<compile_context>
chip_gen: v7x
topology: tpu7x:2x2x1
jax: 0.10.0
libtpu: 0.0.40
codegen_flags: <defaults>
</compile_context>

<pallas_src>
import functools

import jax
import jax.numpy as jnp
from jax import lax
from jax.experimental import pallas as pl
from jax.experimental.pallas import tpu as pltpu

_LANE = 128
_NEG = -3.0e38        # finite "minus infinity" (f32-safe) for max-pool padding
_TM_MAX = 512         # flat spatial rows per matmul tile
_UNROLL = 8           # static-unroll threshold for in-kernel chunk loops


def _round_up(v, m):
    return (v + m - 1) // m * m


def _grid_geom(h, w):
    """Geometry of the zero-ring flat layout for an (h, w) grid.

    Activations travel between kernels as (B, n_pad, Cp): the (h+2)x(w+2)
    zero-padded grid flattened row-major; interior rows are padded up to a
    multiple of the spatial tile so in-kernel chunking uses a fixed size.
    """
    wp = w + 2
    m = (h - 1) * wp + w                 # flat rows spanning the interior
    tm = min(_TM_MAX, _round_up(m, 8))   # spatial matmul tile
    m_pad = _round_up(m, tm)
    n_pad = m_pad + 2 * wp + 2
    ring = wp + 1                        # flat offset of interior row 0
    return wp, m, tm, m_pad, n_pad, ring


def _foreach(n, body):
    """body(c) for c in [0, n): Python-unrolled when short, fori_loop otherwise."""
    if n <= _UNROLL:
        for c in range(n):
            body(c)
    else:
        def _wrap(c, carry):
            body(c)
            return carry
        lax.fori_loop(0, n, _wrap, 0)


def _compiler_params():
    # Generation-aware VMEM limit: leave headroom on v7x (64 MiB/TC), allow more
    # on v5e/v6e (128 MiB).  Tiles are small, so this is belt-and-braces.
    try:
        cap = int(pltpu.get_tpu_info().vmem_capacity_bytes)
    except Exception:  # query unavailable (e.g. interpret mode)
        cap = 64 * 1024 * 1024
    limit = int(min(cap * 3 // 4, 96 * 1024 * 1024))
    return pltpu.CompilerParams(dimension_semantics=("parallel",),
                                vmem_limit_bytes=limit)


# -----------------------------------------------------------------------------
# Weight / bias packing helpers (XLA glue, run once per trace)
# -----------------------------------------------------------------------------
def _flatten_weight(w_hwio, cin_p, cout_p, dtype):
    """(3,3,Cin,Cout) -> zero-pad channels -> (9*Cin_p, Cout_p), (kh,kw,cin) rows."""
    kh, kw, cin, cout = w_hwio.shape
    wpad = jnp.pad(w_hwio, ((0, 0), (0, 0), (0, cin_p - cin), (0, cout_p - cout)))
    return wpad.reshape(kh * kw * cin_p, cout_p).astype(dtype)


def _flatten_weight_first(w_hwio, kp, dp, dtype):
    """First conv: fold (kh,kw,cin) into a single K axis, pad to (kp, dp)."""
    kh, kw, cin, cout = w_hwio.shape
    wf = w_hwio.reshape(kh * kw * cin, cout)
    wf = jnp.pad(wf, ((0, kp - kh * kw * cin), (0, dp - cout)))
    return wf.astype(dtype)


def _pad_bias(b, cout_p):
    return jnp.pad(b, (0, cout_p - b.shape[0])).astype(jnp.float32).reshape(1, cout_p)


# -----------------------------------------------------------------------------
# Pallas kernels
# -----------------------------------------------------------------------------
def _make_first_conv_kernel(*, wp, w_img, m, tm, n_chunks, ring, dp, scratch_rows,
                            out_dtype, pool, ho, wo, wpo, pt, pl_):
    """3x3 'same' conv with folded-K (K already in lanes) matmul tiles, plus an
    optional fused TF-SAME 3x3/stride-2 max pool emitting the pooled zero-ring
    flat layout directly."""
    m_pad = n_chunks * tm

    def conv_chunks(p_ref, w_mat, b_vec, write):
        def chunk(c):
            base = c * tm
            taps = p_ref[0, pl.ds(base, tm), :]                         # (tm, Kp)
            y = jnp.dot(taps, w_mat, preferred_element_type=jnp.float32) + b_vec
            idx = base + lax.broadcasted_iota(jnp.int32, (tm, 1), 0)
            valid = (idx < m) & ((idx % wp) < w_img)
            write(base, y, valid)
        _foreach(n_chunks, chunk)

    if pool:
        def kernel(p_ref, w_ref, b_ref, o_ref, conv_ref):
            w_mat = w_ref[...]
            b_vec = b_ref[...]
            # -inf ring (finite sentinel) so the pool ignores SAME padding.
            conv_ref[0:ring, :] = jnp.full((ring, dp), _NEG, jnp.float32)
            tail = scratch_rows - ring - m_pad
            if tail > 0:
                conv_ref[ring + m_pad:, :] = jnp.full((tail, dp), _NEG, jnp.float32)

            def write(base, y, valid):
                conv_ref[pl.ds(ring + base, tm), :] = jnp.where(valid, y, _NEG)
            conv_chunks(p_ref, w_mat, b_vec, write)

            # ---- fused TF-SAME 3x3 / stride-2 max pool + relayout -----------
            o_ref[...] = jnp.zeros(o_ref.shape, o_ref.dtype)
            # 0/1 selection matrix for the horizontal stride-2 decimation
            # (tiny MXU dot; avoids strided slicing inside the kernel).
            sel = (lax.broadcasted_iota(jnp.int32, (wo, w_img), 1)
                   == 2 * lax.broadcasted_iota(jnp.int32, (wo, w_img), 0) + (1 - pl_)
                   ).astype(jnp.float32)

            def pooled_row(i):
                r0 = 2 * i + (1 - pt)                      # window-top padded row
                r_a = conv_ref[pl.ds(r0 * wp, wp), :]
                r_b = conv_ref[pl.ds((r0 + 1) * wp, wp), :]
                r_c = conv_ref[pl.ds((r0 + 2) * wp, wp), :]
                v = jnp.maximum(jnp.maximum(r_a, r_b), r_c)            # separable: rows
                hrow = jnp.maximum(jnp.maximum(v[0:w_img], v[1:w_img + 1]),
                                   v[2:w_img + 2])                     # then cols
                pooled = jnp.dot(sel, hrow, preferred_element_type=jnp.float32)
                o_ref[0, pl.ds((i + 1) * wpo + 1, wo), :] = pooled.astype(out_dtype)
            _foreach(ho, pooled_row)
        return kernel

    def kernel(p_ref, w_ref, b_ref, o_ref):
        w_mat = w_ref[...]
        b_vec = b_ref[...]
        n_pad = m_pad + 2 * wp + 2
        o_ref[0, 0:ring, :] = jnp.zeros((ring, dp), out_dtype)
        o_ref[0, ring + m_pad:, :] = jnp.zeros((n_pad - ring - m_pad, dp), out_dtype)

        def write(base, y, valid):
            o_ref[0, pl.ds(ring + base, tm), :] = (
                jnp.where(valid, y, 0.0).astype(out_dtype))
        conv_chunks(p_ref, w_mat, b_vec, write)
    return kernel


def _make_res_block_kernel(*, wp, w_img, m, tm, n_chunks, ring, dp, dtype):
    """Fused Impala residual block: relu -> conv0 -> relu -> conv1 -> +residual.

    Both convs are folded-K (9*Cp) matmuls, tiled over the flat spatial dim; the
    intermediate activation lives in a VMEM scratch (never touches HBM)."""
    offs = [kh * wp + kw for kh in range(3) for kw in range(3)]
    m_pad = n_chunks * tm
    n_pad = m_pad + 2 * wp + 2
    tail = n_pad - ring - m_pad

    def kernel(a_ref, w0_ref, b0_ref, w1_ref, b1_ref, o_ref, h_ref):
        w0 = w0_ref[...]
        b0 = b0_ref[...]
        w1 = w1_ref[...]
        b1 = b1_ref[...]

        # Ring/tail rows written with small slice stores (no full-array concat).
        h_ref[0:ring, :] = jnp.zeros((ring, dp), dtype)
        h_ref[ring + m_pad:, :] = jnp.zeros((tail, dp), dtype)
        o_ref[0, 0:ring, :] = jnp.zeros((ring, dp), dtype)
        o_ref[0, ring + m_pad:, :] = jnp.zeros((tail, dp), dtype)

        def valid(base):
            idx = base + lax.broadcasted_iota(jnp.int32, (tm, 1), 0)
            return (idx < m) & ((idx % wp) < w_img)

        def conv0_chunk(c):
            base = c * tm
            taps = jnp.concatenate(
                [jnp.maximum(a_ref[0, pl.ds(base + o, tm), :], 0) for o in offs],
                axis=-1)                                              # (tm, 9*dp)
            hv = jnp.dot(taps, w0, preferred_element_type=jnp.float32) + b0
            hv = jnp.maximum(hv, 0.0)
            hv = jnp.where(valid(base), hv, 0.0)
            h_ref[pl.ds(ring + base, tm), :] = hv.astype(dtype)
        _foreach(n_chunks, conv0_chunk)

        def conv1_chunk(c):
            base = c * tm
            taps = jnp.concatenate(
                [h_ref[pl.ds(base + o, tm), :] for o in offs], axis=-1)
            y = jnp.dot(taps, w1, preferred_element_type=jnp.float32) + b1
            res = a_ref[0, pl.ds(ring + base, tm), :].astype(jnp.float32)
            out = jnp.where(valid(base), y + res, 0.0)
            o_ref[0, pl.ds(ring + base, tm), :] = out.astype(dtype)
        _foreach(n_chunks, conv1_chunk)
    return kernel


# -----------------------------------------------------------------------------
# pallas_call wrappers
# -----------------------------------------------------------------------------
def _first_conv_maxpool(x_nhwc, w_hwio, bias, use_max_pooling, compute_dtype):
    b, h, w, cin = x_nhwc.shape
    assert tuple(w_hwio.shape[:2]) == (3, 3), "only 3x3 kernels supported"
    dim = w_hwio.shape[-1]
    dp = _round_up(dim, _LANE)
    k9 = 9 * cin
    kp = _round_up(k9, _LANE)                    # folded-K lane width
    wp, m, tm, m_pad, n_pad, ring = _grid_geom(h, w)

    # im2col in XLA glue: fold 9 taps x Cin into lanes (K = kp, not 9*pad(Cin)).
    xp = jnp.pad(x_nhwc, ((0, 0), (1, 1), (1, 1), (0, 0)))
    taps = jnp.concatenate(
        [xp[:, kh:kh + h, kw:kw + w, :] for kh in range(3) for kw in range(3)],
        axis=-1)                                                     # (b,h,w,9*cin)
    taps = jnp.pad(taps, ((0, 0), (0, 0), (0, wp - w), (0, kp - k9)))  # (b,h,wp,kp)
    taps = taps.reshape(b, h * wp, kp)
    if m_pad > h * wp:
        taps = jnp.pad(taps, ((0, 0), (0, m_pad - h * wp), (0, 0)))
    elif m_pad < h * wp:
        taps = taps[:, :m_pad]
    taps = taps.astype(compute_dtype)

    wf = _flatten_weight_first(w_hwio, kp, dp, compute_dtype)
    bf = _pad_bias(bias, dp)

    if use_max_pooling:
        ho, wo = -(-h // 2), -(-w // 2)
        pt = max(2 * (ho - 1) + 3 - h, 0) // 2        # TF-SAME top/left padding
        pl_ = max(2 * (wo - 1) + 3 - w, 0) // 2
        wpo = wo + 2
        out_rows = _grid_geom(ho, wo)[4]              # pooled-layout n_pad
        scratch_rows = max((h + 2) * wp, ring + m_pad)
        scratch = [pltpu.VMEM((scratch_rows, dp), jnp.float32)]
    else:
        ho, wo = h, w
        pt = pl_ = 0
        wpo = wp
        out_rows = n_pad
        scratch_rows = 0
        scratch = []

    kernel = _make_first_conv_kernel(
        wp=wp, w_img=w, m=m, tm=tm, n_chunks=m_pad // tm, ring=ring, dp=dp,
        scratch_rows=scratch_rows, out_dtype=compute_dtype, pool=use_max_pooling,
        ho=ho, wo=wo, wpo=wpo, pt=pt, pl_=pl_)

    dsize = jnp.dtype(compute_dtype).itemsize
    flops = 2 * b * m_pad * kp * dp
    bytes_accessed = dsize * (b * m_pad * kp + b * out_rows * dp + kp * dp) + 4 * dp

    flat = pl.pallas_call(
        kernel,
        out_shape=jax.ShapeDtypeStruct((b, out_rows, dp), compute_dtype),
        grid=(b,),
        in_specs=[pl.BlockSpec((1, m_pad, kp), lambda i: (i, 0, 0)),
                  pl.BlockSpec((kp, dp), lambda i: (0, 0)),
                  pl.BlockSpec((1, dp), lambda i: (0, 0))],
        out_specs=pl.BlockSpec((1, out_rows, dp), lambda i: (i, 0, 0)),
        scratch_shapes=scratch,
        compiler_params=_compiler_params(),
        cost_estimate=pl.CostEstimate(flops=flops, transcendentals=0,
                                      bytes_accessed=bytes_accessed),
    )(taps, wf, bf)
    return flat, ho, wo


def _residual_block(a_flat, h, w, w0, b0, w1, b1, compute_dtype):
    b, n_rows, dp = a_flat.shape
    assert tuple(w0.shape[:2]) == (3, 3), "only 3x3 kernels supported"
    wp, m, tm, m_pad, n_pad, ring = _grid_geom(h, w)
    assert n_rows == n_pad, (n_rows, n_pad)

    w0f = _flatten_weight(w0, dp, dp, compute_dtype)
    w1f = _flatten_weight(w1, dp, dp, compute_dtype)
    b0f = _pad_bias(b0, dp)
    b1f = _pad_bias(b1, dp)

    kernel = _make_res_block_kernel(wp=wp, w_img=w, m=m, tm=tm,
                                    n_chunks=m_pad // tm, ring=ring, dp=dp,
                                    dtype=compute_dtype)

    dsize = jnp.dtype(compute_dtype).itemsize
    flops = 2 * 2 * b * m_pad * (9 * dp) * dp
    bytes_accessed = dsize * (2 * b * n_pad * dp + 2 * 9 * dp * dp) + 4 * 2 * dp

    return pl.pallas_call(
        kernel,
        out_shape=jax.ShapeDtypeStruct((b, n_pad, dp), compute_dtype),
        grid=(b,),
        in_specs=[pl.BlockSpec((1, n_pad, dp), lambda i: (i, 0, 0)),
                  pl.BlockSpec((9 * dp, dp), lambda i: (0, 0)),
                  pl.BlockSpec((1, dp), lambda i: (0, 0)),
                  pl.BlockSpec((9 * dp, dp), lambda i: (0, 0)),
                  pl.BlockSpec((1, dp), lambda i: (0, 0))],
        out_specs=pl.BlockSpec((1, n_pad, dp), lambda i: (i, 0, 0)),
        scratch_shapes=[pltpu.VMEM((n_pad, dp), compute_dtype)],
        input_output_aliases={0: 0},
        compiler_params=_compiler_params(),
        cost_estimate=pl.CostEstimate(flops=flops, transcendentals=0,
                                      bytes_accessed=bytes_accessed),
    )(a_flat, w0f, b0f, w1f, b1f)


# -----------------------------------------------------------------------------
# Stage forward (NCHW in / NCHW out, like the PyTorch module)
# -----------------------------------------------------------------------------
@functools.partial(jax.jit, static_argnames=("use_max_pooling", "compute_dtype"))
def impala_residual_stage(x_nchw, params, use_max_pooling=True,
                          compute_dtype=jnp.bfloat16):
    x = jnp.transpose(x_nchw, (0, 2, 3, 1)).astype(jnp.float32)        # -> NHWC
    b = x.shape[0]
    dim = params["first_b"].shape[0]

    flat, h, w = _first_conv_maxpool(x, params["first_w"], params["first_b"],
                                     use_max_pooling, compute_dtype)
    for blk in params["blocks"]:
        flat = _residual_block(flat, h, w, blk["w0"], blk["b0"],
                               blk["w1"], blk["b1"], compute_dtype)

    dp = flat.shape[-1]
    wp = w + 2
    interior = flat[:, wp: wp + h * wp, :]
    out = interior.reshape(b, h, wp, dp)[:, :, 1:1 + w, :dim]
    return jnp.transpose(out, (0, 3, 1, 2)).astype(jnp.float32)        # -> NCHW


# -----------------------------------------------------------------------------
# Deterministic parameter init (HWIO layout, same shapes as the torch module)
# -----------------------------------------------------------------------------
def init_params(key, input_dim, dim, num_blocks=2, kernel_size=(3, 3)):
    kh, kw = kernel_size
    keys = jax.random.split(key, 2 + 4 * num_blocks)
    params = {
        "first_w": 0.1 * jax.random.normal(keys[0], (kh, kw, input_dim, dim), jnp.float32),
        "first_b": 0.1 * jax.random.normal(keys[1], (dim,), jnp.float32),
        "blocks": [],
    }
    for i in range(num_blocks):
        k = keys[2 + 4 * i: 6 + 4 * i]
        params["blocks"].append({
            "w0": 0.1 * jax.random.normal(k[0], (kh, kw, dim, dim), jnp.float32),
            "b0": 0.1 * jax.random.normal(k[1], (dim,), jnp.float32),
            "w1": 0.1 * jax.random.normal(k[2], (kh, kw, dim, dim), jnp.float32),
            "b1": 0.1 * jax.random.normal(k[3], (dim,), jnp.float32),
        })
    return params


# -----------------------------------------------------------------------------
# Pure-JAX reference (sanity check)
# -----------------------------------------------------------------------------
def reference_stage(x_nchw, params):
    x = jnp.transpose(x_nchw, (0, 2, 3, 1))

    def conv(hh, w, b):
        y = lax.conv_general_dilated(
            hh, w, window_strides=(1, 1), padding="SAME",
            dimension_numbers=("NHWC", "HWIO", "NHWC"),
            precision=lax.Precision.HIGHEST)
        return y + b

    out = conv(x, params["first_w"], params["first_b"])
    out = lax.reduce_window(out, -jnp.inf, lax.max,
                            window_dimensions=(1, 3, 3, 1),
                            window_strides=(1, 2, 2, 1), padding="SAME")
    for blk in params["blocks"]:
        h = conv(jax.nn.relu(out), blk["w0"], blk["b0"])
        out = conv(jax.nn.relu(h), blk["w1"], blk["b1"]) + out
    return jnp.transpose(out, (0, 3, 1, 2))


def _check(name, out, ref, atol, rtol):
    max_diff = float(jnp.max(jnp.abs(out - ref)))
    if not bool(jnp.allclose(out, ref, atol=atol, rtol=rtol)):
        raise AssertionError(f"{name}: Pallas vs reference mismatch, "
                             f"max abs diff = {max_diff}")


if __name__ == "__main__":
    B, C_IN, H, W = 2, 4, 16, 16
    DIM, NUM_BLOCKS = 8, 2

    key = jax.random.PRNGKey(0)
    kx, kparams = jax.random.split(key)
    x = jax.random.normal(kx, (B, C_IN, H, W), jnp.float32)
    params = init_params(kparams, C_IN, DIM, num_blocks=NUM_BLOCKS)

    ref = jax.block_until_ready(reference_stage(x, params))

    # Exact-math path (f32 MXU operands).
    out_f32 = jax.block_until_ready(
        impala_residual_stage(x, params, compute_dtype=jnp.float32))
    assert out_f32.shape == (B, DIM, H // 2, W // 2), out_f32.shape
    _check("f32", out_f32, ref, atol=2e-3, rtol=2e-3)

    # Performance path (bf16 MXU operands + bf16 activations, f32 accumulation).
    out_bf16 = jax.block_until_ready(impala_residual_stage(x, params))
    assert out_bf16.shape == (B, DIM, H // 2, W // 2), out_bf16.shape
    _check("bf16", out_bf16, ref, atol=5e-2, rtol=5e-2)

    # Odd / non-square spatial size exercises the TF-SAME pool decimation offsets.
    b2, c2, h2, w2, d2 = 1, 3, 9, 11, 16
    x2 = jax.random.normal(jax.random.PRNGKey(1), (b2, c2, h2, w2), jnp.float32)
    p2 = init_params(jax.random.PRNGKey(2), c2, d2, num_blocks=1)
    ref2 = jax.block_until_ready(reference_stage(x2, p2))
    out2 = jax.block_until_ready(
        impala_residual_stage(x2, p2, compute_dtype=jnp.float32))
    assert out2.shape == (b2, d2, (h2 + 1) // 2, (w2 + 1) // 2), out2.shape
    _check("odd-size f32", out2, ref2, atol=2e-3, rtol=2e-3)

    print("KERNEL_OK")
</pallas_src>

<mosaic_0001>
module attributes {stable_mosaic.version = 11 : i64} {
  func.func @kernel(%arg0: i32, %arg1: memref<1x288x128xf32, #tpu.memory_space<vmem>>, %arg2: memref<128x128xf32, #tpu.memory_space<vmem>>, %arg3: memref<1x128xf32, #tpu.memory_space<vmem>>, %arg4: memref<1x102x128xf32, #tpu.memory_space<vmem>>, %arg5: memref<324x128xf32, #tpu.memory_space<vmem>>) attributes {dimension_semantics = [#tpu.dimension_semantics<parallel>], iteration_bounds = array<i64: 2>, scalar_prefetch = 0 : i64, scratch_operands = 1 : i64, tpu.core_type = #tpu.core_type<tc>, window_params = [{transform_indices = @transform_0, window_bounds = array<i64: 1, 288, 128>}, {pipeline_mode = #tpu.pipeline_mode<synchronous>, transform_indices = @transform_1, window_bounds = array<i64: 128, 128>}, {pipeline_mode = #tpu.pipeline_mode<synchronous>, transform_indices = @transform_2, window_bounds = array<i64: 1, 128>}, {transform_indices = @transform_3, window_bounds = array<i64: 1, 102, 128>}]} {
    %c0 = arith.constant 0 : index
    %c0_0 = arith.constant 0 : index
    %0 = vector.load %arg2[%c0, %c0_0] : memref<128x128xf32, #tpu.memory_space<vmem>>, vector<128x128xf32>
    %c0_1 = arith.constant 0 : index
    %c0_2 = arith.constant 0 : index
    %1 = vector.load %arg3[%c0_1, %c0_2] : memref<1x128xf32, #tpu.memory_space<vmem>>, vector<1x128xf32>
    %cst = arith.constant -3.000000e+38 : f32
    %2 = vector.broadcast %cst : f32 to vector<19x128xf32>
    %c0_3 = arith.constant 0 : index
    %c0_4 = arith.constant 0 : index
    %3 = vector.load %arg5[%c0_3, %c0_4] : memref<324x128xf32, #tpu.memory_space<vmem>>, vector<19x128xf32>
    tpu.vector_store %arg5[%c0_3, %c0_4], %2 {strides = array<i32>} : memref<324x128xf32, #tpu.memory_space<vmem>>, vector<19x128xf32>,
    %cst_5 = arith.constant -3.000000e+38 : f32
    %4 = vector.broadcast %cst_5 : f32 to vector<17x128xf32>
    %c307 = arith.constant 307 : index
    %c0_6 = arith.constant 0 : index
    %5 = vector.load %arg5[%c307, %c0_6] : memref<324x128xf32, #tpu.memory_space<vmem>>, vector<17x128xf32>
    tpu.vector_store %arg5[%c307, %c0_6], %4 {strides = array<i32>} : memref<324x128xf32, #tpu.memory_space<vmem>>, vector<17x128xf32>,
    %c0_7 = arith.constant 0 : index
    %c0_8 = arith.constant 0 : index
    %c0_9 = arith.constant 0 : index
    %6 = vector.load %arg1[%c0_7, %c0_8, %c0_9] : memref<1x288x128xf32, #tpu.memory_space<vmem>>, vector<1x288x128xf32>
    %7 = vector.shape_cast %6 : vector<1x288x128xf32> to vector<288x128xf32>
    %cst_10 = arith.constant dense<0.000000e+00> : vector<288x128xf32>
    %8 = tpu.matmul %7, %0, %cst_10 {dimension_numbers = #tpu.dot_dimension_numbers<[1], [0], [0], [1], [0, 0, 1, 1], [], []>} : vector<288x128xf32>, vector<128x128xf32>, vector<288x128xf32> -> vector<288x128xf32>
    %9 = vector.broadcast %1 : vector<1x128xf32> to vector<288x128xf32>
    %10 = arith.addf %8, %9 : vector<288x128xf32>
    %11 = tpu.iota {dimensions = array<i32: 0>} : vector<288x1xi32>
    %c0_i32 = arith.constant 0 : i32
    %12 = vector.broadcast %c0_i32 : i32 to vector<288x1xi32>
    %13 = arith.addi %12, %11 : vector<288x1xi32>
    %c286_i32 = arith.constant 286 : i32
    %14 = vector.broadcast %c286_i32 : i32 to vector<288x1xi32>
    %15 = arith.cmpi slt, %13, %14 : vector<288x1xi32>
    %c18_i32 = arith.constant 18 : i32
    %c0_i32_11 = arith.constant 0 : i32
    %16 = arith.cmpi eq, %c18_i32, %c0_i32_11 : i32
    %c1_i32 = arith.constant 1 : i32
    %17 = arith.select %16, %c1_i32, %c18_i32 : i32
    %18 = vector.broadcast %17 : i32 to vector<288x1xi32>
    %19 = arith.remsi %13, %18 : vector<288x1xi32>
    %c0_i32_12 = arith.constant 0 : i32
    %20 = vector.broadcast %c0_i32_12 : i32 to vector<288x1xi32>
    %21 = arith.cmpi ne, %19, %20 : vector<288x1xi32>
    %c0_i32_13 = arith.constant 0 : i32
    %22 = vector.broadcast %c0_i32_13 : i32 to vector<288x1xi32>
    %23 = arith.cmpi slt, %19, %22 : vector<288x1xi32>
    %c0_i32_14 = arith.constant 0 : i32
    %24 = arith.cmpi slt, %17, %c0_i32_14 : i32
    %25 = vector.broadcast %24 : i1 to vector<288x1xi1>
    %26 = vector.broadcast %25 : vector<288x1xi1> to vector<288x1xi1>
    %27 = arith.xori %23, %26 : vector<288x1xi1>
    %28 = arith.andi %27, %21 : vector<288x1xi1>
    %29 = vector.broadcast %17 : i32 to vector<288x1xi32>
    %30 = arith.addi %19, %29 : vector<288x1xi32>
    %31 = arith.select %28, %30, %19 : vector<288x1xi1>, vector<288x1xi32>
    %c16_i32 = arith.constant 16 : i32
    %32 = vector.broadcast %c16_i32 : i32 to vector<288x1xi32>
    %33 = arith.cmpi slt, %31, %32 : vector<288x1xi32>
    %34 = arith.andi %15, %33 : vector<288x1xi1>
    %cst_15 = arith.constant -3.000000e+38 : f32
    %35 = vector.shape_cast %34 : vector<288x1xi1> to vector<288x1xi1>
    %36 = vector.broadcast %35 : vector<288x1xi1> to vector<288x128xi1>
    %37 = vector.broadcast %cst_15 : f32 to vector<288x128xf32>
    %38 = arith.select %36, %10, %37 : vector<288x128xi1>, vector<288x128xf32>
    %c19 = arith.constant 19 : index
    %c0_16 = arith.constant 0 : index
    %39 = vector.load %arg5[%c19, %c0_16] : memref<324x128xf32, #tpu.memory_space<vmem>>, vector<288x128xf32>
    tpu.vector_store %arg5[%c19, %c0_16], %38 {strides = array<i32>} : memref<324x128xf32, #tpu.memory_space<vmem>>, vector<288x128xf32>,
    %cst_17 = arith.constant 0.000000e+00 : f32
    %40 = vector.broadcast %cst_17 : f32 to vector<1x102x128xf32>
    %c0_18 = arith.constant 0 : index
    %c0_19 = arith.constant 0 : index
    %c0_20 = arith.constant 0 : index
    %41 = vector.load %arg4[%c0_18, %c0_19, %c0_20] : memref<1x102x128xf32, #tpu.memory_space<vmem>>, vector<1x102x128xf32>
    tpu.vector_store %arg4[%c0_18, %c0_19, %c0_20], %40 {strides = array<i32>} : memref<1x102x128xf32, #tpu.memory_space<vmem>>, vector<1x102x128xf32>,
    %42 = tpu.iota {dimensions = array<i32: 1>} : vector<8x16xi32>
    %43 = tpu.iota {dimensions = array<i32: 0>} : vector<8x16xi32>
    %c2_i32 = arith.constant 2 : i32
    %44 = vector.broadcast %c2_i32 : i32 to vector<8x16xi32>
    %45 = arith.muli %44, %43 : vector<8x16xi32>
    %c1_i32_21 = arith.constant 1 : i32
    %46 = vector.broadcast %c1_i32_21 : i32 to vector<8x16xi32>
    %47 = arith.addi %45, %46 : vector<8x16xi32>
    %48 = arith.cmpi eq, %42, %47 : vector<8x16xi32>
    %49 = arith.extui %48 : vector<8x16xi1> to vector<8x16xi32>
    %50 = arith.sitofp %49 : vector<8x16xi32> to vector<8x16xf32>
    %c18 = arith.constant 18 : index
    %c0_22 = arith.constant 0 : index
    %51 = vector.load %arg5[%c18, %c0_22] : memref<324x128xf32, #tpu.memory_space<vmem>>, vector<18x128xf32>
    %c36 = arith.constant 36 : index
    %c0_23 = arith.constant 0 : index
    %52 = vector.load %arg5[%c36, %c0_23] : memref<324x128xf32, #tpu.memory_space<vmem>>, vector<18x128xf32>
    %c54 = arith.constant 54 : index
    %c0_24 = arith.constant 0 : index
    %53 = vector.load %arg5[%c54, %c0_24] : memref<324x128xf32, #tpu.memory_space<vmem>>, vector<18x128xf32>
    %54 = arith.maximumf %51, %52 : vector<18x128xf32>
    %55 = arith.maximumf %54, %53 : vector<18x128xf32>
    %56 = vector.extract_strided_slice %55 {offsets = [0, 0], sizes = [16, 128], strides = [1, 1]} : vector<18x128xf32> to vector<16x128xf32>
    %57 = vector.extract_strided_slice %55 {offsets = [1, 0], sizes = [16, 128], strides = [1, 1]} : vector<18x128xf32> to vector<16x128xf32>
    %58 = arith.maximumf %56, %57 : vector<16x128xf32>
    %59 = vector.extract_strided_slice %55 {offsets = [2, 0], sizes = [16, 128], strides = [1, 1]} : vector<18x128xf32> to vector<16x128xf32>
    %60 = arith.maximumf %58, %59 : vector<16x128xf32>
    %cst_25 = arith.constant dense<0.000000e+00> : vector<8x128xf32>
    %61 = tpu.matmul %50, %60, %cst_25 {dimension_numbers = #tpu.dot_dimension_numbers<[1], [0], [0], [1], [0, 0, 1, 1], [], []>} : vector<8x16xf32>, vector<16x128xf32>, vector<8x128xf32> -> vector<8x128xf32>
    %c0_26 = arith.constant 0 : index
    %c11 = arith.constant 11 : index
    %c0_27 = arith.constant 0 : index
    %62 = vector.load %arg4[%c0_26, %c11, %c0_27] : memref<1x102x128xf32, #tpu.memory_space<vmem>>, vector<1x8x128xf32>
    %63 = vector.shape_cast %62 : vector<1x8x128xf32> to vector<8x128xf32>
    %64 = vector.shape_cast %61 : vector<8x128xf32> to vector<1x8x128xf32>
    tpu.vector_store %arg4[%c0_26, %c11, %c0_27], %64 {strides = array<i32>} : memref<1x102x128xf32, #tpu.memory_space<vmem>>, vector<1x8x128xf32>,
    %c54_28 = arith.constant 54 : index
    %c0_29 = arith.constant 0 : index
    %65 = vector.load %arg5[%c54_28, %c0_29] : memref<324x128xf32, #tpu.memory_space<vmem>>, vector<18x128xf32>
    %c72 = arith.constant 72 : index
    %c0_30 = arith.constant 0 : index
    %66 = vector.load %arg5[%c72, %c0_30] : memref<324x128xf32, #tpu.memory_space<vmem>>, vector<18x128xf32>
    %c90 = arith.constant 90 : index
    %c0_31 = arith.constant 0 : index
    %67 = vector.load %arg5[%c90, %c0_31] : memref<324x128xf32, #tpu.memory_space<vmem>>, vector<18x128xf32>
    %68 = arith.maximumf %65, %66 : vector<18x128xf32>
    %69 = arith.maximumf %68, %67 : vector<18x128xf32>
    %70 = vector.extract_strided_slice %69 {offsets = [0, 0], sizes = [16, 128], strides = [1, 1]} : vector<18x128xf32> to vector<16x128xf32>
    %71 = vector.extract_strided_slice %69 {offsets = [1, 0], sizes = [16, 128], strides = [1, 1]} : vector<18x128xf32> to vector<16x128xf32>
    %72 = arith.maximumf %70, %71 : vector<16x128xf32>
    %73 = vector.extract_strided_slice %69 {offsets = [2, 0], sizes = [16, 128], strides = [1, 1]} : vector<18x128xf32> to vector<16x128xf32>
    %74 = arith.maximumf %72, %73 : vector<16x128xf32>
    %cst_32 = arith.constant dense<0.000000e+00> : vector<8x128xf32>
    %75 = tpu.matmul %50, %74, %cst_32 {dimension_numbers = #tpu.dot_dimension_numbers<[1], [0], [0], [1], [0, 0, 1, 1], [], []>} : vector<8x16xf32>, vector<16x128xf32>, vector<8x128xf32> -> vector<8x128xf32>
    %c0_33 = arith.constant 0 : index
    %c21 = arith.constant 21 : index
    %c0_34 = arith.constant 0 : index
    %76 = vector.load %arg4[%c0_33, %c21, %c0_34] : memref<1x102x128xf32, #tpu.memory_space<vmem>>, vector<1x8x128xf32>
    %77 = vector.shape_cast %76 : vector<1x8x128xf32> to vector<8x128xf32>
    %78 = vector.shape_cast %75 : vector<8x128xf32> to vector<1x8x128xf32>
    tpu.vector_store %arg4[%c0_33, %c21, %c0_34], %78 {strides = array<i32>} : memref<1x102x128xf32, #tpu.memory_space<vmem>>, vector<1x8x128xf32>,
    %c90_35 = arith.constant 90 : index
    %c0_36 = arith.constant 0 : index
    %79 = vector.load %arg5[%c90_35, %c0_36] : memref<324x128xf32, #tpu.memory_space<vmem>>, vector<18x128xf32>
    %c108 = arith.constant 108 : index
    %c0_37 = arith.constant 0 : index
    %80 = vector.load %arg5[%c108, %c0_37] : memref<324x128xf32, #tpu.memory_space<vmem>>, vector<18x128xf32>
    %c126 = arith.constant 126 : index
    %c0_38 = arith.constant 0 : index
    %81 = vector.load %arg5[%c126, %c0_38] : memref<324x128xf32, #tpu.memory_space<vmem>>, vector<18x128xf32>
    %82 = arith.maximumf %79, %80 : vector<18x128xf32>
    %83 = arith.maximumf %82, %81 : vector<18x128xf32>
    %84 = vector.extract_strided_slice %83 {offsets = [0, 0], sizes = [16, 128], strides = [1, 1]} : vector<18x128xf32> to vector<16x128xf32>
    %85 = vector.extract_strided_slice %83 {offsets = [1, 0], sizes = [16, 128], strides = [1, 1]} : vector<18x128xf32> to vector<16x128xf32>
    %86 = arith.maximumf %84, %85 : vector<16x128xf32>
    %87 = vector.extract_strided_slice %83 {offsets = [2, 0], sizes = [16, 128], strides = [1, 1]} : vector<18x128xf32> to vector<16x128xf32>
    %88 = arith.maximumf %86, %87 : vector<16x128xf32>
    %cst_39 = arith.constant dense<0.000000e+00> : vector<8x128xf32>
    %89 = tpu.matmul %50, %88, %cst_39 {dimension_numbers = #tpu.dot_dimension_numbers<[1], [0], [0], [1], [0, 0, 1, 1], [], []>} : vector<8x16xf32>, vector<16x128xf32>, vector<8x128xf32> -> vector<8x128xf32>
    %c0_40 = arith.constant 0 : index
    %c31 = arith.constant 31 : index
    %c0_41 = arith.constant 0 : index
    %90 = vector.load %arg4[%c0_40, %c31, %c0_41] : memref<1x102x128xf32, #tpu.memory_space<vmem>>, vector<1x8x128xf32>
    %91 = vector.shape_cast %90 : vector<1x8x128xf32> to vector<8x128xf32>
    %92 = vector.shape_cast %89 : vector<8x128xf32> to vector<1x8x128xf32>
    tpu.vector_store %arg4[%c0_40, %c31, %c0_41], %92 {strides = array<i32>} : memref<1x102x128xf32, #tpu.memory_space<vmem>>, vector<1x8x128xf32>,
    %c126_42 = arith.constant 126 : index
    %c0_43 = arith.constant 0 : index
    %93 = vector.load %arg5[%c126_42, %c0_43] : memref<324x128xf32, #tpu.memory_space<vmem>>, vector<18x128xf32>
    %c144 = arith.constant 144 : index
    %c0_44 = arith.constant 0 : index
    %94 = vector.load %arg5[%c144, %c0_44] : memref<324x128xf32, #tpu.memory_space<vmem>>, vector<18x128xf32>
    %c162 = arith.constant 162 : index
    %c0_45 = arith.constant 0 : index
    %95 = vector.load %arg5[%c162, %c0_45] : memref<324x128xf32, #tpu.memory_space<vmem>>, vector<18x128xf32>
    %96 = arith.maximumf %93, %94 : vector<18x128xf32>
    %97 = arith.maximumf %96, %95 : vector<18x128xf32>
    %98 = vector.extract_strided_slice %97 {offsets = [0, 0], sizes = [16, 128], strides = [1, 1]} : vector<18x128xf32> to vector<16x128xf32>
    %99 = vector.extract_strided_slice %97 {offsets = [1, 0], sizes = [16, 128], strides = [1, 1]} : vector<18x128xf32> to vector<16x128xf32>
    %100 = arith.maximumf %98, %99 : vector<16x128xf32>
    %101 = vector.extract_strided_slice %97 {offsets = [2, 0], sizes = [16, 128], strides = [1, 1]} : vector<18x128xf32> to vector<16x128xf32>
    %102 = arith.maximumf %100, %101 : vector<16x128xf32>
    %cst_46 = arith.constant dense<0.000000e+00> : vector<8x128xf32>
    %103 = tpu.matmul %50, %102, %cst_46 {dimension_numbers = #tpu.dot_dimension_numbers<[1], [0], [0], [1], [0, 0, 1, 1], [], []>} : vector<8x16xf32>, vector<16x128xf32>, vector<8x128xf32> -> vector<8x128xf32>
    %c0_47 = arith.constant 0 : index
    %c41 = arith.constant 41 : index
    %c0_48 = arith.constant 0 : index
    %104 = vector.load %arg4[%c0_47, %c41, %c0_48] : memref<1x102x128xf32, #tpu.memory_space<vmem>>, vector<1x8x128xf32>
    %105 = vector.shape_cast %104 : vector<1x8x128xf32> to vector<8x128xf32>
    %106 = vector.shape_cast %103 : vector<8x128xf32> to vector<1x8x128xf32>
    tpu.vector_store %arg4[%c0_47, %c41, %c0_48], %106 {strides = array<i32>} : memref<1x102x128xf32, #tpu.memory_space<vmem>>, vector<1x8x128xf32>,
    %c162_49 = arith.constant 162 : index
    %c0_50 = arith.constant 0 : index
    %107 = vector.load %arg5[%c162_49, %c0_50] : memref<324x128xf32, #tpu.memory_space<vmem>>, vector<18x128xf32>
    %c180 = arith.constant 180 : index
    %c0_51 = arith.constant 0 : index
    %108 = vector.load %arg5[%c180, %c0_51] : memref<324x128xf32, #tpu.memory_space<vmem>>, vector<18x128xf32>
    %c198 = arith.constant 198 : index
    %c0_52 = arith.constant 0 : index
    %109 = vector.load %arg5[%c198, %c0_52] : memref<324x128xf32, #tpu.memory_space<vmem>>, vector<18x128xf32>
    %110 = arith.maximumf %107, %108 : vector<18x128xf32>
    %111 = arith.maximumf %110, %109 : vector<18x128xf32>
    %112 = vector.extract_strided_slice %111 {offsets = [0, 0], sizes = [16, 128], strides = [1, 1]} : vector<18x128xf32> to vector<16x128xf32>
    %113 = vector.extract_strided_slice %111 {offsets = [1, 0], sizes = [16, 128], strides = [1, 1]} : vector<18x128xf32> to vector<16x128xf32>
    %114 = arith.maximumf %112, %113 : vector<16x128xf32>
    %115 = vector.extract_strided_slice %111 {offsets = [2, 0], sizes = [16, 128], strides = [1, 1]} : vector<18x128xf32> to vector<16x128xf32>
    %116 = arith.maximumf %114, %115 : vector<16x128xf32>
    %cst_53 = arith.constant dense<0.000000e+00> : vector<8x128xf32>
    %117 = tpu.matmul %50, %116, %cst_53 {dimension_numbers = #tpu.dot_dimension_numbers<[1], [0], [0], [1], [0, 0, 1, 1], [], []>} : vector<8x16xf32>, vector<16x128xf32>, vector<8x128xf32> -> vector<8x128xf32>
    %c0_54 = arith.constant 0 : index
    %c51 = arith.constant 51 : index
    %c0_55 = arith.constant 0 : index
    %118 = vector.load %arg4[%c0_54, %c51, %c0_55] : memref<1x102x128xf32, #tpu.memory_space<vmem>>, vector<1x8x128xf32>
    %119 = vector.shape_cast %118 : vector<1x8x128xf32> to vector<8x128xf32>
    %120 = vector.shape_cast %117 : vector<8x128xf32> to vector<1x8x128xf32>
    tpu.vector_store %arg4[%c0_54, %c51, %c0_55], %120 {strides = array<i32>} : memref<1x102x128xf32, #tpu.memory_space<vmem>>, vector<1x8x128xf32>,
    %c198_56 = arith.constant 198 : index
    %c0_57 = arith.constant 0 : index
    %121 = vector.load %arg5[%c198_56, %c0_57] : memref<324x128xf32, #tpu.memory_space<vmem>>, vector<18x128xf32>
    %c216 = arith.constant 216 : index
    %c0_58 = arith.constant 0 : index
    %122 = vector.load %arg5[%c216, %c0_58] : memref<324x128xf32, #tpu.memory_space<vmem>>, vector<18x128xf32>
    %c234 = arith.constant 234 : index
    %c0_59 = arith.constant 0 : index
    %123 = vector.load %arg5[%c234, %c0_59] : memref<324x128xf32, #tpu.memory_space<vmem>>, vector<18x128xf32>
    %124 = arith.maximumf %121, %122 : vector<18x128xf32>
    %125 = arith.maximumf %124, %123 : vector<18x128xf32>
    %126 = vector.extract_strided_slice %125 {offsets = [0, 0], sizes = [16, 128], strides = [1, 1]} : vector<18x128xf32> to vector<16x128xf32>
    %127 = vector.extract_strided_slice %125 {offsets = [1, 0], sizes = [16, 128], strides = [1, 1]} : vector<18x128xf32> to vector<16x128xf32>
    %128 = arith.maximumf %126, %127 : vector<16x128xf32>
    %129 = vector.extract_strided_slice %125 {offsets = [2, 0], sizes = [16, 128], strides = [1, 1]} : vector<18x128xf32> to vector<16x128xf32>
    %130 = arith.maximumf %128, %129 : vector<16x128xf32>
    %cst_60 = arith.constant dense<0.000000e+00> : vector<8x128xf32>
    %131 = tpu.matmul %50, %130, %cst_60 {dimension_numbers = #tpu.dot_dimension_numbers<[1], [0], [0], [1], [0, 0, 1, 1], [], []>} : vector<8x16xf32>, vector<16x128xf32>, vector<8x128xf32> -> vector<8x128xf32>
    %c0_61 = arith.constant 0 : index
    %c61 = arith.constant 61 : index
    %c0_62 = arith.constant 0 : index
    %132 = vector.load %arg4[%c0_61, %c61, %c0_62] : memref<1x102x128xf32, #tpu.memory_space<vmem>>, vector<1x8x128xf32>
    %133 = vector.shape_cast %132 : vector<1x8x128xf32> to vector<8x128xf32>
    %134 = vector.shape_cast %131 : vector<8x128xf32> to vector<1x8x128xf32>
    tpu.vector_store %arg4[%c0_61, %c61, %c0_62], %134 {strides = array<i32>} : memref<1x102x128xf32, #tpu.memory_space<vmem>>, vector<1x8x128xf32>,
    %c234_63 = arith.constant 234 : index
    %c0_64 = arith.constant 0 : index
    %135 = vector.load %arg5[%c234_63, %c0_64] : memref<324x128xf32, #tpu.memory_space<vmem>>, vector<18x128xf32>
    %c252 = arith.constant 252 : index
    %c0_65 = arith.constant 0 : index
    %136 = vector.load %arg5[%c252, %c0_65] : memref<324x128xf32, #tpu.memory_space<vmem>>, vector<18x128xf32>
    %c270 = arith.constant 270 : index
    %c0_66 = arith.constant 0 : index
    %137 = vector.load %arg5[%c270, %c0_66] : memref<324x128xf32, #tpu.memory_space<vmem>>, vector<18x128xf32>
    %138 = arith.maximumf %135, %136 : vector<18x128xf32>
    %139 = arith.maximumf %138, %137 : vector<18x128xf32>
    %140 = vector.extract_strided_slice %139 {offsets = [0, 0], sizes = [16, 128], strides = [1, 1]} : vector<18x128xf32> to vector<16x128xf32>
    %141 = vector.extract_strided_slice %139 {offsets = [1, 0], sizes = [16, 128], strides = [1, 1]} : vector<18x128xf32> to vector<16x128xf32>
    %142 = arith.maximumf %140, %141 : vector<16x128xf32>
    %143 = vector.extract_strided_slice %139 {offsets = [2, 0], sizes = [16, 128], strides = [1, 1]} : vector<18x128xf32> to vector<16x128xf32>
    %144 = arith.maximumf %142, %143 : vector<16x128xf32>
    %cst_67 = arith.constant dense<0.000000e+00> : vector<8x128xf32>
    %145 = tpu.matmul %50, %144, %cst_67 {dimension_numbers = #tpu.dot_dimension_numbers<[1], [0], [0], [1], [0, 0, 1, 1], [], []>} : vector<8x16xf32>, vector<16x128xf32>, vector<8x128xf32> -> vector<8x128xf32>
    %c0_68 = arith.constant 0 : index
    %c71 = arith.constant 71 : index
    %c0_69 = arith.constant 0 : index
    %146 = vector.load %arg4[%c0_68, %c71, %c0_69] : memref<1x102x128xf32, #tpu.memory_space<vmem>>, vector<1x8x128xf32>
    %147 = vector.shape_cast %146 : vector<1x8x128xf32> to vector<8x128xf32>
    %148 = vector.shape_cast %145 : vector<8x128xf32> to vector<1x8x128xf32>
    tpu.vector_store %arg4[%c0_68, %c71, %c0_69], %148 {strides = array<i32>} : memref<1x102x128xf32, #tpu.memory_space<vmem>>, vector<1x8x128xf32>,
    %c270_70 = arith.constant 270 : index
    %c0_71 = arith.constant 0 : index
    %149 = vector.load %arg5[%c270_70, %c0_71] : memref<324x128xf32, #tpu.memory_space<vmem>>, vector<18x128xf32>
    %c288 = arith.constant 288 : index
    %c0_72 = arith.constant 0 : index
    %150 = vector.load %arg5[%c288, %c0_72] : memref<324x128xf32, #tpu.memory_space<vmem>>, vector<18x128xf32>
    %c306 = arith.constant 306 : index
    %c0_73 = arith.constant 0 : index
    %151 = vector.load %arg5[%c306, %c0_73] : memref<324x128xf32, #tpu.memory_space<vmem>>, vector<18x128xf32>
    %152 = arith.maximumf %149, %150 : vector<18x128xf32>
    %153 = arith.maximumf %152, %151 : vector<18x128xf32>
    %154 = vector.extract_strided_slice %153 {offsets = [0, 0], sizes = [16, 128], strides = [1, 1]} : vector<18x128xf32> to vector<16x128xf32>
    %155 = vector.extract_strided_slice %153 {offsets = [1, 0], sizes = [16, 128], strides = [1, 1]} : vector<18x128xf32> to vector<16x128xf32>
    %156 = arith.maximumf %154, %155 : vector<16x128xf32>
    %157 = vector.extract_strided_slice %153 {offsets = [2, 0], sizes = [16, 128], strides = [1, 1]} : vector<18x128xf32> to vector<16x128xf32>
    %158 = arith.maximumf %156, %157 : vector<16x128xf32>
    %cst_74 = arith.constant dense<0.000000e+00> : vector<8x128xf32>
    %159 = tpu.matmul %50, %158, %cst_74 {dimension_numbers = #tpu.dot_dimension_numbers<[1], [0], [0], [1], [0, 0, 1, 1], [], []>} : vector<8x16xf32>, vector<16x128xf32>, vector<8x128xf32> -> vector<8x128xf32>
    %c0_75 = arith.constant 0 : index
    %c81 = arith.constant 81 : index
    %c0_76 = arith.constant 0 : index
    %160 = vector.load %arg4[%c0_75, %c81, %c0_76] : memref<1x102x128xf32, #tpu.memory_space<vmem>>, vector<1x8x128xf32>
    %161 = vector.shape_cast %160 : vector<1x8x128xf32> to vector<8x128xf32>
    %162 = vector.shape_cast %159 : vector<8x128xf32> to vector<1x8x128xf32>
    tpu.vector_store %arg4[%c0_75, %c81, %c0_76], %162 {strides = array<i32>} : memref<1x102x128xf32, #tpu.memory_space<vmem>>, vector<1x8x128xf32>,
    return
  }
  func.func @transform_0(%arg0: i32) -> (i32, i32, i32) {
    %c0_i32 = arith.constant 0 : i32
    %c0_i32_0 = arith.constant 0 : i32
    %c0_i32_1 = arith.constant 0 : i32
    return %arg0, %c0_i32, %c0_i32_0 : i32, i32, i32
  }
  func.func @transform_1(%arg0: i32) -> (i32, i32) {
    %c0_i32 = arith.constant 0 : i32
    %c0_i32_0 = arith.constant 0 : i32
    %c0_i32_1 = arith.constant 0 : i32
    return %c0_i32, %c0_i32_0 : i32, i32
  }
  func.func @transform_2(%arg0: i32) -> (i32, i32) {
    %c0_i32 = arith.constant 0 : i32
    %c0_i32_0 = arith.constant 0 : i32
    %c0_i32_1 = arith.constant 0 : i32
    return %c0_i32, %c0_i32_0 : i32, i32
  }
  func.func @transform_3(%arg0: i32) -> (i32, i32, i32) {
    %c0_i32 = arith.constant 0 : i32
    %c0_i32_0 = arith.constant 0 : i32
    %c0_i32_1 = arith.constant 0 : i32
    return %arg0, %c0_i32, %c0_i32_0 : i32, i32, i32
  }
}

module attributes {stable_mosaic.version = 11 : i64} {
  func.func @kernel(%arg0: i32, %arg1: memref<1x102x128xf32, #tpu.memory_space<vmem>>, %arg2: memref<1152x128xf32, #tpu.memory_space<vmem>>, %arg3: memref<1x128xf32, #tpu.memory_space<vmem>>, %arg4: memref<1152x128xf32, #tpu.memory_space<vmem>>, %arg5: memref<1x128xf32, #tpu.memory_space<vmem>>, %arg6: memref<1x102x128xf32, #tpu.memory_space<vmem>>, %arg7: memref<102x128xf32, #tpu.memory_space<vmem>>) attributes {dimension_semantics = [#tpu.dimension_semantics<parallel>], iteration_bounds = array<i64: 2>, scalar_prefetch = 0 : i64, scratch_operands = 1 : i64, tpu.core_type = #tpu.core_type<tc>, window_params = [{transform_indices = @transform_0, window_bounds = array<i64: 1, 102, 128>}, {pipeline_mode = #tpu.pipeline_mode<synchronous>, transform_indices = @transform_1, window_bounds = array<i64: 1152, 128>}, {pipeline_mode = #tpu.pipeline_mode<synchronous>, transform_indices = @transform_2, window_bounds = array<i64: 1, 128>}, {pipeline_mode = #tpu.pipeline_mode<synchronous>, transform_indices = @transform_3, window_bounds = array<i64: 1152, 128>}, {pipeline_mode = #tpu.pipeline_mode<synchronous>, transform_indices = @transform_4, window_bounds = array<i64: 1, 128>}, {transform_indices = @transform_5, window_bounds = array<i64: 1, 102, 128>}]} {
    %c0 = arith.constant 0 : index
    %c0_0 = arith.constant 0 : index
    %0 = vector.load %arg2[%c0, %c0_0] : memref<1152x128xf32, #tpu.memory_space<vmem>>, vector<1152x128xf32>
    %c0_1 = arith.constant 0 : index
    %c0_2 = arith.constant 0 : index
    %1 = vector.load %arg3[%c0_1, %c0_2] : memref<1x128xf32, #tpu.memory_space<vmem>>, vector<1x128xf32>
    %c0_3 = arith.constant 0 : index
    %c0_4 = arith.constant 0 : index
    %2 = vector.load %arg4[%c0_3, %c0_4] : memref<1152x128xf32, #tpu.memory_space<vmem>>, vector<1152x128xf32>
    %c0_5 = arith.constant 0 : index
    %c0_6 = arith.constant 0 : index
    %3 = vector.load %arg5[%c0_5, %c0_6] : memref<1x128xf32, #tpu.memory_space<vmem>>, vector<1x128xf32>
    %cst = arith.constant 0.000000e+00 : f32
    %4 = vector.broadcast %cst : f32 to vector<11x128xf32>
    %c0_7 = arith.constant 0 : index
    %c0_8 = arith.constant 0 : index
    %5 = vector.load %arg7[%c0_7, %c0_8] : memref<102x128xf32, #tpu.memory_space<vmem>>, vector<11x128xf32>
    tpu.vector_store %arg7[%c0_7, %c0_8], %4 {strides = array<i32>} : memref<102x128xf32, #tpu.memory_space<vmem>>, vector<11x128xf32>,
    %cst_9 = arith.constant 0.000000e+00 : f32
    %6 = vector.broadcast %cst_9 : f32 to vector<11x128xf32>
    %c91 = arith.constant 91 : index
    %c0_10 = arith.constant 0 : index
    %7 = vector.load %arg7[%c91, %c0_10] : memref<102x128xf32, #tpu.memory_space<vmem>>, vector<11x128xf32>
    tpu.vector_store %arg7[%c91, %c0_10], %6 {strides = array<i32>} : memref<102x128xf32, #tpu.memory_space<vmem>>, vector<11x128xf32>,
    %cst_11 = arith.constant 0.000000e+00 : f32
    %8 = vector.broadcast %cst_11 : f32 to vector<11x128xf32>
    %c0_12 = arith.constant 0 : index
    %c0_13 = arith.constant 0 : index
    %c0_14 = arith.constant 0 : index
    %9 = vector.load %arg6[%c0_12, %c0_13, %c0_14] : memref<1x102x128xf32, #tpu.memory_space<vmem>>, vector<1x11x128xf32>
    %10 = vector.shape_cast %9 : vector<1x11x128xf32> to vector<11x128xf32>
    %11 = vector.shape_cast %8 : vector<11x128xf32> to vector<1x11x128xf32>
    tpu.vector_store %arg6[%c0_12, %c0_13, %c0_14], %11 {strides = array<i32>} : memref<1x102x128xf32, #tpu.memory_space<vmem>>, vector<1x11x128xf32>,
    %cst_15 = arith.constant 0.000000e+00 : f32
    %12 = vector.broadcast %cst_15 : f32 to vector<11x128xf32>
    %c0_16 = arith.constant 0 : index
    %c91_17 = arith.constant 91 : index
    %c0_18 = arith.constant 0 : index
    %13 = vector.load %arg6[%c0_16, %c91_17, %c0_18] : memref<1x102x128xf32, #tpu.memory_space<vmem>>, vector<1x11x128xf32>
    %14 = vector.shape_cast %13 : vector<1x11x128xf32> to vector<11x128xf32>
    %15 = vector.shape_cast %12 : vector<11x128xf32> to vector<1x11x128xf32>
    tpu.vector_store %arg6[%c0_16, %c91_17, %c0_18], %15 {strides = array<i32>} : memref<1x102x128xf32, #tpu.memory_space<vmem>>, vector<1x11x128xf32>,
    %c0_19 = arith.constant 0 : index
    %c0_20 = arith.constant 0 : index
    %c0_21 = arith.constant 0 : index
    %16 = vector.load %arg1[%c0_19, %c0_20, %c0_21] : memref<1x102x128xf32, #tpu.memory_space<vmem>>, vector<1x80x128xf32>
    %17 = vector.shape_cast %16 : vector<1x80x128xf32> to vector<80x128xf32>
    %cst_22 = arith.constant 0.000000e+00 : f32
    %18 = vector.broadcast %cst_22 : f32 to vector<80x128xf32>
    %19 = arith.maximumf %17, %18 : vector<80x128xf32>
    %c0_23 = arith.constant 0 : index
    %c1 = arith.constant 1 : index
    %c0_24 = arith.constant 0 : index
    %20 = vector.load %arg1[%c0_23, %c1, %c0_24] : memref<1x102x128xf32, #tpu.memory_space<vmem>>, vector<1x80x128xf32>
    %21 = vector.shape_cast %20 : vector<1x80x128xf32> to vector<80x128xf32>
    %cst_25 = arith.constant 0.000000e+00 : f32
    %22 = vector.broadcast %cst_25 : f32 to vector<80x128xf32>
    %23 = arith.maximumf %21, %22 : vector<80x128xf32>
    %c0_26 = arith.constant 0 : index
    %c2 = arith.constant 2 : index
    %c0_27 = arith.constant 0 : index
    %24 = vector.load %arg1[%c0_26, %c2, %c0_27] : memref<1x102x128xf32, #tpu.memory_space<vmem>>, vector<1x80x128xf32>
    %25 = vector.shape_cast %24 : vector<1x80x128xf32> to vector<80x128xf32>
    %cst_28 = arith.constant 0.000000e+00 : f32
    %26 = vector.broadcast %cst_28 : f32 to vector<80x128xf32>
    %27 = arith.maximumf %25, %26 : vector<80x128xf32>
    %c0_29 = arith.constant 0 : index
    %c10 = arith.constant 10 : index
    %c0_30 = arith.constant 0 : index
    %28 = vector.load %arg1[%c0_29, %c10, %c0_30] : memref<1x102x128xf32, #tpu.memory_space<vmem>>, vector<1x80x128xf32>
    %29 = vector.shape_cast %28 : vector<1x80x128xf32> to vector<80x128xf32>
    %cst_31 = arith.constant 0.000000e+00 : f32
    %30 = vector.broadcast %cst_31 : f32 to vector<80x128xf32>
    %31 = arith.maximumf %29, %30 : vector<80x128xf32>
    %c0_32 = arith.constant 0 : index
    %c11 = arith.constant 11 : index
    %c0_33 = arith.constant 0 : index
    %32 = vector.load %arg1[%c0_32, %c11, %c0_33] : memref<1x102x128xf32, #tpu.memory_space<vmem>>, vector<1x80x128xf32>
    %33 = vector.shape_cast %32 : vector<1x80x128xf32> to vector<80x128xf32>
    %cst_34 = arith.constant 0.000000e+00 : f32
    %34 = vector.broadcast %cst_34 : f32 to vector<80x128xf32>
    %35 = arith.maximumf %33, %34 : vector<80x128xf32>
    %c0_35 = arith.constant 0 : index
    %c12 = arith.constant 12 : index
    %c0_36 = arith.constant 0 : index
    %36 = vector.load %arg1[%c0_35, %c12, %c0_36] : memref<1x102x128xf32, #tpu.memory_space<vmem>>, vector<1x80x128xf32>
    %37 = vector.shape_cast %36 : vector<1x80x128xf32> to vector<80x128xf32>
    %cst_37 = arith.constant 0.000000e+00 : f32
    %38 = vector.broadcast %cst_37 : f32 to vector<80x128xf32>
    %39 = arith.maximumf %37, %38 : vector<80x128xf32>
    %c0_38 = arith.constant 0 : index
    %c20 = arith.constant 20 : index
    %c0_39 = arith.constant 0 : index
    %40 = vector.load %arg1[%c0_38, %c20, %c0_39] : memref<1x102x128xf32, #tpu.memory_space<vmem>>, vector<1x80x128xf32>
    %41 = vector.shape_cast %40 : vector<1x80x128xf32> to vector<80x128xf32>
    %cst_40 = arith.constant 0.000000e+00 : f32
    %42 = vector.broadcast %cst_40 : f32 to vector<80x128xf32>
    %43 = arith.maximumf %41, %42 : vector<80x128xf32>
    %c0_41 = arith.constant 0 : index
    %c21 = arith.constant 21 : index
    %c0_42 = arith.constant 0 : index
    %44 = vector.load %arg1[%c0_41, %c21, %c0_42] : memref<1x102x128xf32, #tpu.memory_space<vmem>>, vector<1x80x128xf32>
    %45 = vector.shape_cast %44 : vector<1x80x128xf32> to vector<80x128xf32>
    %cst_43 = arith.constant 0.000000e+00 : f32
    %46 = vector.broadcast %cst_43 : f32 to vector<80x128xf32>
    %47 = arith.maximumf %45, %46 : vector<80x128xf32>
    %c0_44 = arith.constant 0 : index
    %c22 = arith.constant 22 : index
    %c0_45 = arith.constant 0 : index
    %48 = vector.load %arg1[%c0_44, %c22, %c0_45] : memref<1x102x128xf32, #tpu.memory_space<vmem>>, vector<1x80x128xf32>
    %49 = vector.shape_cast %48 : vector<1x80x128xf32> to vector<80x128xf32>
    %cst_46 = arith.constant 0.000000e+00 : f32
    %50 = vector.broadcast %cst_46 : f32 to vector<80x128xf32>
    %51 = arith.maximumf %49, %50 : vector<80x128xf32>
    %52 = tpu.concatenate %19, %23, %27, %31, %35, %39, %43, %47, %51 in 1 : vector<80x128xf32>, vector<80x128xf32>, vector<80x128xf32>, vector<80x128xf32>, vector<80x128xf32>, vector<80x128xf32>, vector<80x128xf32>, vector<80x128xf32>, vector<80x128xf32> -> vector<80x1152xf32>
    %cst_47 = arith.constant dense<0.000000e+00> : vector<80x128xf32>
    %53 = tpu.matmul %52, %0, %cst_47 {dimension_numbers = #tpu.dot_dimension_numbers<[1], [0], [0], [1], [0, 0, 1, 1], [], []>} : vector<80x1152xf32>, vector<1152x128xf32>, vector<80x128xf32> -> vector<80x128xf32>
    %54 = vector.broadcast %1 : vector<1x128xf32> to vector<80x128xf32>
    %55 = arith.addf %53, %54 : vector<80x128xf32>
    %cst_48 = arith.constant 0.000000e+00 : f32
    %56 = vector.broadcast %cst_48 : f32 to vector<80x128xf32>
    %57 = arith.maximumf %55, %56 : vector<80x128xf32>
    %58 = tpu.iota {dimensions = array<i32: 0>} : vector<80x1xi32>
    %c0_i32 = arith.constant 0 : i32
    %59 = vector.broadcast %c0_i32 : i32 to vector<80x1xi32>
    %60 = arith.addi %59, %58 : vector<80x1xi32>
    %c78_i32 = arith.constant 78 : i32
    %61 = vector.broadcast %c78_i32 : i32 to vector<80x1xi32>
    %62 = arith.cmpi slt, %60, %61 : vector<80x1xi32>
    %c10_i32 = arith.constant 10 : i32
    %c0_i32_49 = arith.constant 0 : i32
    %63 = arith.cmpi eq, %c10_i32, %c0_i32_49 : i32
    %c1_i32 = arith.constant 1 : i32
    %64 = arith.select %63, %c1_i32, %c10_i32 : i32
    %65 = vector.broadcast %64 : i32 to vector<80x1xi32>
    %66 = arith.remsi %60, %65 : vector<80x1xi32>
    %c0_i32_50 = arith.constant 0 : i32
    %67 = vector.broadcast %c0_i32_50 : i32 to vector<80x1xi32>
    %68 = arith.cmpi ne, %66, %67 : vector<80x1xi32>
    %c0_i32_51 = arith.constant 0 : i32
    %69 = vector.broadcast %c0_i32_51 : i32 to vector<80x1xi32>
    %70 = arith.cmpi slt, %66, %69 : vector<80x1xi32>
    %c0_i32_52 = arith.constant 0 : i32
    %71 = arith.cmpi slt, %64, %c0_i32_52 : i32
    %72 = vector.broadcast %71 : i1 to vector<80x1xi1>
    %73 = vector.broadcast %72 : vector<80x1xi1> to vector<80x1xi1>
    %74 = arith.xori %70, %73 : vector<80x1xi1>
    %75 = arith.andi %74, %68 : vector<80x1xi1>
    %76 = vector.broadcast %64 : i32 to vector<80x1xi32>
    %77 = arith.addi %66, %76 : vector<80x1xi32>
    %78 = arith.select %75, %77, %66 : vector<80x1xi1>, vector<80x1xi32>
    %c8_i32 = arith.constant 8 : i32
    %79 = vector.broadcast %c8_i32 : i32 to vector<80x1xi32>
    %80 = arith.cmpi slt, %78, %79 : vector<80x1xi32>
    %81 = arith.andi %62, %80 : vector<80x1xi1>
    %cst_53 = arith.constant 0.000000e+00 : f32
    %82 = vector.shape_cast %81 : vector<80x1xi1> to vector<80x1xi1>
    %83 = vector.broadcast %82 : vector<80x1xi1> to vector<80x128xi1>
    %84 = vector.broadcast %cst_53 : f32 to vector<80x128xf32>
    %85 = arith.select %83, %57, %84 : vector<80x128xi1>, vector<80x128xf32>
    %c11_54 = arith.constant 11 : index
    %c0_55 = arith.constant 0 : index
    %86 = vector.load %arg7[%c11_54, %c0_55] : memref<102x128xf32, #tpu.memory_space<vmem>>, vector<80x128xf32>
    tpu.vector_store %arg7[%c11_54, %c0_55], %85 {strides = array<i32>} : memref<102x128xf32, #tpu.memory_space<vmem>>, vector<80x128xf32>,
    %c0_56 = arith.constant 0 : index
    %c0_57 = arith.constant 0 : index
    %87 = vector.load %arg7[%c0_56, %c0_57] : memref<102x128xf32, #tpu.memory_space<vmem>>, vector<80x128xf32>
    %c1_58 = arith.constant 1 : index
    %c0_59 = arith.constant 0 : index
    %88 = vector.load %arg7[%c1_58, %c0_59] : memref<102x128xf32, #tpu.memory_space<vmem>>, vector<80x128xf32>
    %c2_60 = arith.constant 2 : index
    %c0_61 = arith.constant 0 : index
    %89 = vector.load %arg7[%c2_60, %c0_61] : memref<102x128xf32, #tpu.memory_space<vmem>>, vector<80x128xf32>
    %c10_62 = arith.constant 10 : index
    %c0_63 = arith.constant 0 : index
    %90 = vector.load %arg7[%c10_62, %c0_63] : memref<102x128xf32, #tpu.memory_space<vmem>>, vector<80x128xf32>
    %c11_64 = arith.constant 11 : index
    %c0_65 = arith.constant 0 : index
    %91 = vector.load %arg7[%c11_64, %c0_65] : memref<102x128xf32, #tpu.memory_space<vmem>>, vector<80x128xf32>
    %c12_66 = arith.constant 12 : index
    %c0_67 = arith.constant 0 : index
    %92 = vector.load %arg7[%c12_66, %c0_67] : memref<102x128xf32, #tpu.memory_space<vmem>>, vector<80x128xf32>
    %c20_68 = arith.constant 20 : index
    %c0_69 = arith.constant 0 : index
    %93 = vector.load %arg7[%c20_68, %c0_69] : memref<102x128xf32, #tpu.memory_space<vmem>>, vector<80x128xf32>
    %c21_70 = arith.constant 21 : index
    %c0_71 = arith.constant 0 : index
    %94 = vector.load %arg7[%c21_70, %c0_71] : memref<102x128xf32, #tpu.memory_space<vmem>>, vector<80x128xf32>
    %c22_72 = arith.constant 22 : index
    %c0_73 = arith.constant 0 : index
    %95 = vector.load %arg7[%c22_72, %c0_73] : memref<102x128xf32, #tpu.memory_space<vmem>>, vector<80x128xf32>
    %96 = tpu.concatenate %87, %88, %89, %90, %91, %92, %93, %94, %95 in 1 : vector<80x128xf32>, vector<80x128xf32>, vector<80x128xf32>, vector<80x128xf32>, vector<80x128xf32>, vector<80x128xf32>, vector<80x128xf32>, vector<80x128xf32>, vector<80x128xf32> -> vector<80x1152xf32>
    %cst_74 = arith.constant dense<0.000000e+00> : vector<80x128xf32>
    %97 = tpu.matmul %96, %2, %cst_74 {dimension_numbers = #tpu.dot_dimension_numbers<[1], [0], [0], [1], [0, 0, 1, 1], [], []>} : vector<80x1152xf32>, vector<1152x128xf32>, vector<80x128xf32> -> vector<80x128xf32>
    %98 = vector.broadcast %3 : vector<1x128xf32> to vector<80x128xf32>
    %99 = arith.addf %97, %98 : vector<80x128xf32>
    %c0_75 = arith.constant 0 : index
    %c11_76 = arith.constant 11 : index
    %c0_77 = arith.constant 0 : index
    %100 = vector.load %arg1[%c0_75, %c11_76, %c0_77] : memref<1x102x128xf32, #tpu.memory_space<vmem>>, vector<1x80x128xf32>
    %101 = vector.shape_cast %100 : vector<1x80x128xf32> to vector<80x128xf32>
    %102 = tpu.iota {dimensions = array<i32: 0>} : vector<80x1xi32>
    %c0_i32_78 = arith.constant 0 : i32
    %103 = vector.broadcast %c0_i32_78 : i32 to vector<80x1xi32>
    %104 = arith.addi %103, %102 : vector<80x1xi32>
    %c78_i32_79 = arith.constant 78 : i32
    %105 = vector.broadcast %c78_i32_79 : i32 to vector<80x1xi32>
    %106 = arith.cmpi slt, %104, %105 : vector<80x1xi32>
    %c10_i32_80 = arith.constant 10 : i32
    %c0_i32_81 = arith.constant 0 : i32
    %107 = arith.cmpi eq, %c10_i32_80, %c0_i32_81 : i32
    %c1_i32_82 = arith.constant 1 : i32
    %108 = arith.select %107, %c1_i32_82, %c10_i32_80 : i32
    %109 = vector.broadcast %108 : i32 to vector<80x1xi32>
    %110 = arith.remsi %104, %109 : vector<80x1xi32>
    %c0_i32_83 = arith.constant 0 : i32
    %111 = vector.broadcast %c0_i32_83 : i32 to vector<80x1xi32>
    %112 = arith.cmpi ne, %110, %111 : vector<80x1xi32>
    %c0_i32_84 = arith.constant 0 : i32
    %113 = vector.broadcast %c0_i32_84 : i32 to vector<80x1xi32>
    %114 = arith.cmpi slt, %110, %113 : vector<80x1xi32>
    %c0_i32_85 = arith.constant 0 : i32
    %115 = arith.cmpi slt, %108, %c0_i32_85 : i32
    %116 = vector.broadcast %115 : i1 to vector<80x1xi1>
    %117 = vector.broadcast %116 : vector<80x1xi1> to vector<80x1xi1>
    %118 = arith.xori %114, %117 : vector<80x1xi1>
    %119 = arith.andi %118, %112 : vector<80x1xi1>
    %120 = vector.broadcast %108 : i32 to vector<80x1xi32>
    %121 = arith.addi %110, %120 : vector<80x1xi32>
    %122 = arith.select %119, %121, %110 : vector<80x1xi1>, vector<80x1xi32>
    %c8_i32_86 = arith.constant 8 : i32
    %123 = vector.broadcast %c8_i32_86 : i32 to vector<80x1xi32>
    %124 = arith.cmpi slt, %122, %123 : vector<80x1xi32>
    %125 = arith.andi %106, %124 : vector<80x1xi1>
    %126 = arith.addf %99, %101 : vector<80x128xf32>
    %cst_87 = arith.constant 0.000000e+00 : f32
    %127 = vector.shape_cast %125 : vector<80x1xi1> to vector<80x1xi1>
    %128 = vector.broadcast %127 : vector<80x1xi1> to vector<80x128xi1>
    %129 = vector.broadcast %cst_87 : f32 to vector<80x128xf32>
    %130 = arith.select %128, %126, %129 : vector<80x128xi1>, vector<80x128xf32>
    %c0_88 = arith.constant 0 : index
    %c11_89 = arith.constant 11 : index
    %c0_90 = arith.constant 0 : index
    %131 = vector.load %arg6[%c0_88, %c11_89, %c0_90] : memref<1x102x128xf32, #tpu.memory_space<vmem>>, vector<1x80x128xf32>
    %132 = vector.shape_cast %131 : vector<1x80x128xf32> to vector<80x128xf32>
    %133 = vector.shape_cast %130 : vector<80x128xf32> to vector<1x80x128xf32>
    tpu.vector_store %arg6[%c0_88, %c11_89, %c0_90], %133 {strides = array<i32>} : memref<1x102x128xf32, #tpu.memory_space<vmem>>, vector<1x80x128xf32>,
    return
  }
  func.func @transform_0(%arg0: i32) -> (i32, i32, i32) {
    %c0_i32 = arith.constant 0 : i32
    %c0_i32_0 = arith.constant 0 : i32
    %c0_i32_1 = arith.constant 0 : i32
    return %arg0, %c0_i32, %c0_i32_0 : i32, i32, i32
  }
  func.func @transform_1(%arg0: i32) -> (i32, i32) {
    %c0_i32 = arith.constant 0 : i32
    %c0_i32_0 = arith.constant 0 : i32
    %c0_i32_1 = arith.constant 0 : i32
    return %c0_i32, %c0_i32_0 : i32, i32
  }
  func.func @transform_2(%arg0: i32) -> (i32, i32) {
    %c0_i32 = arith.constant 0 : i32
    %c0_i32_0 = arith.constant 0 : i32
    %c0_i32_1 = arith.constant 0 : i32
    return %c0_i32, %c0_i32_0 : i32, i32
  }
  func.func @transform_3(%arg0: i32) -> (i32, i32) {
    %c0_i32 = arith.constant 0 : i32
    %c0_i32_0 = arith.constant 0 : i32
    %c0_i32_1 = arith.constant 0 : i32
    return %c0_i32, %c0_i32_0 : i32, i32
  }
  func.func @transform_4(%arg0: i32) -> (i32, i32) {
    %c0_i32 = arith.constant 0 : i32
    %c0_i32_0 = arith.constant 0 : i32
    %c0_i32_1 = arith.constant 0 : i32
    return %c0_i32, %c0_i32_0 : i32, i32
  }
  func.func @transform_5(%arg0: i32) -> (i32, i32, i32) {
    %c0_i32 = arith.constant 0 : i32
    %c0_i32_0 = arith.constant 0 : i32
    %c0_i32_1 = arith.constant 0 : i32
    return %arg0, %c0_i32, %c0_i32_0 : i32, i32, i32
  }
}

</mosaic_0001>

<bundles_post_ra>
// kernel: impala_residual_stage.3
= control target key start
LH: loop header
LB: loop body
LE: loop exit
PB: predicated region body
PF: predicated region fallthrough
CT: control target
= control target key end

     0   :  { %s2711_s12 = smov 0   ;;  %s4377_s0 = inlined_call_operand.vmem [shape: f32[2,288,128], index: 0, kind: input, shape index: {}]   ;;  %s4378_s1 = inlined_call_operand.vmem [shape: f32[128,128], index: 1, kind: input, shape index: {}]   ;;  %s4379_s2 = inlined_call_operand.vmem [shape: f32[1,128], index: 2, kind: input, shape index: {}]   ;;  %s4380_s3 = inlined_call_operand.vmem [shape: f32[2,102,128], index: 3, kind: output, shape index: {}]  }
   0x1 LB: > { %s2283_s13 = sadd.s32 4294967295, %s2685_s12   ;;  %p2287_p0 = scmp.ge.s32.totalorder %s2685_s12, 1  ;;  %s2685_s12 = sphi %s2711_s12, %s13_s12  }
   0x2   : > { %p137_p1 = scmp.lt.s32.totalorder %s2685_s12, 3 }
   0x4   : > { %p138_p2 = pnand %p2287_p0, %p137_p1 }
   0x6   : > { %141 = sbr.rel (%p138_p2) target bundleno = 573 (0x23d), region = 32 }
   0xd   : > { %v171_v0 = vld [vmem:[%s4378_s1] sm:$0xff]  ;;  %v172_v1 = vld [vmem:[%s4378_s1 + $0x8] sm:$0xff]  ;;  %v173_v2 = vld [vmem:[%s4378_s1 + $0x10] sm:$0xff]  ;;  %p161_p3 = scmp.lt.s32.totalorder %s2283_s13, 1  ;;  %v2687_v60 = vmov -3e+38   ;;  %v4388_v61 = vlaneseq }
   0xe   : > { %v2520_v3 = vpack.c.bf16 %v172_v1, %v171_v0  ;;  %v174_v4 = vld [vmem:[%s4378_s1 + $0x18] sm:$0xff]  ;;  %v175_v6 = vld [vmem:[%s4378_s1 + $0x20] sm:$0xff]  ;;  %v176_v7 = vld [vmem:[%s4378_s1 + $0x28] sm:$0xff]  ;;  %190 = vst [vmem:[#allocation2 + $0x10] sm:$0x7] %v2687_v60  ;;  %v4384_v63 = vmov 0.0|0.0  }
   0xf   : > { %v2524_v5 = vpack.c.bf16 %v174_v4, %v173_v2  ;;  %s4718_s13 = smov (!%p161_p3, %s2283_s13), 1  ;;  %v2528_v8 = vpack.c.bf16 %v176_v7, %v175_v6  ;;  %v177_v9 = vld [vmem:[%s4378_s1 + $0x30] sm:$0xff]  ;;  %v178_v10 = vld [vmem:[%s4378_s1 + $0x38] sm:$0xff]  ;;  %v179_v13 = vld [vmem:[%s4378_s1 + $0x40] sm:$0xff]  ;;  %191 = vst [vmem:[#allocation2 + $0x133] sm:$0xff] %v2687_v60  ;;  %v2812_v62 = vshrl.u32 %v4388_v61, 7 }
  0x10   : > { %2521 = vmatprep.subr.bf16.mxu0 %v2520_v3  ;;  %2576 = vmatprep.subr.bf16.mxu1 %v2520_v3  ;;  %s2592_s26 = smul.u32 288, %s4718_s13  ;;  %v2532_v12 = vpack.c.bf16 %v178_v10, %v177_v9  ;;  %v180_v14 = vld [vmem:[%s4378_s1 + $0x48] sm:$0xff]  ;;  %v181_v17 = vld [vmem:[%s4378_s1 + $0x50] sm:$0xff]  ;;  %v182_v18 = vld [vmem:[%s4378_s1 + $0x58] sm:$0xff]  ;;  %192 = vst [vmem:[#allocation2 + $0x13b] sm:$0xff] %v2687_v60  ;;  %vm4381_vm6 = vmmov 0  }
  0x11   : > { %2523 = vmatpush3.bf16.msra.mxu0 %v2520_v3  ;;  %2584 = vmatpush3.bf16.msra.mxu1 %v2520_v3  ;;  %v2536_v16 = vpack.c.bf16 %v180_v14, %v179_v13  ;;  %v2540_v19 = vpack.c.bf16 %v182_v18, %v181_v17  ;;  %v183_v20 = vld [vmem:[%s4378_s1 + $0x60] sm:$0xff]  ;;  %v184_v21 = vld [vmem:[%s4378_s1 + $0x68] sm:$0xff]  ;;  %v185_v23 = vld [vmem:[%s4378_s1 + $0x70] sm:$0xff]  ;;  %193 = vst [vmem:[#allocation2 + $0x143] sm:$0x1] %v2687_v60  ;;  %v483_v0 = vadd.s32 8, %v2812_v62 }
  0x12   : > { %2525 = vmatprep.subr.bf16.mxu0 %v2524_v5  ;;  %2577 = vmatprep.subr.bf16.mxu1 %v2524_v5  ;;  %s2749_s6 = scalar_lea.vmem %s4377_s0, %s2592_s26  ;;  %v2544_v22 = vpack.c.bf16 %v184_v21, %v183_v20  ;;  %v186_v24 = vld [vmem:[%s4378_s1 + $0x78] sm:$0xff]  ;;  %v485_v1 = vadd.s32 24, %v2812_v62  ;;  %v484_v4 = vadd.s32 16, %v2812_v62  ;;  %v2836_v13 = vadd.s32 32, %v2812_v62  ;;  %s2593_s25 = smul.u32 104, %s4718_s13 }
  0x13   : > { %v194_v11 = vld [vmem:[%s2749_s6] sm:$0xff]  ;;  %v220_v15 = vld [vmem:[%s2749_s6 + $0xd0] sm:$0xff]  ;;  %v2548_v25 = vpack.c.bf16 %v186_v24, %v185_v23  ;;  %v195_v26 = vld [vmem:[%s2749_s6 + $0x8] sm:$0xff]  ;;  %v2817_v2 = vmul.u32.u64.low 3817748708, %v483_v0  ;;  %v2818_v3 = vmul.u32.u64.high 3817748708, %v483_v0, %v2817_v2  ;;  %v2845_v18 = vadd.s32 56, %v2812_v62 }
  0x14   : > { %2410 = vmatprep.mubr.f32.mxu0 %v194_v11  ;;  %2449 = vmatprep.mubr.f32.mxu1 %v220_v15  ;;  %v196_v27 = vld [vmem:[%s2749_s6 + $0x10] sm:$0xff]  ;;  %v221_v28 = vld [vmem:[%s2749_s6 + $0xd8] sm:$0xff]  ;;  %v222_v29 = vld [vmem:[%s2749_s6 + $0xe0] sm:$0xff]  ;;  %v2828_v9 = vmul.u32.u64.low 3817748708, %v484_v4  ;;  %v2829_v10 = vmul.u32.u64.high 3817748708, %v484_v4, %v2828_v9  ;;  %v2832_v11 = vadd.s32 40, %v2812_v62  ;;  %s3178_s27 = scalar_lea.vmem %s4380_s3, %s2593_s25 }
  0x15   : > { %2527 = vmatpush3.bf16.msra.mxu0 %v2524_v5  ;;  %2585 = vmatpush3.bf16.msra.mxu1 %v2524_v5  ;;  %v197_v30 = vld [vmem:[%s2749_s6 + $0x18] sm:$0xff]  ;;  %v198_v31 = vld [vmem:[%s2749_s6 + $0x20] sm:$0xff]  ;;  %v223_v32 = vld [vmem:[%s2749_s6 + $0xe8] sm:$0xff]  ;;  %v2822_v5 = vmul.u32.u64.low 3817748708, %v2812_v62  ;;  %v2823_v6 = vmul.u32.u64.high 3817748708, %v2812_v62, %v2822_v5 }
  0x16   : > { %2529 = vmatprep.subr.bf16.mxu0 %v2528_v8  ;;  %2578 = vmatprep.subr.bf16.mxu1 %v2528_v8  ;;  %v224_v33 = vld [vmem:[%s2749_s6 + $0xf0] sm:$0xff]  ;;  %v199_v34 = vld [vmem:[%s2749_s6 + $0x28] sm:$0xff]  ;;  %v225_v36 = vld [vmem:[%s2749_s6 + $0xf8] sm:$0xff]  ;;  %v582_v21 = vshrl.u32 %v2829_v10, 4 }
  0x17   : > { %v200_v35 = vld [vmem:[%s2749_s6 + $0x30] sm:$0xff]  ;;  %v226_v37 = vld [vmem:[%s2749_s6 + $0x100] sm:$0xff]  ;;  %v201_v38 = vld [vmem:[%s2749_s6 + $0x38] sm:$0xff]  ;;  %v560_v14 = vshrl.u32 %v2823_v6, 4 }
  0x18   : > { %v202_v39 = vld [vmem:[%s2749_s6 + $0x40] sm:$0xff]  ;;  %v227_v40 = vld [vmem:[%s2749_s6 + $0x108] sm:$0xff]  ;;  %v228_v41 = vld [vmem:[%s2749_s6 + $0x110] sm:$0xff] }
  0x19   : > { %2531 = vmatpush3.bf16.msra.mxu0 %v2528_v8  ;;  %2586 = vmatpush3.bf16.msra.mxu1 %v2528_v8  ;;  %v203_v42 = vld [vmem:[%s2749_s6 + $0x48] sm:$0xff]  ;;  %v204_v43 = vld [vmem:[%s2749_s6 + $0x50] sm:$0xff]  ;;  %v229_v44 = vld [vmem:[%s2749_s6 + $0x118] sm:$0xff]  ;;  %v2825_v7 = vmul.u32.u64.low 3817748708, %v485_v1  ;;  %v2826_v8 = vmul.u32.u64.high 3817748708, %v485_v1, %v2825_v7  ;;  %v561_v24 = vmul.u32 18, %v560_v14 }
  0x1a   : > { %2533 = vmatprep.subr.bf16.mxu0 %v2532_v12  ;;  %2579 = vmatprep.subr.bf16.mxu1 %v2532_v12  ;;  %v205_v45 = vld [vmem:[%s2749_s6 + $0x58] sm:$0xff]  ;;  %v206_v46 = vld [vmem:[%s2749_s6 + $0x60] sm:$0xff]  ;;  %v207_v47 = vld [vmem:[%s2749_s6 + $0x68] sm:$0xff] }
  0x1b   : > { %v208_v48 = vld [vmem:[%s2749_s6 + $0x70] sm:$0xff]  ;;  %v209_v49 = vld [vmem:[%s2749_s6 + $0x78] sm:$0xff]  ;;  %v210_v50 = vld [vmem:[%s2749_s6 + $0x80] sm:$0xff]  ;;  %v593_v15 = vshrl.u32 %v2826_v8, 4  ;;  %v4427_v8 = vmov 0 }
  0x1c   : > { %v211_v51 = vld [vmem:[%s2749_s6 + $0x88] sm:$0xff]  ;;  %v212_v52 = vld [vmem:[%s2749_s6 + $0x90] sm:$0xff]  ;;  %v213_v53 = vld [vmem:[%s2749_s6 + $0x98] sm:$0xff] }
  0x1d   : > { %2535 = vmatpush3.bf16.msra.mxu0 %v2532_v12  ;;  %2587 = vmatpush3.bf16.msra.mxu1 %v2532_v12  ;;  %v214_v54 = vld [vmem:[%s2749_s6 + $0xa0] sm:$0xff]  ;;  %v215_v55 = vld [vmem:[%s2749_s6 + $0xa8] sm:$0xff]  ;;  %v216_v56 = vld [vmem:[%s2749_s6 + $0xb0] sm:$0xff]  ;;  %v571_v12 = vshrl.u32 %v2818_v3, 4 }
  0x1e   : > { %2537 = vmatprep.subr.bf16.mxu0 %v2536_v16  ;;  %2580 = vmatprep.subr.bf16.mxu1 %v2536_v16  ;;  %v217_v57 = vld [vmem:[%s2749_s6 + $0xb8] sm:$0xff]  ;;  %v218_v58 = vld [vmem:[%s2749_s6 + $0xc0] sm:$0xff]  ;;  %v219_v59 = vld [vmem:[%s2749_s6 + $0xc8] sm:$0xff] }
  0x1f   : > { %v572_v20 = vmul.u32 18, %v571_v12 }
  0x21   : > { %2539 = vmatpush3.bf16.msra.mxu0 %v2536_v16  ;;  %2588 = vmatpush3.bf16.msra.mxu1 %v2536_v16  ;;  %v2841_v16 = vmul.u32.u64.low 3817748708, %v2832_v11  ;;  %v2842_v17 = vmul.u32.u64.high 3817748708, %v2832_v11, %v2841_v16 }
  0x22   : > { %2541 = vmatprep.subr.bf16.mxu0 %v2540_v19  ;;  %2581 = vmatprep.subr.bf16.mxu1 %v2540_v19 }
  0x25   : > { %2543 = vmatpush3.bf16.msra.mxu0 %v2540_v19  ;;  %2589 = vmatpush3.bf16.msra.mxu1 %v2540_v19  ;;  %v2848_v19 = vadd.s32 48, %v2812_v62 }
  0x26   : > { %2545 = vmatprep.subr.bf16.mxu0 %v2544_v22  ;;  %2582 = vmatprep.subr.bf16.mxu1 %v2544_v22 }
  0x29   : > { %2547 = vmatpush3.bf16.msra.mxu0 %v2544_v22  ;;  %2590 = vmatpush3.bf16.msra.mxu1 %v2544_v22  ;;  %v2852_v22 = vmul.u32.u64.low 3817748708, %v2836_v13  ;;  %v2853_v23 = vmul.u32.u64.high 3817748708, %v2836_v13, %v2852_v22 }
  0x2a   : > { %2549 = vmatprep.subr.bf16.mxu0 %v2548_v25  ;;  %2583 = vmatprep.subr.bf16.mxu1 %v2548_v25 }
  0x2d   : > { %2551 = vmatpush3.bf16.msra.mxu0 %v2548_v25  ;;  %2591 = vmatpush3.bf16.msra.mxu1 %v2548_v25  ;;  %v2856_v25 = vadd.s32 72, %v2812_v62 }
  0x2e   : > { %2552 = vmatprep.subr.bf16.mxu1 %v4384_v63  ;;  %v3162_v63 = vadd.s32 152, %v2812_v62 }
  0x30   : > { %2411 = vmatmul.mubr.f32.vlgmr.msra.gmra.mrb[0].mxu0 %v195_v26  ;;  %2450 = vmatmul.mubr.f32.vlgmr.msra.gmra.mrb[0].mxu1 %v221_v28  ;;  %v594_v26 = vmul.u32 18, %v593_v15 }
  0x31   : > { %2413 = vmatprep.mubr.f32.mxu0 %v196_v27  ;;  %2452 = vmatprep.mubr.f32.mxu1 %v222_v29  ;;  %v2859_v27 = vmul.u32.u64.low 3817748708, %v2845_v18  ;;  %v2860_v28 = vmul.u32.u64.high 3817748708, %v2845_v18, %v2859_v27  ;;  %v2863_v29 = vadd.s32 64, %v2812_v62 }
  0x32   : > { %v3005_v27 = vadd.s32 112, %v2812_v62 }
  0x34   : > { %2414 = vmatmul.mubr.f32.gmra.mrb[2].mxu0 %v197_v30  ;;  %2453 = vmatmul.mubr.f32.gmra.mrb[2].mxu1 %v223_v32  ;;  %v2870_v32 = vadd.s32 88, %v2812_v62 }
  0x35   : > { %2416 = vmatprep.mubr.f32.mxu0 %v198_v31  ;;  %2455 = vmatprep.mubr.f32.mxu1 %v224_v33  ;;  %v2866_v30 = vmul.u32.u64.low 3817748708, %v2848_v19  ;;  %v2867_v31 = vmul.u32.u64.high 3817748708, %v2848_v19, %v2866_v30  ;;  %v2872_v33 = vsub.s32 %v483_v0, %v572_v20 }
  0x37   : > { %vm951_vm0 = vcmp.ne.s32.totalorder %v2872_v33, 0  ;;  %vm987_vm1 = vcmp.lt.s32.totalorder %v2872_v33, 0 }
  0x38   : > { %2417 = vmatmul.mubr.f32.gmra.mrb[4].mxu0 %v199_v34  ;;  %2456 = vmatmul.mubr.f32.gmra.mrb[4].mxu1 %v225_v36  ;;  %v583_v34 = vmul.u32 18, %v582_v21  ;;  %vm2911_vm7 = vmand %vm987_vm1, %vm951_vm0  ;;  %v2990_v21 = vadd.s32 120, %v2812_v62 }
  0x39   : > { %2419 = vmatprep.mubr.f32.mxu0 %v200_v35  ;;  %2458 = vmatprep.mubr.f32.mxu1 %v226_v37  ;;  %v2875_v35 = vsub.s32 %v2812_v62, %v561_v24  ;;  %v2878_v36 = vmul.u32.u64.low 3817748708, %v2856_v25  ;;  %v2879_v37 = vmul.u32.u64.high 3817748708, %v2856_v25, %v2878_v36 }
  0x3b   : > { %vm950_vm2 = vcmp.ne.s32.totalorder %v2875_v35, 0  ;;  %vm986_vm3 = vcmp.lt.s32.totalorder %v2875_v35, 0 }
  0x3c   : > { %2420 = vmatmul.mubr.f32.gmra.mrb[6].mxu0 %v201_v38  ;;  %2459 = vmatmul.mubr.f32.gmra.mrb[6].mxu1 %v227_v40  ;;  %v2881_v38 = vsub.s32 %v485_v1, %v594_v26  ;;  %vm2929_vm8 = vmand %vm986_vm3, %vm950_vm2  ;;  %v2952_v1 = vadd.s32 96, %v2812_v62 }
  0x3d   : > { %2422 = vmatprep.mubr.f32.mxu0 %v202_v39  ;;  %2461 = vmatprep.mubr.f32.mxu1 %v228_v41  ;;  %v615_v39 = vshrl.u32 %v2842_v17, 4  ;;  %v2885_v40 = vmul.u32.u64.low 3817748708, %v2863_v29  ;;  %v2886_v41 = vmul.u32.u64.high 3817748708, %v2863_v29, %v2885_v40 }
  0x3e   : > { %vm953_vm4 = vcmp.ne.s32.totalorder %v2881_v38, 0  ;;  %vm989_vm5 = vcmp.lt.s32.totalorder %v2881_v38, 0  ;;  %v2986_v17 = vmul.u32.u64.low 3817748708, %v2952_v1  ;;  %v2987_v20 = vmul.u32.u64.high 3817748708, %v2952_v1, %v2986_v17 }
  0x3f   : > { %vm2942_vm11 = vmand %vm989_vm5, %vm953_vm4  ;;  %v648_v5 = vshrl.u32 %v2886_v41, 4 }
  0x40   : > { %2423 = vmatmul.mubr.f32.gmra.mrb[8].mxu0 %v203_v42  ;;  %2462 = vmatmul.mubr.f32.gmra.mrb[8].mxu1 %v229_v44  ;;  %v2894_v44 = vsub.s32 %v484_v4, %v583_v34 }
  0x41   : > { %2425 = vmatprep.mubr.f32.mxu0 %v204_v43  ;;  %v2889_v42 = vmul.u32.u64.low 3817748708, %v2870_v32  ;;  %v2890_v43 = vmul.u32.u64.high 3817748708, %v2870_v32, %v2889_v42 }
  0x42   : > { %vm952_vm9 = vcmp.ne.s32.totalorder %v2894_v44, 0  ;;  %vm988_vm10 = vcmp.lt.s32.totalorder %v2894_v44, 0  ;;  %v2955_v2 = vadd.s32 18, %v2894_v44  ;;  %v3053_v42 = vadd.s32 216, %v2812_v62 }
  0x43   : > { %vm2969_vm12 = vmand %vm988_vm10, %vm952_vm9  ;;  %v681_v10 = vshrl.u32 %v2890_v43, 4 }
  0x44   : > { %2426 = vmatmul.mubr.f32.gmra.mrb[10].mxu0 %v205_v45  ;;  %v604_v45 = vshrl.u32 %v2853_v23, 4  ;;  %v4428_v8 = vsel %vm2969_vm12, 4294967295, %v4427_v8  ;;  %v649_v23 = vmul.u32 18, %v648_v5 }
  0x45   : > { %2428 = vmatprep.mubr.f32.mxu0 %v206_v46  ;;  %v2900_v46 = vadd.s32 80, %v2812_v62  ;;  %v682_v26 = vmul.u32 18, %v681_v10 }
  0x47   : > { %v2948_v60 = vmul.u32.u64.low 3817748708, %v2900_v46  ;;  %v2949_v0 = vmul.u32.u64.high 3817748708, %v2900_v46, %v2948_v60 }
  0x48   : > { %2429 = vmatmul.mubr.f32.gmra.mrb[12].mxu0 %v207_v47  ;;  %v616_v47 = vmul.u32 18, %v615_v39  ;;  %v3036_v39 = vmul.u32.u64.low 3817748708, %v3005_v27  ;;  %v3037_v40 = vmul.u32.u64.high 3817748708, %v3005_v27, %v3036_v39 }
  0x49   : > { %2431 = vmatprep.mubr.f32.mxu0 %v208_v48  ;;  %v637_v48 = vshrl.u32 %v2860_v28, 4 }
  0x4a   : > { %v2958_v3 = vsub.s32 %v2832_v11, %v616_v47  ;;  %v692_v47 = vshrl.u32 %v2987_v20, 4 }
  0x4b   : > { %v638_v4 = vmul.u32 18, %v637_v48 }
  0x4c   : > { %2432 = vmatmul.mubr.f32.gmra.mrb[14].mxu0 %v209_v49  ;;  %v4386_v49 = vmov 0.0   ;;  %vm955_vm13 = vcmp.ne.s32.totalorder %v2958_v3, 0  ;;  %vm991_vm14 = vcmp.lt.s32.totalorder %v2958_v3, 0  ;;  %v3008_v28 = vadd.s32 18, %v2958_v3 }
  0x4d   : > { %2434 = vmatprep.mubr.f32.mxu0 %v210_v50  ;;  %2468 = vmatprep.mubr.msk.f32.mxu1 %vm4381_vm6, %v4386_v49  ;;  %vm3043_vm4 = vmand %vm991_vm14, %vm955_vm13  ;;  %v693_v17 = vmul.u32 18, %v692_v47  ;;  %v714_v47 = vshrl.u32 %v3037_v40, 4  ;;  %1346 = vst [vmem:[%s3178_s27] sm:$0xff] %v4386_v49 }
  0x4e   : > { %1347 = vst [vmem:[%s3178_s27 + $0x8] sm:$0xff] %v4386_v49  ;;  %1348 = vst [vmem:[%s3178_s27 + $0x10] sm:$0xff] %v4386_v49 }
  0x4f   : > { %1358 = vst [vmem:[%s3178_s27 + $0x60] sm:$0x3f] %v4386_v49  ;;  %1349 = vst [vmem:[%s3178_s27 + $0x18] sm:$0xff] %v4386_v49 }
  0x50   : > { %2435 = vmatmul.mubr.f32.gmra.mrb[16].mxu0 %v211_v51  ;;  %v2916_v51 = vadd.s32 18, %v2872_v33  ;;  %1350 = vst [vmem:[%s3178_s27 + $0x20] sm:$0xff] %v4386_v49  ;;  %1351 = vst [vmem:[%s3178_s27 + $0x28] sm:$0xff] %v4386_v49 }
  0x51   : > { %2437 = vmatprep.mubr.f32.mxu0 %v212_v52  ;;  %v2919_v52 = vadd.s32 18, %v2875_v35  ;;  %1352 = vst [vmem:[%s3178_s27 + $0x30] sm:$0xff] %v4386_v49  ;;  %1353 = vst [vmem:[%s3178_s27 + $0x38] sm:$0xff] %v4386_v49 }
  0x52   : > { %1354 = vst [vmem:[%s3178_s27 + $0x40] sm:$0xff] %v4386_v49  ;;  %1355 = vst [vmem:[%s3178_s27 + $0x48] sm:$0xff] %v4386_v49 }
  0x53   : > { %1356 = vst [vmem:[%s3178_s27 + $0x50] sm:$0xff] %v4386_v49  ;;  %1357 = vst [vmem:[%s3178_s27 + $0x58] sm:$0xff] %v4386_v49 }
  0x54   : > { %2438 = vmatmul.mubr.f32.gmra.mrb[18].mxu0 %v213_v53  ;;  %v2922_v53 = vadd.s32 18, %v2881_v38 }
  0x55   : > { %2440 = vmatprep.mubr.f32.mxu0 %v214_v54  ;;  %v626_v54 = vshrl.u32 %v2867_v31, 4  ;;  %v3020_v31 = vmul.u32.u64.low 3817748708, %v2990_v21  ;;  %v3021_v34 = vmul.u32.u64.high 3817748708, %v2990_v21, %v3020_v31 }
  0x57   : > { %v627_v9 = vmul.u32 18, %v626_v54  ;;  %v3077_v54 = vadd.s32 136, %v2812_v62  ;;  %v725_v20 = vshrl.u32 %v3021_v34, 4  ;;  %v3173_v34 = vadd.s32 232, %v2812_v62 }
  0x58   : > { %2441 = vmatmul.mubr.f32.gmra.mrb[20].mxu0 %v215_v55 }
  0x59   : > { %2443 = vmatprep.mubr.f32.mxu0 %v216_v56  ;;  %v605_v56 = vmul.u32 18, %v604_v45  ;;  %v3002_v24 = vsub.s32 %v2848_v19, %v627_v9  ;;  %v670_v19 = vshrl.u32 %v2949_v0, 4 }
  0x5b   : > { %v2979_v12 = vsub.s32 %v2836_v13, %v605_v56  ;;  %v2998_v13 = vsub.s32 %v2845_v18, %v638_v4  ;;  %4430 = vst [vmem:[#allocation4_spill] sm:$0xff] %v3002_v24  ;;  %vm956_vm3 = vcmp.ne.s32.totalorder %v3002_v24, 0  ;;  %vm992_vm5 = vcmp.lt.s32.totalorder %v3002_v24, 0 }
  0x5c   : > { %2444 = vmatmul.mubr.f32.gmra.mrb[22].mxu0 %v217_v57  ;;  %v2936_v57 = vadd.s32 104, %v2812_v62  ;;  %v671_v45 = vmul.u32 18, %v670_v19  ;;  %v3080_v56 = vadd.s32 128, %v2812_v62  ;;  %vm3086_vm6 = vmand %vm992_vm5, %vm956_vm3  ;;  %v4446_v4 = vmov 0 }
  0x5d   : > { %2446 = vmatprep.mubr.f32.mxu0 %v218_v58  ;;  %4429 = vst [vmem:[#allocation3_spill] sm:$0xff] %v2998_v13  ;;  %vm954_vm15 = vcmp.ne.s32.totalorder %v2979_v12, 0  ;;  %vm990_vm0 = vcmp.lt.s32.totalorder %v2979_v12, 0  ;;  %v3013_v18 = vadd.s32 18, %v2979_v12  ;;  %vm957_vm1 = vcmp.ne.s32.totalorder %v2998_v13, 0 }
  0x5e   : > { %v2982_v14 = vmul.u32.u64.low 3817748708, %v2936_v57  ;;  %v2983_v15 = vmul.u32.u64.high 3817748708, %v2936_v57, %v2982_v14  ;;  %vm993_vm2 = vcmp.lt.s32.totalorder %v2998_v13, 0  ;;  %v3026_v36 = vadd.s32 18, %v2998_v13  ;;  %vm3059_vm9 = vmand %vm990_vm0, %vm954_vm15 }
  0x5f   : > { %vm3070_vm14 = vmand %vm993_vm2, %vm957_vm1  ;;  %v3110_v10 = vmul.u32.u64.low 3817748708, %v3053_v42  ;;  %v3111_v14 = vmul.u32.u64.high 3817748708, %v3053_v42, %v3110_v10  ;;  %v3129_v19 = vmul.u32.u64.low 3817748708, %v3077_v54  ;;  %v3130_v31 = vmul.u32.u64.high 3817748708, %v3077_v54, %v3129_v19 }
  0x60   : > { %2447 = vmatmul.mubr.f32.gmra.mrb[24].mxu0 %v219_v59  ;;  %v659_v59 = vshrl.u32 %v2879_v37, 4  ;;  %v3029_v37 = vsub.s32 %v2863_v29, %v649_v23  ;;  %v3049_v29 = vadd.s32 18, %v3002_v24  ;;  %v3122_v23 = vadd.s32 208, %v2812_v62 }
  0x61   : > { %v857_v10 = vshrl.u32 %v3111_v14, 4  ;;  %v3224_v40 = vmul.u32.u64.low 3817748708, %v3162_v63  ;;  %v3225_v19 = vmul.u32.u64.high 3817748708, %v3162_v63, %v3224_v40  ;;  %v747_v14 = vshrl.u32 %v3130_v31, 4 }
  0x62   : > { %v660_v16 = vmul.u32 18, %v659_v59  ;;  %4432 = vst [vmem:[#allocation6_spill] sm:$0xff] %v3029_v37  ;;  %4436 = vst [vmem:[#allocation8_spill] sm:$0xff] %v3049_v29  ;;  %vm958_vm15 = vcmp.ne.s32.totalorder %v3029_v37, 0  ;;  %vm994_vm0 = vcmp.lt.s32.totalorder %v3029_v37, 0  ;;  %v4441_v59 = vmov 0 }
  0x63   : > { %v4442_v59 = vsel %vm3086_vm6, 4294967295, %v4441_v59  ;;  %v3094_v0 = vadd.s32 18, %v3029_v37  ;;  %vm3113_vm3 = vmand %vm994_vm0, %vm958_vm15  ;;  %v858_v7 = vmul.u32 18, %v857_v10  ;;  %v3256_v31 = vadd.s32 240, %v2812_v62 }
  0x64   : > { %v3016_v30 = vsub.s32 %v2856_v25, %v660_v16  ;;  %v3033_v25 = vsub.s32 %v2870_v32, %v682_v26  ;;  %v703_v32 = vshrl.u32 %v2983_v15, 4  ;;  %4443 = vst [vmem:[#allocation9_spill] sm:$0xff] %v4442_v59  ;;  %v4450_v15 = vmov 0 }
  0x65   : > { %4445 = vst [vmem:[#allocation11_spill] sm:$0xff] %v3094_v0  ;;  %v4451_v15 = vsel %vm3113_vm3, 4294967295, %v4450_v15  ;;  %v3118_v16 = vsub.s32 %v2900_v46, %v671_v45  ;;  %v4453_v26 = vmov 0  ;;  %v726_v45 = vmul.u32 18, %v725_v20 }
  0x66   : > { %4431 = vst [vmem:[#allocation5_spill] sm:$0xff] %v3016_v30  ;;  %4433 = vst [vmem:[#allocation7_spill] sm:$0xff] %v3033_v25  ;;  %vm959_vm10 = vcmp.ne.s32.totalorder %v3016_v30, 0  ;;  %vm995_vm13 = vcmp.lt.s32.totalorder %v3016_v30, 0  ;;  %v3091_v60 = vadd.s32 18, %v3016_v30  ;;  %vm961_vm1 = vcmp.ne.s32.totalorder %v3033_v25, 0 }
  0x67   : > { %vm997_vm2 = vcmp.lt.s32.totalorder %v3033_v25, 0  ;;  %vm3102_vm12 = vmand %vm995_vm13, %vm959_vm10  ;;  %v3107_v5 = vadd.s32 18, %v3033_v25  ;;  %v704_v9 = vmul.u32 18, %v703_v32  ;;  %4452 = vst [vmem:[#allocation14_spill] sm:$0xff] %v4451_v15  ;;  %vm960_vm10 = vcmp.ne.s32.totalorder %v3118_v16, 0 }
  0x68   : > { %4444 = vst [vmem:[#allocation10_spill] sm:$0xff] %v3091_v60  ;;  %v4447_v4 = vsel %vm3102_vm12, 4294967295, %v4446_v4  ;;  %vm3124_vm5 = vmand %vm997_vm2, %vm961_vm1  ;;  %v3133_v39 = vmul.u32.u64.low 3817748708, %v3080_v56  ;;  %v3134_v32 = vmul.u32.u64.high 3817748708, %v3080_v56, %v3133_v39  ;;  %vm996_vm13 = vcmp.lt.s32.totalorder %v3118_v16, 0 }
  0x69   : > { %4448 = vst [vmem:[#allocation12_spill] sm:$0xff] %v4447_v4  ;;  %4449 = vst [vmem:[#allocation13_spill] sm:$0xff] %v3107_v5  ;;  %v4454_v26 = vsel %vm3124_vm5, 4294967295, %v4453_v26  ;;  %v3159_v39 = vsub.s32 %v2936_v57, %v704_v9  ;;  %v3182_v57 = vsub.s32 %v2952_v1, %v693_v17  ;;  %v3216_v1 = vadd.s32 18, %v3118_v16 }
  0x6a   : > { %4455 = vst [vmem:[#allocation15_spill] sm:$0xff] %v4454_v26  ;;  %v3185_v9 = vmul.u32.u64.low 3817748708, %v3122_v23  ;;  %v3186_v20 = vmul.u32.u64.high 3817748708, %v3122_v23, %v3185_v9  ;;  %v715_v17 = vmul.u32 18, %v714_v47  ;;  %v3229_v49 = vsub.s32 %v2990_v21, %v726_v45  ;;  %vm3282_vm0 = vmand %vm996_vm13, %vm960_vm10 }
  0x6b   : > { %4456 = vst [vmem:[#allocation16_spill] sm:$0xff] %v3159_v39  ;;  %4457 = vst [vmem:[#allocation17_spill] sm:$0xff] %v3182_v57  ;;  %v3219_v9 = vadd.s32 224, %v2812_v62  ;;  %vm963_vm15 = vcmp.ne.s32.totalorder %v3159_v39, 0  ;;  %v3232_v46 = vmul.u32.u64.low 3817748708, %v3173_v34  ;;  %v3233_v22 = vmul.u32.u64.high 3817748708, %v3173_v34, %v3232_v46 }
  0x6c   : > { %4458 = vst [vmem:[#allocation18_spill] sm:$0xff] %v3229_v49  ;;  %v3236_v47 = vadd.s32 18, %v3159_v39  ;;  %v736_v61 = vshrl.u32 %v3134_v32, 4  ;;  %v3242_v40 = vsub.s32 %v3005_v27, %v715_v17  ;;  %v3249_v45 = vadd.s32 248, %v2812_v62 }
  0x6d   : > { %v3245_v11 = vmul.u32.u64.low 3817748708, %v3219_v9  ;;  %v3246_v21 = vmul.u32.u64.high 3817748708, %v3219_v9, %v3245_v11  ;;  %v3253_v46 = vadd.s32 18, %v3182_v57  ;;  %v3261_v27 = vadd.s32 18, %v3229_v49 }
  0x6e   : > { %4459 = vst [vmem:[#allocation19_spill] sm:$0xff] %v3236_v47  ;;  %4460 = vst [vmem:[#allocation20_spill] sm:$0xff] %v3242_v40  ;;  %v3264_v11 = vadd.s32 144, %v2812_v62  ;;  %v748_v32 = vmul.u32 18, %v747_v14  ;;  %v737_v17 = vmul.u32 18, %v736_v61  ;;  %v846_v6 = vshrl.u32 %v3186_v20, 4 }
  0x6f   : > { %4461 = vst [vmem:[#allocation21_spill] sm:$0xff] %v3253_v46  ;;  %4462 = vst [vmem:[#allocation22_spill] sm:$0xff] %v3261_v27  ;;  %v3268_v25 = vadd.s32 264, %v2812_v62  ;;  %v3272_v10 = vmul.u32.u64.low 3817748708, %v3249_v45  ;;  %v3273_v5 = vmul.u32.u64.high 3817748708, %v3249_v45, %v3272_v10  ;;  %v3276_v26 = vadd.s32 168, %v2812_v62 }
  0x70   : > { %v4463_v61 = vmov 0  ;;  %v3287_v20 = vsub.s32 %v3053_v42, %v858_v7  ;;  %v769_v14 = vshrl.u32 %v3225_v19, 4  ;;  %vm4465_vm2 = vcmp.lt.s32.totalorder %v3159_v39, 0 }
  0x71   : > { %v4464_v61 = vsel %vm3282_vm0, 4294967295, %v4463_v61  ;;  %v3291_v37 = vmul.u32.u64.low 3817748708, %v3256_v31  ;;  %v3292_v0 = vmul.u32.u64.high 3817748708, %v3256_v31, %v3291_v37  ;;  %vm3298_vm1 = vmand %vm4465_vm2, %vm963_vm15  ;;  %v4466_v10 = vmov 0 }
  0x72   : > { %v4467_v10 = vsel %vm3298_vm1, 4294967295, %v4466_v10  ;;  %vm1000_vm10 = vcmp.lt.s32.totalorder %v3242_v40, 0  ;;  %v879_v15 = vshrl.u32 %v3233_v22, 4  ;;  %vm4468_vm13 = vcmp.ne.s32.totalorder %v3182_v57, 0 }
  0x73   : > { %v3305_v7 = vmul.u32.u64.low 3817748708, %v3264_v11  ;;  %v3306_v42 = vmul.u32.u64.high 3817748708, %v3264_v11, %v3305_v7  ;;  %vm4469_vm5 = vcmp.lt.s32.totalorder %v3182_v57, 0  ;;  %v4470_v37 = vmov 0 }
  0x74   : > { %vm3312_vm3 = vmand %vm4469_vm5, %vm4468_vm13  ;;  %v3317_v19 = vadd.s32 18, %v3242_v40  ;;  %v847_v30 = vmul.u32 18, %v846_v6  ;;  %v3320_v60 = vmul.u32.u64.low 3817748708, %v3268_v25  ;;  %v3321_v4 = vmul.u32.u64.high 3817748708, %v3268_v25, %v3320_v60 }
  0x75   : > { %v4471_v37 = vsel %vm3312_vm3, 4294967295, %v4470_v37  ;;  %vm4474_vm15 = vcmp.ne.s32.totalorder %v3229_v49, 0  ;;  %vm4475_vm2 = vcmp.lt.s32.totalorder %v3229_v49, 0  ;;  %v4476_v22 = vmov 0 }
  0x76   : > { %4472 = vst [vmem:[#allocation23_spill] sm:$0xff] %v4471_v37  ;;  %4473 = vst [vmem:[#allocation24_spill] sm:$0xff] %v3317_v19  ;;  %v3332_v7 = vsub.s32 %v3077_v54, %v748_v32  ;;  %v868_v24 = vshrl.u32 %v3246_v21, 4  ;;  %v3336_v29 = vmul.u32.u64.low 3817748708, %v3276_v26  ;;  %v3337_v6 = vmul.u32.u64.high 3817748708, %v3276_v26, %v3336_v29 }
  0x77   : > { %vm3327_vm12 = vmand %vm4475_vm2, %vm4474_vm15  ;;  %vm4479_vm5 = vcmp.ne.s32.totalorder %v3242_v40, 0  ;;  %v4480_v60 = vmov 0  ;;  %v3346_v59 = vsub.s32 %v3080_v56, %v737_v17  ;;  %vm977_vm15 = vcmp.ne.s32.totalorder %v3287_v20, 0 }
  0x78   : > { %v4477_v22 = vsel %vm3327_vm12, 4294967295, %v4476_v22  ;;  %vm3341_vm13 = vmand %vm1000_vm10, %vm4479_vm5  ;;  %vm1013_vm2 = vcmp.lt.s32.totalorder %v3287_v20, 0  ;;  %v770_v54 = vmul.u32 18, %v769_v14  ;;  %v880_v32 = vmul.u32 18, %v879_v15 }
  0x79   : > { %4478 = vst [vmem:[#allocation25_spill] sm:$0xff] %v4477_v22  ;;  %v4481_v60 = vsel %vm3341_vm13, 4294967295, %v4480_v60  ;;  %v3359_v13 = vadd.s32 256, %v2812_v62  ;;  %v3370_v14 = vadd.s32 18, %v3287_v20  ;;  %v3373_v21 = vsub.s32 %v3122_v23, %v847_v30  ;;  %vm3386_vm10 = vmand %vm1013_vm2, %vm977_vm15 }
  0x7a   : > { %4482 = vst [vmem:[#allocation26_spill] sm:$0xff] %v4481_v60  ;;  %v3380_v29 = vadd.s32 18, %v3332_v7  ;;  %v869_v56 = vmul.u32 18, %v868_v24  ;;  %v901_v30 = vshrl.u32 %v3273_v5, 4  ;;  %v3392_v23 = vadd.s32 18, %v3346_v59 }
  0x7b   : > { %v3395_v60 = vsub.s32 %v3162_v63, %v770_v54  ;;  %v890_v15 = vshrl.u32 %v3292_v0, 4  ;;  %v3399_v40 = vadd.s32 160, %v2812_v62  ;;  %v3402_v19 = vsub.s32 %v3173_v34, %v880_v32 }
  0x7c   : > { %v758_v49 = vshrl.u32 %v3306_v42, 4  ;;  %v3406_v24 = vmul.u32.u64.low 3817748708, %v3359_v13  ;;  %v3407_v27 = vmul.u32.u64.high 3817748708, %v3359_v13, %v3406_v24  ;;  %v1121_v63 = vsel %vm3386_vm10, %v3370_v14, %v3287_v20 }
  0x7d   : > { %vm976_vm5 = vcmp.ne.s32.totalorder %v3373_v21, 0  ;;  %v923_v0 = vshrl.u32 %v3321_v4, 4  ;;  %v3416_v5 = vadd.s32 280, %v2812_v62  ;;  %vm1012_vm15 = vcmp.lt.s32.totalorder %v3373_v21, 0 }
  0x7e   : > { %v3420_v34 = vsub.s32 %v3219_v9, %v869_v56  ;;  %v902_v42 = vmul.u32 18, %v901_v30  ;;  %v791_v54 = vshrl.u32 %v3337_v6, 4  ;;  %v891_v32 = vmul.u32 18, %v890_v15  ;;  %vm3444_vm13 = vmand %vm1012_vm15, %vm976_vm5 }
  0x7f   : > { %v3424_v24 = vmul.u32.u64.low 3817748708, %v3399_v40  ;;  %v3425_v17 = vmul.u32.u64.high 3817748708, %v3399_v40, %v3424_v24  ;;  %v3428_v20 = vadd.s32 184, %v2812_v62  ;;  %vm979_vm2 = vcmp.ne.s32.totalorder %v3402_v19, 0 }
  0x80   : > { %vm1015_vm10 = vcmp.lt.s32.totalorder %v3402_v19, 0  ;;  %v759_v4 = vmul.u32 18, %v758_v49  ;;  %v3433_v14 = vadd.s32 272, %v2812_v62  ;;  %v1084_v9 = vadd.s32 18, %v3373_v21 }
  0x81   : > { %v924_v56 = vmul.u32 18, %v923_v0  ;;  %v3437_v6 = vmul.u32.u64.low 3817748708, %v3416_v5  ;;  %v3438_v15 = vmul.u32.u64.high 3817748708, %v3416_v5, %v3437_v6  ;;  %v1087_v49 = vadd.s32 18, %v3402_v19  ;;  %vm3453_vm3 = vmand %vm1015_vm10, %vm979_vm2 }
  0x82   : > { %vm978_vm12 = vcmp.ne.s32.totalorder %v3420_v34, 0  ;;  %v3451_v24 = vsub.s32 %v3249_v45, %v902_v42  ;;  %v792_v0 = vmul.u32 18, %v791_v54  ;;  %vm1014_vm1 = vcmp.lt.s32.totalorder %v3420_v34, 0 }
  0x83   : > { %v3459_v6 = vsub.s32 %v3256_v31, %v891_v32  ;;  %v3462_v57 = vmul.u32.u64.low 3817748708, %v3428_v20  ;;  %v3463_v46 = vmul.u32.u64.high 3817748708, %v3428_v20, %v3462_v57  ;;  %v912_v37 = vshrl.u32 %v3407_v27, 4 }
  0x84   : > { %v3467_v39 = vadd.s32 176, %v2812_v62  ;;  %v3470_v45 = vmul.u32.u64.low 3817748708, %v3433_v14  ;;  %v3471_v42 = vmul.u32.u64.high 3817748708, %v3433_v14, %v3470_v45  ;;  %v1120_v54 = vsel %vm3444_vm13, %v1084_v9, %v3373_v21 }
  0x85   : > { %v3477_v31 = vadd.s32 18, %v3395_v60  ;;  %v3480_v32 = vsub.s32 %v3264_v11, %v759_v4  ;;  %v3483_v57 = vsub.s32 %v3268_v25, %v924_v56  ;;  %v1123_v27 = vsel %vm3453_vm3, %v1087_v49, %v3402_v19  ;;  %vm3506_vm3 = vmand %vm1014_vm1, %vm978_vm12 }
  0x86   : > { %v1086_v47 = vadd.s32 18, %v3420_v34  ;;  %v3491_v30 = vsub.s32 %v3276_v26, %v792_v0  ;;  %v4489_v11 = vsel %vm2911_vm7, %v2916_v51, %v2872_v33  ;;  %v780_v50 = vshrl.u32 %v3425_v17, 4 }
  0x87   : > { %vm3498_vm13 = vcmp.lt.s32.totalorder %v4489_v11, 16  ;;  %v1361_v33 = vmul.u32 2, %v2812_v62  ;;  %v4494_v51 = vsel %vm2929_vm8, %v2919_v52, %v2875_v35  ;;  %vm3523_vm12 = vcmp.lt.s32.totalorder %v1121_v63, 16 }
  0x88   : > { %vm3519_vm7 = vcmp.lt.s32.totalorder %v4494_v51, 16  ;;  %v913_v22 = vmul.u32 18, %v912_v37  ;;  %v3529_v17 = vmul.u32.u64.low 3817748708, %v3467_v39  ;;  %v3530_v4 = vmul.u32.u64.high 3817748708, %v3467_v39, %v3529_v17 }
  0x89   : > { %vm3534_vm8 = vcmp.lt.s32.totalorder %v1120_v54, 16  ;;  %v1089_v52 = vadd.s32 18, %v3451_v24  ;;  %v945_v55 = vshrl.u32 %v3438_v15, 4  ;;  %v1122_v37 = vsel %vm3506_vm3, %v1086_v47, %v3420_v34 }
  0x8a   : > { %vm4501_vm10 = vcmp.ne.s32.totalorder %v3451_v24, 0  ;;  %vm4502_vm2 = vcmp.lt.s32.totalorder %v3451_v24, 0  ;;  %v1088_v9 = vadd.s32 18, %v3459_v6  ;;  %v3555_v56 = vadd.s32 18, %v3483_v57 }
  0x8b   : > { %vm3549_vm1 = vmand %vm4502_vm2, %vm4501_vm10  ;;  %v3558_v49 = vadd.s32 200, %v2812_v62  ;;  %v4505_v47 = vsel %vm2942_vm11, %v2922_v53, %v2881_v38  ;;  %v4506_v34 = vmov 0  ;;  %vm4508_vm2 = vcmp.ne.s32.totalorder %v3459_v6, 0 }
  0x8c   : > { %vm3565_vm3 = vcmp.lt.s32.totalorder %v4505_v47, 16  ;;  %vm4509_vm10 = vcmp.lt.s32.totalorder %v3459_v6, 0  ;;  %v781_v0 = vmul.u32 18, %v780_v50  ;;  %v813_v45 = vshrl.u32 %v3463_v46, 4  ;;  %v3610_v46 = vld [vmem:[%s4379_s2] ss:$0 sm:$0xff] }
  0x8d   : > { %v4507_v34 = vsel %vm3565_vm3, 4294967295, %v4506_v34  ;;  %vm3573_vm5 = vmand %vm4509_vm10, %vm4508_vm2  ;;  %v4512_v54 = vlaneseq  ;;  %v1362_v11 = vadd.s32 1, %v1361_v33  ;;  %vm4513_vm11 = vnez %v4428_v8 }
  0x8e   : > { %v4514_v38 = vsel %vm4513_vm11, %v2955_v2, %v2894_v44  ;;  %vm3588_vm0 = vcmp.lt.s32.totalorder %v1123_v27, 16  ;;  %v3593_v50 = vadd.s32 18, %v3480_v32  ;;  %vm4519_vm2 = vcmp.ne.s32.totalorder %v3483_v57, 0 }
  0x8f   : > { %v1360_v58 = vand.u32 127, %v4512_v54  ;;  %vm3584_vm15 = vcmp.lt.s32.totalorder %v4514_v38, 16  ;;  %vm4520_vm10 = vcmp.lt.s32.totalorder %v3483_v57, 0  ;;  %v3604_v44 = vsub.s32 %v3359_v13, %v913_v22 }
  0x90   : > { %vm3599_vm3 = vmand %vm4520_vm10, %vm4519_vm2  ;;  %v934_v2 = vshrl.u32 %v3471_v42, 4  ;;  %vm3612_vm11 = vcmp.lt.s32.totalorder %v1122_v37, 16  ;;  %v1125_v33 = vsel %vm3549_vm1, %v1089_v52, %v3451_v24  ;;  %v3620_v51 = vadd.s32 18, %v3491_v30 }
  0x91   : > { %v946_v13 = vmul.u32 18, %v945_v55  ;;  %v1124_v42 = vsel %vm3573_vm5, %v1088_v9, %v3459_v6  ;;  %v3628_v22 = vmul.u32.u64.low 3817748708, %v3558_v49  ;;  %v3629_v17 = vmul.u32.u64.high 3817748708, %v3558_v49, %v3628_v22 }
  0x92   : > { %v3632_v37 = vadd.s32 192, %v2812_v62  ;;  %v4525_v52 = vsel %vm3043_vm4, %v3008_v28, %v2958_v3  ;;  %v1127_v6 = vsel %vm3599_vm3, %v3555_v56, %v3483_v57  ;;  %v3648_v63 = vsub.s32 %v3399_v40, %v781_v0 }
  0x93   : > { %vm3639_vm1 = vcmp.lt.s32.totalorder %v4525_v52, 16  ;;  %v814_v62 = vmul.u32 18, %v813_v45  ;;  %vm1363_vm5 = vcmp.eq.s32.totalorder %v1360_v58, %v1362_v11  ;;  %v4528_v3 = vsel %vm3059_vm9, %v3013_v18, %v2979_v12 }
  0x94   : > { %vm3656_vm4 = vcmp.lt.s32.totalorder %v4528_v3, 16  ;;  %vm982_vm3 = vcmp.ne.s32.totalorder %v3604_v44, 0  ;;  %v802_v40 = vshrl.u32 %v3530_v4, 4  ;;  %v935_v57 = vmul.u32 18, %v934_v2 }
  0x95   : > { %vm3664_vm10 = vcmp.lt.s32.totalorder %v1125_v33, 16  ;;  %vm3668_vm9 = vcmp.lt.s32.totalorder %v1124_v42, 16  ;;  %v3674_v18 = vsub.s32 %v3416_v5, %v946_v13  ;;  %v4535_v33 = vld [vmem:[#allocation3_spill] sm:$0xff]  ;;  %v4537_v42 = vmov 0 }
  0x96   : > { %v3680_v54 = vmul.u32.u64.low 3817748708, %v3632_v37  ;;  %v3681_v38 = vmul.u32.u64.high 3817748708, %v3632_v37, %v3680_v54  ;;  %v4536_v13 = vsel %vm3070_vm14, %v3026_v36, %v4535_v33  ;;  %v3697_v22 = vsub.s32 %v3428_v20, %v814_v62  ;;  %v4541_v36 = vld [vmem:[#allocation8_spill] sm:$0xff]  ;;  %v4558_v33 = vld [vmem:[#allocation10_spill] sm:$0xff] }
  0x97   : > { %vm3690_vm2 = vcmp.lt.s32.totalorder %v4536_v13, 16  ;;  %v3726_v11 = vadd.s32 18, %v3604_v44  ;;  %v3729_v62 = vsub.s32 %v3433_v14, %v935_v57  ;;  %v4559_v13 = vld [vmem:[#allocation5_spill] sm:$0xff]  ;;  %v1093_v53 = vadd.s32 18, %v3674_v18 }
  0x98   : > { %v4538_v42 = vsel %vm3690_vm2, 4294967295, %v4537_v42  ;;  %vm1021_vm2 = vcmp.lt.s32.totalorder %v3674_v18, 0 }
 0x103   : > { %v2412_v24 = vpop.f32.mrb[0].mxu0  ;;  %v2451_v47 = vpop.f32.mrb[0].mxu1 }
 0x104   : > { %v308_v9 = vadd.f32 %v2412_v24, %v3610_v46  ;;  %v302_v41 = vpop.f32.mrb[1].mxu0  ;;  %v438_v15 = vadd.f32 %v2451_v47, %v3610_v46  ;;  %v432_v0 = vpop.f32.mrb[1].mxu1  ;;  %v4539_v24 = vmov 0.0   ;;  %v4544_v47 = vmov 0 }
 0x105   : > { %v303_v56 = vadd.f32 %v3610_v46, %v302_v41  ;;  %v433_v45 = vadd.f32 %v3610_v46, %v432_v0  ;;  %v3701_v26 = vsel %vm1363_vm5, 1.0, %v4539_v24  ;;  %v4542_v41 = vld [vmem:[#allocation4_spill] sm:$0xff] }
 0x106   : > { %v1275_v4 = vsel %vm3498_vm13, %v308_v9, -3e+38  ;;  %v1301_v21 = vsel %vm3523_vm12, %v438_v15, -3e+38  ;;  %v4543_v3 = vsel %vm3086_vm6, %v4541_v36, %v4542_v41  ;;  %vm4546_vm13 = vcmp.ne.s32.totalorder %v3332_v7, 0  ;;  %v4563_v9 = vld [vmem:[#allocation14_spill] sm:$0xff] }
 0x107   : > { %1311 = vst [vmem:[#allocation2 + $0x1b] sm:$0xff] %v1275_v4  ;;  %v1274_v8 = vsel %vm3519_vm7, %v303_v56, -3e+38  ;;  %v2415_v2 = vpop.f32.mrb[2].mxu0  ;;  %vm3709_vm14 = vcmp.lt.s32.totalorder %v4543_v3, 16  ;;  %vm4547_vm7 = vcmp.lt.s32.totalorder %v3332_v7, 0 }
 0x108   : > { %1310 = vst [vmem:[#allocation2 + $0x13] sm:$0xff] %v1274_v8  ;;  %v318_v48 = vadd.f32 %v2415_v2, %v3610_v46  ;;  %v312_v52 = vpop.f32.mrb[3].mxu0  ;;  %v4545_v47 = vsel %vm3709_vm14, 4294967295, %v4544_v47  ;;  %vm3717_vm12 = vmand %vm4547_vm7, %vm4546_vm13  ;;  %v1300_v19 = vsel %vm3534_vm8, %v433_v45, -3e+38  ;;  %v2454_v58 = vpop.f32.mrb[2].mxu1  ;;  %vm4555_vm13 = vnez %v4507_v34 }
 0x109   : > { %1337 = vst [vmem:[#allocation2 + $0xeb] sm:$0xff] %v1301_v21  ;;  %v313_v56 = vadd.f32 %v3610_v46, %v312_v52  ;;  %1336 = vst [vmem:[#allocation2 + $0xe3] sm:$0xff] %v1300_v19  ;;  %v448_v15 = vadd.f32 %v2454_v58, %v3610_v46  ;;  %v442_v35 = vpop.f32.mrb[3].mxu1  ;;  %vm3735_vm7 = vcmp.lt.s32.totalorder %v1127_v6, 16  ;;  %vm4552_vm6 = vcmp.lt.s32.totalorder %v3604_v44, 0  ;;  %v4556_v2 = vld [vmem:[#allocation12_spill] sm:$0xff] }
 0x10a   : > { %vm3743_vm5 = vmand %vm4552_vm6, %vm982_vm3  ;;  %vm985_vm14 = vcmp.ne.s32.totalorder %v3674_v18, 0  ;;  %v1277_v57 = vsel %vm4555_vm13, %v318_v48, -3e+38  ;;  %v443_v6 = vadd.f32 %v3610_v46, %v442_v35  ;;  %v803_v4 = vmul.u32 18, %v802_v40  ;;  %v4565_v36 = vld [vmem:[#allocation11_spill] sm:$0xff]  ;;  %v4566_v41 = vld [vmem:[#allocation6_spill] sm:$0xff] }
 0x10b   : > { %v835_v45 = vshrl.u32 %v3629_v17, 4  ;;  %1313 = vst [vmem:[#allocation2 + $0x2b] sm:$0xff] %v1277_v57  ;;  %v1276_v54 = vsel %vm3584_vm15, %v313_v56, -3e+38  ;;  %v2418_v8 = vpop.f32.mrb[4].mxu0  ;;  %vm4557_vm3 = vnez %v4556_v2  ;;  %v1111_v40 = vsel %vm3717_vm12, %v3380_v29, %v3332_v7  ;;  %v2457_v58 = vpop.f32.mrb[4].mxu1 }
 0x10c   : > { %v4560_v21 = vsel %vm4557_vm3, %v4558_v33, %v4559_v13  ;;  %v1303_v17 = vsel %vm3588_vm0, %v448_v15, -3e+38  ;;  %1312 = vst [vmem:[#allocation2 + $0x23] sm:$0xff] %v1276_v54  ;;  %v328_v48 = vadd.f32 %v2418_v8, %v3610_v46  ;;  %v322_v52 = vpop.f32.mrb[5].mxu0  ;;  %vm4564_vm3 = vnez %v4563_v9  ;;  %v4576_v13 = vld [vmem:[#allocation15_spill] sm:$0xff] }
 0x10d   : > { %vm3761_vm6 = vcmp.lt.s32.totalorder %v4560_v21, 16  ;;  %v4567_v3 = vsel %vm4564_vm3, %v4565_v36, %v4566_v41  ;;  %1339 = vst [vmem:[#allocation2 + $0xfb] sm:$0xff] %v1303_v17  ;;  %v1302_v25 = vsel %vm3612_vm11, %v443_v6, -3e+38  ;;  %v3789_v56 = vadd.s32 18, %v3648_v63  ;;  %vm3799_vm3 = vmand %vm1021_vm2, %vm985_vm14  ;;  %v4578_v21 = vld [vmem:[#allocation13_spill] sm:$0xff] }
 0x10e   : > { %vm3780_vm8 = vcmp.lt.s32.totalorder %v4567_v3, 16  ;;  %v1126_v15 = vsel %vm3743_vm5, %v3726_v11, %v3604_v44  ;;  %v323_v35 = vadd.f32 %v3610_v46, %v322_v52  ;;  %vm4572_vm11 = vcmp.ne.s32.totalorder %v3346_v59, 0  ;;  %1338 = vst [vmem:[#allocation2 + $0xf3] sm:$0xff] %v1302_v25  ;;  %v452_v11 = vpop.f32.mrb[5].mxu1  ;;  %v4579_v17 = vld [vmem:[#allocation7_spill] sm:$0xff] }
 0x10f   : > { %vm4573_vm13 = vcmp.lt.s32.totalorder %v3346_v59, 0  ;;  %v458_v44 = vadd.f32 %v2457_v58, %v3610_v46  ;;  %vm984_vm2 = vcmp.ne.s32.totalorder %v3729_v62, 0  ;;  %vm1020_vm14 = vcmp.lt.s32.totalorder %v3729_v62, 0  ;;  %v2421_v33 = vpop.f32.mrb[6].mxu0  ;;  %v2460_v41 = vpop.f32.mrb[6].mxu1  ;;  %v4628_v58 = vld [vmem:[#allocation18_spill] sm:$0xff] }
 0x110   : > { %vm3808_vm0 = vmand %vm4573_vm13, %vm4572_vm11  ;;  %v1279_v14 = vsel %vm3639_vm1, %v328_v48, -3e+38  ;;  %v453_v6 = vadd.f32 %v3610_v46, %v452_v11  ;;  %v3820_v54 = vsub.s32 %v3467_v39, %v803_v4  ;;  %v824_v8 = vshrl.u32 %v3681_v38, 4  ;;  %v332_v48 = vpop.f32.mrb[7].mxu0  ;;  %v462_v43 = vpop.f32.mrb[7].mxu1  ;;  %v4597_v11 = vld [vmem:[#allocation16_spill] sm:$0xff] }
 0x111   : > { %1315 = vst [vmem:[#allocation2 + $0x3b] sm:$0xff] %v1279_v14  ;;  %v1278_v2 = vsel %vm3656_vm4, %v323_v35, -3e+38  ;;  %vm4577_vm13 = vnez %v4576_v13  ;;  %v1129_v39 = vsel %vm3799_vm3, %v1093_v53, %v3674_v18  ;;  %v1092_v38 = vadd.s32 18, %v3729_v62  ;;  %vm3860_vm3 = vmand %vm1020_vm14, %vm984_vm2  ;;  %v4605_v13 = vld [vmem:[#allocation23_spill] sm:$0xff] }
 0x112   : > { %v4580_v52 = vsel %vm4577_vm13, %v4578_v21, %v4579_v17  ;;  %v836_v4 = vmul.u32 18, %v835_v45  ;;  %1314 = vst [vmem:[#allocation2 + $0x33] sm:$0xff] %v1278_v2  ;;  %v338_v28 = vadd.f32 %v2421_v33, %v3610_v46  ;;  %vm4583_vm1 = vnez %v4464_v61  ;;  %v4607_v21 = vld [vmem:[#allocation21_spill] sm:$0xff] }
 0x113   : > { %vm3830_vm11 = vcmp.lt.s32.totalorder %v4580_v52, 16  ;;  %v4584_v9 = vsel %vm4583_vm1, %v3216_v1, %v3118_v16  ;;  %v1110_v18 = vsel %vm3808_vm0, %v3392_v23, %v3346_v59  ;;  %v1305_v45 = vsel %vm3664_vm10, %v458_v44, -3e+38  ;;  %v4596_v44 = vld [vmem:[#allocation19_spill] sm:$0xff]  ;;  %v4608_v17 = vld [vmem:[#allocation17_spill] sm:$0xff] }
 0x114   : > { %vm3844_vm4 = vcmp.lt.s32.totalorder %v4584_v9, 16  ;;  %v1304_v53 = vsel %vm3668_vm9, %v453_v6, -3e+38  ;;  %v333_v1 = vadd.f32 %v3610_v46, %v332_v48  ;;  %1341 = vst [vmem:[#allocation2 + $0x10b] sm:$0xff] %v1305_v45  ;;  %v468_v61 = vadd.f32 %v2460_v41, %v3610_v46  ;;  %v2463_v48 = vpop.f32.mrb[8].mxu1  ;;  %v1366_v16 = vld [vmem:[#allocation2 + $0x12] sm:$0xff] }
 0x115   : > { %1340 = vst [vmem:[#allocation2 + $0x103] sm:$0xff] %v1304_v53  ;;  %vm3866_vm10 = vcmp.lt.s32.totalorder %v1126_v15, 16  ;;  %vm4591_vm13 = vnez %v4538_v42  ;;  %v463_v25 = vadd.f32 %v3610_v46, %v462_v43  ;;  %vm3874_vm2 = vcmp.lt.s32.totalorder %v1129_v39, 16  ;;  %v2424_v15 = vpop.f32.mrb[8].mxu0 }
 0x116   : > { %v1281_v12 = vsel %vm4591_vm13, %v338_v28, -3e+38  ;;  %v825_v27 = vmul.u32 18, %v824_v8  ;;  %vm4594_vm14 = vnez %v4545_v47  ;;  %vm4595_vm1 = vnez %v4467_v10  ;;  %v1369_v47 = vld [vmem:[#allocation2 + $0x24] sm:$0xff]  ;;  %v342_v33 = vpop.f32.mrb[9].mxu0 }
 0x117   : > { %1317 = vst [vmem:[#allocation2 + $0x4b] sm:$0xff] %v1281_v12  ;;  %v1280_v35 = vsel %vm4594_vm14, %v333_v1, -3e+38  ;;  %v4598_v14 = vsel %vm4595_vm1, %v4596_v44, %v4597_v11  ;;  %v4599_v42 = vmov 0  ;;  %vm4601_vm13 = vcmp.ne.s32.totalorder %v3395_v60, 0  ;;  %v2427_v3 = vpop.f32.mrb[10].mxu0 }
 0x118   : > { %vm3885_vm9 = vcmp.lt.s32.totalorder %v4598_v14, 16  ;;  %vm4602_vm5 = vcmp.lt.s32.totalorder %v3395_v60, 0  ;;  %v3898_v8 = vadd.s32 18, %v3697_v22  ;;  %v1128_v10 = vsel %vm3860_vm3, %v1092_v38, %v3729_v62  ;;  %1316 = vst [vmem:[#allocation2 + $0x43] sm:$0xff] %v1280_v35  ;;  %v4625_v12 = vld [vmem:[#allocation25_spill] sm:$0xff] }
 0x119   : > { %v4600_v42 = vsel %vm3885_vm9, 4294967295, %v4599_v42  ;;  %vm3893_vm15 = vmand %vm4602_vm5, %vm4601_vm13  ;;  %v348_v2 = vadd.f32 %v2424_v15, %v3610_v46  ;;  %vm4606_vm1 = vnez %v4605_v13  ;;  %vm4612_vm13 = vcmp.ne.s32.totalorder %v3480_v32, 0  ;;  %v1371_v44 = vld [vmem:[#allocation2 + $0x34] sm:$0x3]  ;;  %v3998_v13 = vld [vmem:[#allocation2 + $0x36] sm:$0xff] }
 0x11a   : > { %v4609_v52 = vsel %vm4606_vm1, %v4607_v21, %v4608_v17  ;;  %vm4613_vm14 = vcmp.lt.s32.totalorder %v3480_v32, 0  ;;  %v1307_v62 = vsel %vm3735_vm7, %v468_v61, -3e+38  ;;  %v1306_v38 = vsel %vm3866_vm10, %v463_v25, -3e+38  ;;  %v4627_v25 = vld [vmem:[#allocation22_spill] sm:$0xff] }
 0x11b   : > { %vm3910_vm5 = vcmp.lt.s32.totalorder %v4609_v52, 16  ;;  %vm3918_vm9 = vmand %vm4613_vm14, %vm4612_vm13  ;;  %v3927_v9 = vsub.s32 %v3558_v49, %v836_v4  ;;  %v343_v45 = vadd.f32 %v3610_v46, %v342_v33  ;;  %1343 = vst [vmem:[#allocation2 + $0x11b] sm:$0xff] %v1307_v62  ;;  %v3932_v53 = vadd.s32 18, %v3820_v54  ;;  %v472_v4 = vpop.f32.mrb[9].mxu1  ;;  %v1367_v62 = vld [vmem:[#allocation2 + $0x1a] sm:$0xff] }
 0x11c   : > { %1342 = vst [vmem:[#allocation2 + $0x113] sm:$0xff] %v1306_v38  ;;  %v478_v0 = vadd.f32 %v2463_v48, %v3610_v46  ;;  %vm4616_vm7 = vcmp.lt.s32.totalorder %v3416_v5, 286  ;;  %v1283_v41 = vsel %vm3761_vm6, %v348_v2, -3e+38  ;;  %vm4619_vm13 = vcmp.ne.s32.totalorder %v3491_v30, 0 }
 0x11d   : > { %vm3939_vm10 = vmand %vm4616_vm7, %vm3874_vm2  ;;  %vm4620_vm1 = vcmp.lt.s32.totalorder %v3491_v30, 0  ;;  %v473_v61 = vadd.f32 %v3610_v46, %v472_v4  ;;  %vm3954_vm14 = vcmp.lt.s32.totalorder %v1128_v10, 16  ;;  %v3959_v43 = vsub.s32 %v3632_v37, %v825_v27  ;;  %1319 = vst [vmem:[#allocation2 + $0x5b] sm:$0xff] %v1283_v41  ;;  %v1370_v27 = vld [vmem:[#allocation2 + $0x2c] sm:$0xff]  ;;  %v1368_v38 = vld [vmem:[#allocation2 + $0x22] sm:$0x3] }
 0x11e   : > { %vm3949_vm3 = vmand %vm4620_vm1, %vm4619_vm13  ;;  %v1282_v34 = vsel %vm3780_vm8, %v343_v45, -3e+38  ;;  %vm4626_vm6 = vnez %v4625_v12  ;;  %v4630_v15 = vmov 0  ;;  %v1113_v37 = vsel %vm3893_vm15, %v3477_v31, %v3395_v60  ;;  %v352_v60 = vpop.f32.mrb[11].mxu0  ;;  %v4636_v31 = vld [vmem:[#allocation26_spill] sm:$0xff]  ;;  %v4639_v10 = vld [vmem:[#allocation20_spill] sm:$0xff] }
 0x11f   : > { %v4629_v35 = vsel %vm4626_vm6, %v4627_v25, %v4628_v58  ;;  %v1375_v11 = vmax.f32 %v1366_v16, %v1369_v47  ;;  %v1112_v19 = vsel %vm3918_vm9, %v3593_v50, %v3480_v32  ;;  %vm4632_vm8 = vcmp.ne.s32.totalorder %v3648_v63, 0  ;;  %1318 = vst [vmem:[#allocation2 + $0x53] sm:$0xff] %v1282_v34  ;;  %v4638_v47 = vld [vmem:[#allocation24_spill] sm:$0xff]  ;;  %v2430_v34 = vpop.f32.mrb[12].mxu0  ;;  %v4035_v55 = vld [vmem:[#allocation2 + $0x3e] sm:$0xff] }
 0x120   : > { %vm3968_vm2 = vcmp.lt.s32.totalorder %v4629_v35, 16  ;;  %vm4633_vm1 = vcmp.lt.s32.totalorder %v3648_v63, 0  ;;  %v358_v6 = vadd.f32 %v2427_v3, %v3610_v46  ;;  %vm4637_vm15 = vnez %v4636_v31  ;;  %v1374_v5 = vld [vmem:[#allocation2 + $0x46] sm:$0x3] }
 0x121   : > { %v4631_v15 = vsel %vm3968_vm2, 4294967295, %v4630_v15  ;;  %vm3984_vm7 = vmand %vm4633_vm1, %vm4632_vm8  ;;  %v4640_v2 = vsel %vm4637_vm15, %v4638_v47, %v4639_v10  ;;  %vm4643_vm6 = vcmp.ne.s32.totalorder %v3697_v22, 0  ;;  %vm4644_vm8 = vcmp.lt.s32.totalorder %v3697_v22, 0  ;;  %v1481_v50 = vld [vmem:[#allocation2 + $0x46] sm:$0x3] }
 0x122   : > { %vm3994_vm13 = vcmp.lt.s32.totalorder %v4640_v2, 16  ;;  %vm4004_vm1 = vmand %vm4644_vm8, %vm4643_vm6  ;;  %v1309_v17 = vsel %vm3939_vm10, %v478_v0, -3e+38  ;;  %vm975_vm2 = vcmp.ne.s32.totalorder %v3927_v9, 0  ;;  %vm1011_vm15 = vcmp.lt.s32.totalorder %v3927_v9, 0 }
 0x123   : > { %v353_v52 = vadd.f32 %v3610_v46, %v352_v60  ;;  %v4014_v48 = vmax.f32 %v1375_v11, %v3998_v13  ;;  %1345 = vst [vmem:[#allocation2 + $0x12b] sm:$0xff] %v1309_v17  ;;  %v1308_v45 = vsel %vm3954_vm14, %v473_v61, -3e+38  ;;  %v4019_v4 = vadd.s32 18, %v3927_v9  ;;  %vm4107_vm8 = vmand %vm1011_vm15, %vm975_vm2 }
 0x124   : > { %v1285_v0 = vsel %vm3830_vm11, %v358_v6, -3e+38  ;;  %v1376_v49 = vmax.f32 %v1367_v62, %v1370_v27  ;;  %v1377_v41 = vmax.f32 %v1368_v38, %v1371_v44  ;;  %1344 = vst [vmem:[#allocation2 + $0x123] sm:$0xff] %v1308_v45  ;;  %vm974_vm10 = vcmp.ne.s32.totalorder %v3959_v43, 0 }
 0x125   : > { %1321 = vst [vmem:[#allocation2 + $0x6b] sm:$0xff] %v1285_v0  ;;  %v1284_v16 = vsel %vm3844_vm4, %v353_v52, -3e+38  ;;  %vm4031_vm14 = vcmp.lt.s32.totalorder %v1111_v40, 16  ;;  %v1115_v3 = vsel %vm3949_vm3, %v3620_v51, %v3491_v30  ;;  %v1114_v20 = vsel %vm3984_vm7, %v3789_v56, %v3648_v63  ;;  %v362_v40 = vpop.f32.mrb[13].mxu0  ;;  %v1482_v56 = vld [vmem:[#allocation2 + $0x48] sm:$0xff] }
 0x126   : > { %v1117_v7 = vsel %vm4004_vm1, %v3898_v8, %v3697_v22  ;;  %1320 = vst [vmem:[#allocation2 + $0x63] sm:$0xff] %v1284_v16  ;;  %v368_v29 = vadd.f32 %v2430_v34, %v3610_v46  ;;  %vm4055_vm12 = vcmp.lt.s32.totalorder %v1110_v18, 16  ;;  %v1379_v51 = vmax.f32 %v1376_v49, %v4035_v55  ;;  %v2433_v27 = vpop.f32.mrb[14].mxu0  ;;  %v1483_v14 = vld [vmem:[#allocation2 + $0x50] sm:$0xff]  ;;  %v4083_v6 = vld [vmem:[#allocation2 + $0x5a] sm:$0xff] }
 0x127   : > { %v1380_v63 = vmax.f32 %v1377_v41, %v1374_v5  ;;  %vm4651_vm11 = vcmp.ne.s32.totalorder %v3820_v54, 0  ;;  %vm4652_vm4 = vcmp.lt.s32.totalorder %v3820_v54, 0  ;;  %vm1010_vm7 = vcmp.lt.s32.totalorder %v3959_v43, 0  ;;  %v372_v31 = vpop.f32.mrb[15].mxu0  ;;  %v4128_v49 = vld [vmem:[#allocation2 + $0xea] sm:$0xff] }
 0x128   : > { %vm4064_vm3 = vmand %vm4652_vm4, %vm4651_vm11  ;;  %v363_v59 = vadd.f32 %v3610_v46, %v362_v40  ;;  %v1385_v23 = vrot.slane %v4014_v48, 1  ;;  %v1395_v57 = vrot.slane %v4014_v48, 2  ;;  %v4073_v18 = vadd.s32 18, %v3959_v43  ;;  %v2436_v16 = vpop.f32.mrb[16].mxu0 }
 0x129   : > { %vm4655_vm0 = vnez %v4600_v42  ;;  %v1386_v12 = vrot.slane %v1379_v51, 1  ;;  %v1388_v25 = vrot.slane %v1380_v63, 1  ;;  %v1396_v58 = vrot.slane %v1379_v51, 2  ;;  %vm4118_vm9 = vmand %vm1010_vm7, %vm974_vm10  ;;  %v382_v33 = vpop.f32.mrb[17].mxu0 }
 0x12a   : > { %v1287_v1 = vsel %vm4655_vm0, %v368_v29, -3e+38  ;;  %v1286_v35 = vsel %vm3910_vm5, %v363_v59, -3e+38  ;;  %vm4079_vm6 = vcmp.lt.s32.totalorder %v1113_v37, 16  ;;  %v1398_v11 = vrot.slane %v1380_v63, 2 }
 0x12b   : > { %1323 = vst [vmem:[#allocation2 + $0x7b] sm:$0xff] %v1287_v1  ;;  %v1488_v42 = vmax.f32 %v3998_v13, %v1482_v56  ;;  %v1116_v60 = vsel %vm4064_vm3, %v3932_v53, %v3820_v54  ;;  %1322 = vst [vmem:[#allocation2 + $0x73] sm:$0xff] %v1286_v35  ;;  %v378_v39 = vadd.f32 %v2433_v27, %v3610_v46  ;;  %vm4658_vm5 = vcmask 1046528   ;;  %v1484_v13 = vld [vmem:[#allocation2 + $0x58] sm:$0x3] }
 0x12c   : > { %v1387_v37 = vsel %vm4658_vm5, %v1385_v23, %v1386_v12  ;;  %vm4659_vm11 = vmmov %vm4658_vm5  ;;  %vm4660_vm4 = vcmask 1045504   ;;  %vm4099_vm0 = vcmp.lt.s32.totalorder %v1112_v19, 16  ;;  %v373_v52 = vadd.f32 %v3610_v46, %v372_v31  ;;  %v4152_v23 = vld [vmem:[#allocation2 + $0xf2] sm:$0xff] }
 0x12d   : > { %v1389_v47 = vsel %vm4659_vm11, %v1386_v12, %v1388_v25  ;;  %v1397_v10 = vsel %vm4660_vm4, %v1395_v57, %v1396_v58  ;;  %v1392_v28 = vmax.f32 %v4014_v48, %v1387_v37  ;;  %vm4665_vm5 = vmmov %vm4660_vm4  ;;  %vm4668_vm2 = vnez %v4631_v15  ;;  %v4136_v15 = vld [vmem:[#allocation2 + $0x62] sm:$0xff] }
 0x12e   : > { %v1393_v62 = vmax.f32 %v1379_v51, %v1389_v47  ;;  %v1399_v32 = vsel %vm4665_vm5, %v1396_v58, %v1398_v11  ;;  %v1289_v38 = vsel %vm4668_vm2, %v378_v39, -3e+38  ;;  %v1489_v45 = vmax.f32 %v4035_v55, %v1483_v14  ;;  %v1487_v55 = vld [vmem:[#allocation2 + $0x6a] sm:$0x3]  ;;  %v4154_v57 = vld [vmem:[#allocation2 + $0xfc] sm:$0xff]  ;;  %vm4676_vm1 = vmmov %vm4659_vm11 }
 0x12f   : > { %v1490_v0 = vmax.f32 %v1481_v50, %v1484_v13  ;;  %v4126_v48 = vmax.f32 %v1488_v42, %v4083_v6  ;;  %1325 = vst [vmem:[#allocation2 + $0x8b] sm:$0xff] %v1289_v38  ;;  %v1288_v41 = vsel %vm3994_vm13, %v373_v52, -3e+38  ;;  %v1402_v34 = vmax.f32 %v1392_v28, %v1397_v10  ;;  %v4163_v11 = vld [vmem:[#allocation2 + $0xfa] sm:$0x3]  ;;  %v2439_v42 = vpop.f32.mrb[18].mxu0 }
 0x130   : > { %v1403_v5 = vmax.f32 %v1393_v62, %v1399_v32  ;;  %vm4132_vm15 = vcmp.lt.s32.totalorder %v1115_v3, 16  ;;  %v1119_v40 = vsel %vm4107_vm8, %v4019_v4, %v3927_v9  ;;  %1324 = vst [vmem:[#allocation2 + $0x83] sm:$0xff] %v1288_v41  ;;  %v388_v51 = vadd.f32 %v2436_v16, %v3610_v46  ;;  %v4156_v9 = vld [vmem:[#allocation2 + $0x104] sm:$0xff]  ;;  %v392_v21 = vpop.f32.mrb[19].mxu0  ;;  %v2019_v28 = vld [vmem:[#allocation2 + $0x10c] sm:$0x3]  ;;  %vm4681_vm8 = vmmov %vm4660_vm4 }
 0x131   : > { %vm4143_vm13 = vcmp.lt.s32.totalorder %v1114_v20, 16  ;;  %v1492_v3 = vmax.f32 %v1489_v45, %v4136_v15  ;;  %v1493_v56 = vmax.f32 %v1490_v0, %v1487_v55  ;;  %v1118_v59 = vsel %vm4118_vm9, %v4073_v18, %v3959_v43  ;;  %v1588_v45 = vld [vmem:[#allocation2 + $0x6a] sm:$0x3]  ;;  %v4203_v41 = vld [vmem:[#allocation2 + $0x10e] sm:$0xff]  ;;  %v4205_v16 = vld [vmem:[#allocation2 + $0x116] sm:$0xff] }
 0x132   : > { %v383_v4 = vadd.f32 %v3610_v46, %v382_v33  ;;  %v2553_v20 = vpack.c.bf16 %v1403_v5, %v1402_v34  ;;  %v1497_v1 = vrot.slane %v4126_v48, 1  ;;  %v1506_v12 = vrot.slane %v4126_v48, 2  ;;  %v1589_v31 = vld [vmem:[#allocation2 + $0x6c] sm:$0xff]  ;;  %v1590_v37 = vld [vmem:[#allocation2 + $0x74] sm:$0xff]  ;;  %v1591_v52 = vld [vmem:[#allocation2 + $0x7c] sm:$0x3] }
 0x133   : > { %v1291_v25 = vsel %vm4031_vm14, %v388_v51, -3e+38  ;;  %v1498_v58 = vrot.slane %v1492_v3, 1  ;;  %v1500_v35 = vrot.slane %v1493_v56, 1  ;;  %v1507_v27 = vrot.slane %v1492_v3, 2  ;;  %vm4677_vm14 = vmmov %vm4676_vm1  ;;  %v2442_v34 = vpop.f32.mrb[20].mxu0 }
 0x134   : > { %1327 = vst [vmem:[#allocation2 + $0x9b] sm:$0xff] %v1291_v25  ;;  %v1290_v14 = vsel %vm4055_vm12, %v383_v4, -3e+38  ;;  %2554 = vmatpush3.bf16.msra.mxu1 %v2553_v20  ;;  %vm4172_vm10 = vcmp.lt.s32.totalorder %v1117_v7, 16  ;;  %v1509_v61 = vrot.slane %v1493_v56, 2  ;;  %v2023_v47 = vmax.f32 %v4128_v49, %v4154_v57  ;;  %vm4678_vm12 = vmmov %vm4660_vm4 }
 0x135   : > { %v2024_v30 = vmax.f32 %v4152_v23, %v4156_v9  ;;  %1326 = vst [vmem:[#allocation2 + $0x93] sm:$0xff] %v1290_v14  ;;  %v398_v10 = vadd.f32 %v2439_v42, %v3610_v46  ;;  %v4675_v13 = vmov 0.0|0.0   ;;  %v1499_v22 = vsel %vm4676_vm1, %v1497_v1, %v1498_v58  ;;  %v2022_v4 = vld [vmem:[#allocation2 + $0x11e] sm:$0x3]  ;;  %vm4686_vm4 = vmmov %vm4676_vm1 }
 0x136   : > { %2555 = vmatprep.subr.bf16.mxu1 %v4675_v13  ;;  %v1501_v8 = vsel %vm4677_vm14, %v1498_v58, %v1500_v35  ;;  %v1508_v7 = vsel %vm4678_vm12, %v1506_v12, %v1507_v27  ;;  %vm4190_vm7 = vcmp.lt.s32.totalorder %v1116_v60, 16  ;;  %v393_v62 = vadd.f32 %v3610_v46, %v392_v21  ;;  %v1594_v54 = vld [vmem:[#allocation2 + $0x8e] sm:$0x3] }
 0x137   : > { %v1504_v32 = vmax.f32 %v4126_v48, %v1499_v22  ;;  %v1505_v50 = vmax.f32 %v1492_v3, %v1501_v8  ;;  %v1510_v38 = vsel %vm4681_vm8, %v1507_v27, %v1509_v61  ;;  %v1293_v36 = vsel %vm4079_vm6, %v398_v10, -3e+38  ;;  %v402_v3 = vpop.f32.mrb[21].mxu0  ;;  %vm4698_vm8 = vmmov %vm4665_vm5 }
 0x138   : > { %vm4682_vm11 = vcmask 130048   ;;  %v1595_v53 = vmax.f32 %v4083_v6, %v1589_v31  ;;  %v1596_v60 = vmax.f32 %v4136_v15, %v1590_v37  ;;  %v1597_v0 = vmax.f32 %v1588_v45, %v1591_v52  ;;  %1329 = vst [vmem:[#allocation2 + $0xab] sm:$0xff] %v1293_v36  ;;  %v1592_v6 = vld [vmem:[#allocation2 + $0x7e] sm:$0xff]  ;;  %v1593_v15 = vld [vmem:[#allocation2 + $0x86] sm:$0xff]  ;;  %v2445_v27 = vpop.f32.mrb[22].mxu0 }
 0x139   : > { %2469 = vmatmul.mubr.msk.f32.vlgmr.msra.gmra.mrb[10].mxu1 %vm4682_vm11, %v3701_v26  ;;  %v1292_v48 = vsel %vm4099_vm0, %v393_v62, -3e+38  ;;  %v1513_v44 = vmax.f32 %v1504_v32, %v1508_v7  ;;  %v1514_v5 = vmax.f32 %v1505_v50, %v1510_v38  ;;  %vm4209_vm3 = vcmp.lt.s32.totalorder %v1119_v40, 16  ;;  %v412_v31 = vpop.f32.mrb[23].mxu0  ;;  %vm4687_vm0 = vmmov %vm4676_vm1 }
 0x13a   : > { %vm4685_vm6 = vmmov 0   ;;  %v2025_v51 = vmax.f32 %v4163_v11, %v2019_v28  ;;  %1328 = vst [vmem:[#allocation2 + $0xa3] sm:$0xff] %v1292_v48  ;;  %v408_v33 = vadd.f32 %v2442_v34, %v3610_v46  ;;  %v1598_v2 = vmax.f32 %v1595_v53, %v1592_v6  ;;  %vm4688_vm2 = vmmov %vm4682_vm11  ;;  %v2448_v38 = vpop.f32.mrb[24].mxu0  ;;  %v2125_v48 = vld [vmem:[#allocation2 + $0x128] sm:$0xff] }
 0x13b   : > { %2475 = vmatprep.mubr.msk.f32.mxu1 %vm4685_vm6, %v4539_v24  ;;  %v1599_v56 = vmax.f32 %v1596_v60, %v1593_v15  ;;  %v1600_v57 = vmax.f32 %v1597_v0, %v1594_v54  ;;  %v403_v9 = vadd.f32 %v3610_v46, %v402_v3  ;;  %v2556_v40 = vpack.c.bf16 %v1514_v5, %v1513_v44  ;;  %v1698_v28 = vld [vmem:[#allocation2 + $0xa0] sm:$0x3]  ;;  %v422_v60 = vpop.f32.mrb[25].mxu0  ;;  %v1695_v5 = vld [vmem:[#allocation2 + $0x8e] sm:$0x3]  ;;  %vm4692_vm9 = vmmov %vm4687_vm0 }
 0x13c   : > { %v4219_v20 = vmax.f32 %v2023_v47, %v4203_v41  ;;  %v4222_v24 = vmax.f32 %v2024_v30, %v4205_v16  ;;  %v1295_v1 = vsel %vm4132_vm15, %v408_v33, -3e+38  ;;  %v1604_v12 = vrot.slane %v1598_v2, 1  ;;  %v1696_v47 = vld [vmem:[#allocation2 + $0x90] sm:$0xff]  ;;  %v1697_v30 = vld [vmem:[#allocation2 + $0x98] sm:$0xff]  ;;  %vm4689_vm15 = vmmov %vm4665_vm5 }
 0x13d   : > { %v1605_v25 = vrot.slane %v1599_v56, 1  ;;  %v1607_v58 = vrot.slane %v1600_v57, 1  ;;  %1331 = vst [vmem:[#allocation2 + $0xbb] sm:$0xff] %v1295_v1  ;;  %v1294_v35 = vsel %vm4143_vm13, %v403_v9, -3e+38  ;;  %2557 = vmatpush3.bf16.msra.mxu1 %v2556_v40  ;;  %v1613_v11 = vrot.slane %v1598_v2, 2  ;;  %vm4694_vm1 = vmmov %vm4687_vm0 }
 0x13e   : > { %v1614_v14 = vrot.slane %v1599_v56, 2  ;;  %v1616_v42 = vrot.slane %v1600_v57, 2  ;;  %1330 = vst [vmem:[#allocation2 + $0xb3] sm:$0xff] %v1294_v35  ;;  %v418_v61 = vadd.f32 %v2445_v27, %v3610_v46  ;;  %2558 = vmatprep.subr.bf16.mxu1 %v4675_v13  ;;  %v4232_v10 = vmax.f32 %v2025_v51, %v2022_v4  ;;  %v4253_v54 = vld [vmem:[%s3178_s27] sm:$0xff]  ;;  %v2123_v51 = vld [vmem:[#allocation2 + $0x11e] sm:$0x3]  ;;  %vm4695_vm14 = vmmov %vm4688_vm2 }
 0x13f   : > { %v1606_v29 = vsel %vm4686_vm4, %v1604_v12, %v1605_v25  ;;  %v1608_v37 = vsel %vm4687_vm0, %v1605_v25, %v1607_v58  ;;  %v413_v63 = vadd.f32 %v3610_v46, %v412_v31  ;;  %v1702_v62 = vmax.f32 %v1592_v6, %v1696_v47  ;;  %v2126_v57 = vld [vmem:[#allocation2 + $0x130] sm:$0x3]  ;;  %v2127_v35 = vld [vmem:[#allocation2 + $0x132] sm:$0xff]  ;;  %v2128_v27 = vld [vmem:[#allocation2 + $0x13a] sm:$0xff] }
 0x140   : > { %v1611_v21 = vmax.f32 %v1598_v2, %v1606_v29  ;;  %v1612_v22 = vmax.f32 %v1599_v56, %v1608_v37  ;;  %v1615_v8 = vsel %vm4665_vm5, %v1613_v11, %v1614_v14  ;;  %v1297_v7 = vsel %vm4172_vm10, %v418_v61, -3e+38  ;;  %2476 = vmatmul.mubr.msk.f32.vlgmr.msra.gmra.mrb[12].mxu1 %vm4688_vm2, %v3701_v26  ;;  %vm4693_vm10 = vmmov %vm4687_vm0  ;;  %v2129_v29 = vld [vmem:[#allocation2 + $0x142] sm:$0x3] }
 0x141   : > { %v1617_v52 = vsel %vm4689_vm15, %v1614_v14, %v1616_v42  ;;  %v1703_v32 = vmax.f32 %v1593_v15, %v1697_v30  ;;  %1333 = vst [vmem:[#allocation2 + $0xcb] sm:$0xff] %v1297_v7  ;;  %v1296_v50 = vsel %vm4190_vm7, %v413_v63, -3e+38  ;;  %vm4248_vm13 = vcmp.lt.s32.totalorder %v1118_v59, 16  ;;  %2482 = vmatprep.mubr.msk.f32.mxu1 %vm4685_vm6, %v4253_v54  ;;  %v1699_v53 = vld [vmem:[#allocation2 + $0xa2] sm:$0xff]  ;;  %v4257_v17 = vld [vmem:[#allocation2 + $0xaa] sm:$0xff]  ;;  %vm4696_vm12 = vmmov %vm4687_vm0 }
 0x142   : > { %v1620_v45 = vmax.f32 %v1611_v21, %v1615_v8  ;;  %v1621_v36 = vmax.f32 %v1612_v22, %v1617_v52  ;;  %1332 = vst [vmem:[#allocation2 + $0xc3] sm:$0xff] %v1296_v50  ;;  %v428_v19 = vadd.f32 %v2448_v38, %v3610_v46  ;;  %v4260_v0 = vmax.f32 %v1702_v62, %v1699_v53  ;;  %v2124_v59 = vld [vmem:[#allocation2 + $0x120] sm:$0xff]  ;;  %vm4697_vm7 = vmmov %vm4665_vm5 }
 0x143   : > { %v4263_v43 = vmax.f32 %v1703_v32, %v4257_v17  ;;  %v2032_v18 = vrot.slane %v4219_v20, 1  ;;  %v423_v34 = vadd.f32 %v3610_v46, %v422_v60  ;;  %v2033_v6 = vrot.slane %v4222_v24, 1  ;;  %vm4699_vm11 = vmmov %vm4665_vm5 }
 0x144   : > { %v2559_v44 = vpack.c.bf16 %v1621_v36, %v1620_v45  ;;  %v2035_v15 = vrot.slane %v4232_v10, 1  ;;  %v1299_v33 = vsel %vm4209_vm3, %v428_v19, -3e+38  ;;  %v1704_v3 = vmax.f32 %v1695_v5, %v1698_v28  ;;  %vm4700_vm3 = vmmov %vm4687_vm0 }
 0x145   : > { %v1711_v2 = vrot.slane %v4260_v0, 1  ;;  %v1712_v56 = vrot.slane %v4263_v43, 1  ;;  %1335 = vst [vmem:[#allocation2 + $0xdb] sm:$0xff] %v1299_v33  ;;  %v1298_v46 = vsel %vm4248_vm13, %v423_v34, -3e+38  ;;  %v2130_v40 = vmax.f32 %v4203_v41, %v2124_v59  ;;  %v1803_v58 = vld [vmem:[#allocation2 + $0xb4] sm:$0xff]  ;;  %vm4701_vm4 = vmmov %vm4687_vm0 }
 0x146   : > { %2560 = vmatpush3.bf16.msra.mxu1 %v2559_v44  ;;  %v1701_v9 = vld [vmem:[#allocation2 + $0xb2] sm:$0x3]  ;;  %v2131_v4 = vmax.f32 %v4205_v16, %v2125_v48  ;;  %1334 = vst [vmem:[#allocation2 + $0xd3] sm:$0xff] %v1298_v46  ;;  %v1720_v12 = vrot.slane %v4260_v0, 2  ;;  %v1721_v25 = vrot.slane %v4263_v43, 2  ;;  %v4282_v11 = vsel %vm4693_vm10, %v2032_v18, %v2033_v6  ;;  %vm4702_vm0 = vmmov %vm4665_vm5 }
 0x147   : > { %2561 = vmatprep.subr.bf16.mxu1 %v4675_v13  ;;  %v1707_v55 = vmax.f32 %v1704_v3, %v1701_v9  ;;  %v1713_v1 = vsel %vm4692_vm9, %v1711_v2, %v1712_v56  ;;  %v4285_v41 = vsel %vm4694_vm1, %v2033_v6, %v2035_v15  ;;  %v2132_v16 = vmax.f32 %v2123_v51, %v2126_v57  ;;  %v1802_v50 = vld [vmem:[#allocation2 + $0xb2] sm:$0x3]  ;;  %v1912_v51 = vld [vmem:[#allocation2 + $0xe8] sm:$0x3]  ;;  %vm4703_vm5 = vmmov %vm4702_vm0 }
 0x148   : > { %v2041_v61 = vrot.slane %v4219_v20, 2  ;;  %v2042_v31 = vrot.slane %v4222_v24, 2  ;;  %v1718_v37 = vmax.f32 %v4260_v0, %v1713_v1  ;;  %v1809_v21 = vmax.f32 %v1699_v53, %v1803_v58  ;;  %vm4704_vm15 = vmmov %vm4694_vm1 }
 0x149   : > { %2483 = vmatmul.mubr.msk.f32.vlgmr.msra.gmra.mrb[14].mxu1 %vm4695_vm14, %v3701_v26  ;;  %v1714_v14 = vrot.slane %v1707_v55, 1  ;;  %v1723_v42 = vrot.slane %v1707_v55, 2  ;;  %v1804_v47 = vld [vmem:[#allocation2 + $0xbc] sm:$0xff]  ;;  %v1805_v30 = vld [vmem:[#allocation2 + $0xc4] sm:$0x3]  ;;  %v1806_v63 = vld [vmem:[#allocation2 + $0xc6] sm:$0xff]  ;;  %v4294_v22 = vmax.f32 %v2130_v40, %v2127_v35  ;;  %v4296_v8 = vmax.f32 %v2131_v4, %v2128_v27 }
 0x14a   : > { %2489 = vmatprep.mubr.msk.f32.mxu1 %vm4685_vm6, %v4253_v54  ;;  %v1722_v52 = vsel %vm4697_vm7, %v1720_v12, %v1721_v25  ;;  %v2039_v28 = vmax.f32 %v4219_v20, %v4282_v11  ;;  %v2040_v62 = vmax.f32 %v4222_v24, %v4285_v41  ;;  %v1812_v38 = vmax.f32 %v1809_v21, %v1806_v63  ;;  %v1915_v55 = vld [vmem:[#allocation2 + $0xfa] sm:$0x3]  ;;  %vm4705_vm13 = vmmov %vm4702_vm0 }
 0x14b   : > { %v1715_v7 = vsel %vm4696_vm12, %v1712_v56, %v1714_v14  ;;  %v2044_v39 = vrot.slane %v4232_v10, 2  ;;  %v4306_v45 = vmax.f32 %v2132_v16, %v2129_v29  ;;  %v1724_v36 = vsel %vm4698_vm8, %v1721_v25, %v1723_v42  ;;  %vm4706_vm9 = vmmov %vm4694_vm1 }
 0x14c   : > { %v1719_v32 = vmax.f32 %v4263_v43, %v1715_v7  ;;  %v1810_v53 = vmax.f32 %v4257_v17, %v1804_v47  ;;  %v1811_v19 = vmax.f32 %v1802_v50, %v1805_v30  ;;  %v1911_v60 = vld [vmem:[#allocation2 + $0xe0] sm:$0xff]  ;;  %v2043_v0 = vsel %vm4699_vm11, %v2041_v61, %v2042_v31  ;;  %vm4707_vm10 = vmmov %vm4694_vm1 }
 0x14d   : > { %v1727_v18 = vmax.f32 %v1718_v37, %v1722_v52  ;;  %v1807_v48 = vld [vmem:[#allocation2 + $0xce] sm:$0xff]  ;;  %v1808_v43 = vld [vmem:[#allocation2 + $0xd6] sm:$0x3]  ;;  %v1910_v34 = vld [vmem:[#allocation2 + $0xd8] sm:$0xff]  ;;  %v2139_v44 = vrot.slane %v4294_v22, 1  ;;  %v2140_v10 = vrot.slane %v4296_v8, 1  ;;  %v2045_v52 = vsel %vm4705_vm13, %v2042_v31, %v2044_v39 }
 0x14e   : > { %v1728_v59 = vmax.f32 %v1719_v32, %v1724_v36  ;;  %v1813_v5 = vmax.f32 %v1810_v53, %v1807_v48  ;;  %v1814_v6 = vmax.f32 %v1811_v19, %v1808_v43  ;;  %v1909_v15 = vld [vmem:[#allocation2 + $0xd6] sm:$0x3]  ;;  %v1916_v17 = vmax.f32 %v1806_v63, %v1910_v34  ;;  %vm4708_vm1 = vmmov %vm4702_vm0 }
 0x14f   : > { %v1917_v33 = vmax.f32 %v1807_v48, %v1911_v60  ;;  %v1818_v2 = vrot.slane %v1812_v38, 1  ;;  %v1827_v56 = vrot.slane %v1812_v38, 2  ;;  %v1918_v57 = vmax.f32 %v1909_v15, %v1912_v51  ;;  %vm4709_vm14 = vmmov %vm4702_vm0 }
 0x150   : > { %v2562_v3 = vpack.c.bf16 %v1728_v59, %v1727_v18  ;;  %v1819_v46 = vrot.slane %v1813_v5, 1  ;;  %v1821_v9 = vrot.slane %v1814_v6, 1  ;;  %v1828_v40 = vrot.slane %v1813_v5, 2  ;;  %vm4710_vm12 = vmmov %vm4700_vm3 }
 0x151   : > { %v1830_v4 = vrot.slane %v1814_v6, 2  ;;  %v1919_v1 = vmax.f32 %v1916_v17, %v4128_v49  ;;  %v1920_v12 = vmax.f32 %v1917_v33, %v4152_v23  ;;  %v1921_v25 = vmax.f32 %v1918_v57, %v1915_v55  ;;  %vm4711_vm7 = vmmov %vm4688_vm2 }
 0x152   : > { %2563 = vmatpush3.bf16.msra.mxu1 %v2562_v3  ;;  %v2142_v58 = vrot.slane %v4306_v45, 1  ;;  %v1820_v35 = vsel %vm4700_vm3, %v1818_v2, %v1819_v46  ;;  %v1822_v27 = vsel %vm4701_vm4, %v1819_v46, %v1821_v9  ;;  %v1829_v16 = vsel %vm4702_vm0, %v1827_v56, %v1828_v40  ;;  %vm4712_vm8 = vmmov %vm4702_vm0 }
 0x153   : > { %2564 = vmatprep.subr.bf16.mxu1 %v4675_v13  ;;  %v1831_v14 = vsel %vm4703_vm5, %v1828_v40, %v1830_v4  ;;  %v1825_v42 = vmax.f32 %v1812_v38, %v1820_v35  ;;  %v1826_v61 = vmax.f32 %v1813_v5, %v1822_v27  ;;  %v1925_v29 = vrot.slane %v1919_v1, 1  ;;  %vm4713_vm11 = vmmov %vm4702_vm0 }
 0x154   : > { %v1926_v37 = vrot.slane %v1920_v12, 1  ;;  %v1928_v49 = vrot.slane %v1921_v25, 1  ;;  %v1934_v23 = vrot.slane %v1919_v1, 2  ;;  %v1935_v47 = vrot.slane %v1920_v12, 2  ;;  %vm4714_vm3 = vmmov %vm4688_vm2 }
 0x155   : > { %2490 = vmatmul.mubr.msk.f32.vlgmr.msra.gmra.mrb[16].mxu1 %vm4688_vm2, %v3701_v26  ;;  %v1937_v30 = vrot.slane %v1921_v25, 2  ;;  %v1834_v63 = vmax.f32 %v1825_v42, %v1829_v16  ;;  %v1835_v21 = vmax.f32 %v1826_v61, %v1831_v14  ;;  %v2141_v38 = vsel %vm4707_vm10, %v2139_v44, %v2140_v10  ;;  %vm4715_vm4 = vmmov %vm4688_vm2 }
 0x156   : > { %2496 = vmatprep.mubr.msk.f32.mxu1 %vm4685_vm6, %v4253_v54  ;;  %v1927_v7 = vsel %vm4704_vm15, %v1925_v29, %v1926_v37  ;;  %v1929_v32 = vsel %vm4706_vm9, %v1926_v37, %v1928_v49  ;;  %v2148_v36 = vrot.slane %v4294_v22, 2  ;;  %v1936_v60 = vsel %vm4708_vm1, %v1934_v23, %v1935_v47  ;;  %vm4716_vm0 = vmmov %vm4688_vm2 }
 0x157   : > { %v1932_v50 = vmax.f32 %v1919_v1, %v1927_v7  ;;  %v2565_v53 = vpack.c.bf16 %v1835_v21, %v1834_v63  ;;  %v1933_v19 = vmax.f32 %v1920_v12, %v1929_v32  ;;  %v2149_v18 = vrot.slane %v4296_v8, 2 }
 0x158   : > { %v1938_v59 = vsel %vm4709_vm14, %v1935_v47, %v1937_v30  ;;  %v2143_v43 = vsel %vm4710_vm12, %v2140_v10, %v2142_v58  ;;  %v2151_v31 = vrot.slane %v4306_v45, 2  ;;  %v2048_v34 = vmax.f32 %v2039_v28, %v2043_v0 }
 0x159   : > { %v1941_v48 = vmax.f32 %v1932_v50, %v1936_v60  ;;  %2566 = vmatpush3.bf16.msra.mxu1 %v2565_v53  ;;  %v1942_v39 = vmax.f32 %v1933_v19, %v1938_v59  ;;  %v2049_v5 = vmax.f32 %v2040_v62, %v2045_v52  ;;  %v2146_v6 = vmax.f32 %v4294_v22, %v2141_v38 }
 0x15a   : > { %2567 = vmatprep.subr.bf16.mxu1 %v4675_v13  ;;  %v2147_v15 = vmax.f32 %v4296_v8, %v2143_v43  ;;  %v2150_v45 = vsel %vm4712_vm8, %v2148_v36, %v2149_v18  ;;  %v2152_v10 = vsel %vm4713_vm11, %v2149_v18, %v2151_v31 }
 0x15b   : > { %v2568_v44 = vpack.c.bf16 %v1942_v39, %v1941_v48  ;;  %v2571_v20 = vpack.c.bf16 %v2049_v5, %v2048_v34  ;;  %v2155_v24 = vmax.f32 %v2146_v6, %v2150_v45 }
 0x15c   : > { %2497 = vmatmul.mubr.msk.f32.vlgmr.msra.gmra.mrb[18].mxu1 %vm4711_vm7, %v3701_v26  ;;  %v2156_v11 = vmax.f32 %v2147_v15, %v2152_v10 }
 0x15d   : > { %2569 = vmatpush3.bf16.msra.mxu1 %v2568_v44  ;;  %2503 = vmatprep.mubr.msk.f32.mxu1 %vm4685_vm6, %v4253_v54 }
 0x15e   : > { %2570 = vmatprep.subr.bf16.mxu1 %v4675_v13  ;;  %v2574_v41 = vpack.c.bf16 %v2156_v11, %v2155_v24 }
 0x160   : > { %2504 = vmatmul.mubr.msk.f32.vlgmr.msra.gmra.mrb[20].mxu1 %vm4714_vm3, %v3701_v26 }
 0x161   : > { %2572 = vmatpush3.bf16.msra.mxu1 %v2571_v20  ;;  %2510 = vmatprep.mubr.msk.f32.mxu1 %vm4685_vm6, %v4253_v54 }
 0x162   : > { %2573 = vmatprep.subr.bf16.mxu1 %v4675_v13 }
 0x164   : > { %2511 = vmatmul.mubr.msk.f32.vlgmr.msra.gmra.mrb[22].mxu1 %vm4715_vm4, %v3701_v26 }
 0x165   : > { %2575 = vmatpush3.bf16.msra.mxu1 %v2574_v41  ;;  %2517 = vmatprep.mubr.msk.f32.mxu1 %vm4685_vm6, %v4253_v54 }
 0x168   : > { %2518 = vmatmul.mubr.msk.f32.vlgmr.msra.gmra.mrb[24].mxu1 %vm4716_vm0, %v3701_v26 }
 0x20c   : > { %v1474_v22 = vpop.f32.mrb[10].mxu1 }
 0x20d   : > { %1478 = vst [vmem:[%s3178_s27 + $0xb] sm:$0xff] %v1474_v22  ;;  %v2470_v8 = vpop.f32.mrb[11].mxu1 }
 0x213   : > { %v1581_v28 = vpop.f32.mrb[12].mxu1 }
 0x214   : > { %1585 = vst [vmem:[%s3178_s27 + $0x15] sm:$0xff] %v1581_v28  ;;  %v2477_v13 = vpop.f32.mrb[13].mxu1 }
 0x21c   : > { %v1688_v62 = vpop.f32.mrb[14].mxu1 }
 0x21d   : > { %1692 = vst [vmem:[%s3178_s27 + $0x1f] sm:$0xff] %v1688_v62  ;;  %v2484_v0 = vpop.f32.mrb[15].mxu1 }
 0x228   : > { %v1795_v51 = vpop.f32.mrb[16].mxu1 }
 0x229   : > { %1799 = vst [vmem:[%s3178_s27 + $0x29] sm:$0xff] %v1795_v51  ;;  %v2491_v17 = vpop.f32.mrb[17].mxu1 }
 0x22f   : > { %v1902_v33 = vpop.f32.mrb[18].mxu1 }
 0x230   : > { %1906 = vst [vmem:[%s3178_s27 + $0x33] sm:$0xff] %v1902_v33  ;;  %v2498_v54 = vpop.f32.mrb[19].mxu1 }
 0x233   : > { %v2009_v3 = vpop.f32.mrb[20].mxu1 }
 0x234   : > { %2013 = vst [vmem:[%s3178_s27 + $0x3d] sm:$0xff] %v2009_v3  ;;  %v2505_v26 = vpop.f32.mrb[21].mxu1 }
 0x237   : > { %v2116_v2 = vpop.f32.mrb[22].mxu1 }
 0x238   : > { %2120 = vst [vmem:[%s3178_s27 + $0x47] sm:$0xff] %v2116_v2  ;;  %v2512_v56 = vpop.f32.mrb[23].mxu1 }
 0x23b   : > { %v2223_v57 = vpop.f32.mrb[24].mxu1 }
 0x23c   : > { %2227 = vst [vmem:[%s3178_s27 + $0x51] sm:$0xff] %v2223_v57  ;;  %v2519_v46 = vpop.f32.mrb[25].mxu1 }
 0x23d PF: > { %s13_s12 = sadd.s32 1, %s2685_s12  }
 0x23e   : > { %p10_p4 = scmp.ge.s32.totalorder %s13_s12, 4  }
 0x240   :  { %12 = sbr.rel (!%p10_p4) target bundleno = 1 (0x1), region = 62 }

// kernel: impala_residual_stage.4
= control target key start
LH: loop header
LB: loop body
LE: loop exit
PB: predicated region body
PF: predicated region fallthrough
CT: control target
= control target key end

     0   :  { %s3300_s18 = smov 0   ;;  %s4899_s0 = inlined_call_operand.vmem [shape: f32[2,102,128], index: 0, kind: input, shape index: {}, may-alias: {0,5}]   ;;  %s4900_s1 = inlined_call_operand.vmem [shape: f32[1152,128], index: 1, kind: input, shape index: {}]   ;;  %s4901_s2 = inlined_call_operand.vmem [shape: f32[1,128], index: 2, kind: input, shape index: {}]   ;;  %s4902_s3 = inlined_call_operand.vmem [shape: f32[1152,128], index: 3, kind: input, shape index: {}]   ;;  %s4903_s4 = inlined_call_operand.vmem [shape: f32[1,128], index: 4, kind: input, shape index: {}]   ;;  %s4904_s5 = inlined_call_operand.vmem [shape: f32[2,102,128], index: 5, kind: output, shape index: {}, may-alias: {0,5}]  }
   0x1 LB: > { %s2247_s19 = sadd.s32 4294967295, %s3267_s18   ;;  %p2251_p0 = scmp.ge.s32.totalorder %s3267_s18, 1  ;;  %s3267_s18 = sphi %s3300_s18, %s15_s18  }
   0x2   : > { %p187_p1 = scmp.lt.s32.totalorder %s3267_s18, 3 }
   0x4   : > { %p188_p2 = pnand %p2251_p0, %p187_p1 }
   0x5   : > { %v241_v0 = vld [vmem:[%s4900_s1 + $0x80] sm:$0xff] (!%p188_p2)  ;;  %v242_v1 = vld [vmem:[%s4900_s1 + $0x88] sm:$0xff] (!%p188_p2)  ;;  %p3317_p3 = scmp.lt.s32.totalorder (!%p188_p2), %s2247_s19, 1  ;;  %v3269_v7 = vmov (!%p188_p2), 0.0   ;;  %v243_v12 = vld [vmem:[%s4900_s1 + $0x90] sm:$0xff] (!%p188_p2) }
   0x6   : > { %191 = sbr.rel (%p188_p2) target bundleno = 659 (0x293), region = 40  ;;  %v225_v2 = vld [vmem:[%s4900_s1] sm:$0xff] (!%p188_p2)  ;;  %v2900_v3 = vpack.c.bf16 (!%p188_p2), %v242_v1, %v241_v0  ;;  %v226_v4 = vld [vmem:[%s4900_s1 + $0x8] sm:$0xff] (!%p188_p2)  ;;  %515 = vst [vmem:[#allocation2] sm:$0xff] (!%p188_p2), %v3269_v7  ;;  %516 = vst [vmem:[#allocation2 + $0x8] sm:$0x7] (!%p188_p2), %v3269_v7 }
   0x7   : > { %v273_v5 = vld [vmem:[%s4900_s1 + $0x180] sm:$0xff] (!%p188_p2)  ;;  %v274_v6 = vld [vmem:[%s4900_s1 + $0x188] sm:$0xff] (!%p188_p2)  ;;  %517 = vst [vmem:[#allocation2 + $0x5b] sm:$0xff] (!%p188_p2), %v3269_v7  ;;  %518 = vst [vmem:[#allocation2 + $0x63] sm:$0x7] (!%p188_p2), %v3269_v7  ;;  %v2902_v8 = vpack.c.bf16 (!%p188_p2), %v226_v4, %v225_v2 }
   0x8   : > { %v2932_v9 = vpack.c.bf16 (!%p188_p2), %v274_v6, %v273_v5  ;;  %v257_v10 = vld [vmem:[%s4900_s1 + $0x100] sm:$0xff] (!%p188_p2)  ;;  %v258_v11 = vld [vmem:[%s4900_s1 + $0x108] sm:$0xff] (!%p188_p2)  ;;  %2901 = vmatprep.subr.bf16.mxu0 (!%p188_p2), %v2900_v3  ;;  %v244_v14 = vld [vmem:[%s4900_s1 + $0x98] sm:$0xff] (!%p188_p2) }
   0x9   : > { %v2934_v13 = vpack.c.bf16 (!%p188_p2), %v258_v11, %v257_v10  ;;  %v227_v15 = vld [vmem:[%s4900_s1 + $0x10] sm:$0xff] (!%p188_p2)  ;;  %v228_v16 = vld [vmem:[%s4900_s1 + $0x18] sm:$0xff] (!%p188_p2)  ;;  %2903 = vmatpush3.bf16.msra.mxu0 (!%p188_p2), %v2902_v8  ;;  %v2904_v17 = vpack.c.bf16 (!%p188_p2), %v244_v14, %v243_v12  ;;  %v245_v24 = vld [vmem:[%s4900_s1 + $0xa0] sm:$0xff] (!%p188_p2) }
   0xa   : > { %2933 = vmatprep.subr.bf16.mxu1 (!%p188_p2), %v2932_v9  ;;  %v2906_v18 = vpack.c.bf16 (!%p188_p2), %v228_v16, %v227_v15  ;;  %v275_v19 = vld [vmem:[%s4900_s1 + $0x190] sm:$0xff] (!%p188_p2)  ;;  %v276_v20 = vld [vmem:[%s4900_s1 + $0x198] sm:$0xff] (!%p188_p2)  ;;  %v246_v25 = vld [vmem:[%s4900_s1 + $0xa8] sm:$0xff] (!%p188_p2) }
   0xb   : > { %v259_v21 = vld [vmem:[%s4900_s1 + $0x110] sm:$0xff] (!%p188_p2)  ;;  %2935 = vmatpush3.bf16.msra.mxu1 (!%p188_p2), %v2934_v13  ;;  %v2936_v22 = vpack.c.bf16 (!%p188_p2), %v276_v20, %v275_v19  ;;  %v260_v23 = vld [vmem:[%s4900_s1 + $0x118] sm:$0xff] (!%p188_p2)  ;;  %2905 = vmatprep.subr.bf16.mxu0 (!%p188_p2), %v2904_v17  ;;  %v2908_v27 = vpack.c.bf16 (!%p188_p2), %v246_v25, %v245_v24  ;;  %v229_v28 = vld [vmem:[%s4900_s1 + $0x20] sm:$0xff] (!%p188_p2) }
   0xc   : > { %v2938_v26 = vpack.c.bf16 (!%p188_p2), %v260_v23, %v259_v21  ;;  %v230_v29 = vld [vmem:[%s4900_s1 + $0x28] sm:$0xff] (!%p188_p2)  ;;  %v277_v30 = vld [vmem:[%s4900_s1 + $0x1a0] sm:$0xff] (!%p188_p2)  ;;  %v247_v36 = vld [vmem:[%s4900_s1 + $0xb0] sm:$0xff] (!%p188_p2) }
   0xd   : > { %s4949_s19 = smov (!%p3317_p3, %s2247_s19), 1  ;;  %2937 = vmatprep.subr.bf16.mxu1 %v2936_v22  ;;  %v278_v31 = vld [vmem:[%s4900_s1 + $0x1a8] sm:$0xff]  ;;  %v261_v32 = vld [vmem:[%s4900_s1 + $0x120] sm:$0xff]  ;;  %2907 = vmatpush3.bf16.msra.mxu0 %v2906_v18  ;;  %v2910_v34 = vpack.c.bf16 %v230_v29, %v229_v28  ;;  %v248_v37 = vld [vmem:[%s4900_s1 + $0xb8] sm:$0xff] }
   0xe   : > { %s3220_s28 = smul.u32 104, %s4949_s19  ;;  %v262_v33 = vld [vmem:[%s4900_s1 + $0x128] sm:$0xff]  ;;  %v2940_v35 = vpack.c.bf16 %v278_v31, %v277_v30  ;;  %v231_v38 = vld [vmem:[%s4900_s1 + $0x30] sm:$0xff]  ;;  %2909 = vmatprep.subr.bf16.mxu0 %v2908_v27  ;;  %v2912_v40 = vpack.c.bf16 %v248_v37, %v247_v36  ;;  %v232_v41 = vld [vmem:[%s4900_s1 + $0x38] sm:$0xff] }
   0xf   : > { %2939 = vmatpush3.bf16.msra.mxu1 %v2938_v26  ;;  %v2942_v39 = vpack.c.bf16 %v262_v33, %v261_v32  ;;  %v279_v42 = vld [vmem:[%s4900_s1 + $0x1b0] sm:$0xff]  ;;  %v280_v43 = vld [vmem:[%s4900_s1 + $0x1b8] sm:$0xff]  ;;  %v249_v47 = vld [vmem:[%s4900_s1 + $0xc0] sm:$0xff]  ;;  %v2914_v49 = vpack.c.bf16 %v232_v41, %v231_v38 }
  0x10   : > { %s3385_s20 = scalar_lea.vmem %s4904_s5, %s3220_s28  ;;  %2941 = vmatprep.subr.bf16.mxu1 %v2940_v35  ;;  %v2944_v44 = vpack.c.bf16 %v280_v43, %v279_v42  ;;  %v263_v45 = vld [vmem:[%s4900_s1 + $0x130] sm:$0xff]  ;;  %v264_v46 = vld [vmem:[%s4900_s1 + $0x138] sm:$0xff]  ;;  %v250_v48 = vld [vmem:[%s4900_s1 + $0xc8] sm:$0xff]  ;;  %s3474_s9 = scalar_lea.vmem %s4899_s0, %s3220_s28 }
  0x11   : > { %519 = vst [vmem:[%s3385_s20] sm:$0xff] %v3269_v7  ;;  %520 = vst [vmem:[%s3385_s20 + $0x8] sm:$0x7] %v3269_v7  ;;  %2911 = vmatpush3.bf16.msra.mxu0 %v2910_v34  ;;  %v281_v50 = vld [vmem:[%s4900_s1 + $0x1c0] sm:$0xff]  ;;  %v282_v51 = vld [vmem:[%s4900_s1 + $0x1c8] sm:$0xff]  ;;  %v2946_v52 = vpack.c.bf16 %v264_v46, %v263_v45  ;;  %v2916_v53 = vpack.c.bf16 %v250_v48, %v249_v47 }
  0x12   : > { %521 = vst [vmem:[%s3385_s20 + $0x5b] sm:$0xff] %v3269_v7  ;;  %522 = vst [vmem:[%s3385_s20 + $0x63] sm:$0x7] %v3269_v7  ;;  %2913 = vmatprep.subr.bf16.mxu0 %v2912_v40  ;;  %v233_v54 = vld [vmem:[%s4900_s1 + $0x40] sm:$0xff]  ;;  %v234_v55 = vld [vmem:[%s4900_s1 + $0x48] sm:$0xff]  ;;  %v2948_v57 = vpack.c.bf16 %v282_v51, %v281_v50 }
  0x13   : > { %2943 = vmatpush3.bf16.msra.mxu1 %v2942_v39  ;;  %v265_v56 = vld [vmem:[%s4900_s1 + $0x140] sm:$0xff]  ;;  %v266_v58 = vld [vmem:[%s4900_s1 + $0x148] sm:$0xff]  ;;  %v251_v59 = vld [vmem:[%s4900_s1 + $0xd0] sm:$0xff]  ;;  %v2918_v63 = vpack.c.bf16 %v234_v55, %v233_v54 }
  0x14   : > { %2945 = vmatprep.subr.bf16.mxu1 %v2944_v44  ;;  %v252_v60 = vld [vmem:[%s4900_s1 + $0xd8] sm:$0xff]  ;;  %v283_v61 = vld [vmem:[%s4900_s1 + $0x1d0] sm:$0xff]  ;;  %v2950_v0 = vpack.c.bf16 %v266_v58, %v265_v56  ;;  %v253_v7 = vld [vmem:[%s4900_s1 + $0xe0] sm:$0xff] }
  0x15   : > { %v284_v62 = vld [vmem:[%s4900_s1 + $0x1d8] sm:$0xff]  ;;  %2915 = vmatpush3.bf16.msra.mxu0 %v2914_v49  ;;  %v2920_v1 = vpack.c.bf16 %v252_v60, %v251_v59  ;;  %v235_v2 = vld [vmem:[%s4900_s1 + $0x50] sm:$0xff]  ;;  %v254_v8 = vld [vmem:[%s4900_s1 + $0xe8] sm:$0xff] }
  0x16   : > { %2917 = vmatprep.subr.bf16.mxu0 %v2916_v53  ;;  %v236_v3 = vld [vmem:[%s4900_s1 + $0x58] sm:$0xff]  ;;  %v267_v4 = vld [vmem:[%s4900_s1 + $0x150] sm:$0xff]  ;;  %v2952_v5 = vpack.c.bf16 %v284_v62, %v283_v61  ;;  %v285_v9 = vld [vmem:[%s4900_s1 + $0x1e0] sm:$0xff]  ;;  %v2924_v15 = vpack.c.bf16 %v254_v8, %v253_v7 }
  0x17   : > { %2947 = vmatpush3.bf16.msra.mxu1 %v2946_v52  ;;  %v268_v6 = vld [vmem:[%s4900_s1 + $0x158] sm:$0xff]  ;;  %v286_v10 = vld [vmem:[%s4900_s1 + $0x1e8] sm:$0xff]  ;;  %v2922_v11 = vpack.c.bf16 %v236_v3, %v235_v2  ;;  %v237_v12 = vld [vmem:[%s4900_s1 + $0x60] sm:$0xff] }
  0x18   : > { %2949 = vmatprep.subr.bf16.mxu1 %v2948_v57  ;;  %v2954_v14 = vpack.c.bf16 %v268_v6, %v267_v4  ;;  %v238_v16 = vld [vmem:[%s4900_s1 + $0x68] sm:$0xff]  ;;  %v269_v17 = vld [vmem:[%s4900_s1 + $0x160] sm:$0xff]  ;;  %v2956_v20 = vpack.c.bf16 %v286_v10, %v285_v9  ;;  %v255_v21 = vld [vmem:[%s4900_s1 + $0xf0] sm:$0xff] }
  0x19   : > { %2919 = vmatpush3.bf16.msra.mxu0 %v2918_v63  ;;  %v543_v13 = vld [vmem:[%s3474_s9 + $0x1] sm:$0xff]  ;;  %v256_v22 = vld [vmem:[%s4900_s1 + $0xf8] sm:$0xff]  ;;  %v3511_v23 = vld [vmem:[%s3474_s9 + $0xa] sm:$0xff]  ;;  %v2926_v27 = vpack.c.bf16 %v238_v16, %v237_v12 }
  0x1a   : > { %2921 = vmatprep.subr.bf16.mxu0 %v2920_v1  ;;  %v270_v18 = vld [vmem:[%s4900_s1 + $0x168] sm:$0xff]  ;;  %v553_v19 = vmax.f32 %v543_v13, 0.0  ;;  %v287_v24 = vld [vmem:[%s4900_s1 + $0x1f0] sm:$0xff]  ;;  %v288_v25 = vld [vmem:[%s4900_s1 + $0x1f8] sm:$0xff]  ;;  %v574_v26 = vmax.f32 %v3511_v23, 0.0  ;;  %v2928_v29 = vpack.c.bf16 %v256_v22, %v255_v21 }
  0x1b   : > { %2951 = vmatpush3.bf16.msra.mxu1 %v2950_v0  ;;  %v2958_v28 = vpack.c.bf16 %v270_v18, %v269_v17  ;;  %v239_v30 = vld [vmem:[%s4900_s1 + $0x70] sm:$0xff]  ;;  %v240_v31 = vld [vmem:[%s4900_s1 + $0x78] sm:$0xff]  ;;  %v2960_v33 = vpack.c.bf16 %v288_v25, %v287_v24  ;;  %v305_v35 = vld [vmem:[%s4900_s1 + $0x280] sm:$0xff] }
  0x1c   : > { %2953 = vmatprep.subr.bf16.mxu1 %v2952_v5  ;;  %737 = vmatprep.mubr.f32.mxu0 %v553_v19  ;;  %v271_v32 = vld [vmem:[%s4900_s1 + $0x170] sm:$0xff]  ;;  %v272_v34 = vld [vmem:[%s4900_s1 + $0x178] sm:$0xff]  ;;  %v306_v36 = vld [vmem:[%s4900_s1 + $0x288] sm:$0xff]  ;;  %v2930_v37 = vpack.c.bf16 %v240_v31, %v239_v30 }
  0x1d   : > { %2923 = vmatpush3.bf16.msra.mxu0 %v2922_v11  ;;  %852 = vmatprep.mubr.f32.mxu1 %v574_v26  ;;  %v523_v38 = vld [vmem:[%s3474_s9] sm:$0xff]  ;;  %v338_v40 = vld [vmem:[%s4900_s1 + $0x388] sm:$0xff]  ;;  %v2962_v41 = vpack.c.bf16 %v272_v34, %v271_v32  ;;  %v2964_v42 = vpack.c.bf16 %v306_v36, %v305_v35  ;;  %v3556_v47 = vld [vmem:[%s3474_s9 + $0x12] sm:$0xff] }
  0x1e   : > { %2925 = vmatprep.subr.bf16.mxu0 %v2924_v15  ;;  %v337_v39 = vld [vmem:[%s4900_s1 + $0x380] sm:$0xff]  ;;  %v290_v44 = vld [vmem:[%s4900_s1 + $0x208] sm:$0xff]  ;;  %v307_v48 = vld [vmem:[%s4900_s1 + $0x290] sm:$0xff]  ;;  %v533_v50 = vmax.f32 %v523_v38, 0.0  ;;  %v575_v60 = vmax.f32 %v3556_v47, 0.0 }
  0x1f   : > { %2955 = vmatpush3.bf16.msra.mxu1 %v2954_v14  ;;  %v289_v43 = vld [vmem:[%s4900_s1 + $0x200] sm:$0xff]  ;;  %v544_v46 = vld [vmem:[%s3474_s9 + $0x9] sm:$0xff]  ;;  %v2996_v49 = vpack.c.bf16 %v338_v40, %v337_v39  ;;  %v308_v51 = vld [vmem:[%s4900_s1 + $0x298] sm:$0xff] }
  0x20   : > { %2957 = vmatprep.subr.bf16.mxu1 %v2956_v20  ;;  %v563_v45 = vld [vmem:[%s3474_s9 + $0x2] sm:$0xff]  ;;  %v2966_v54 = vpack.c.bf16 %v290_v44, %v289_v43  ;;  %v339_v57 = vld [vmem:[%s4900_s1 + $0x390] sm:$0xff]  ;;  %v340_v58 = vld [vmem:[%s4900_s1 + $0x398] sm:$0xff]  ;;  %v554_v59 = vmax.f32 %v544_v46, 0.0  ;;  %v2968_v63 = vpack.c.bf16 %v308_v51, %v307_v48 }
  0x21   : > { %2927 = vmatpush3.bf16.msra.mxu0 %v2926_v27  ;;  %v321_v52 = vld [vmem:[%s4900_s1 + $0x300] sm:$0xff]  ;;  %v322_v53 = vld [vmem:[%s4900_s1 + $0x308] sm:$0xff]  ;;  %v573_v55 = vmax.f32 %v563_v45, 0.0  ;;  %v291_v61 = vld [vmem:[%s4900_s1 + $0x210] sm:$0xff]  ;;  %v3000_v6 = vpack.c.bf16 %v340_v58, %v339_v57 }
  0x22   : > { %2929 = vmatprep.subr.bf16.mxu0 %v2928_v29  ;;  %v524_v56 = vld [vmem:[%s3474_s9 + $0x8] sm:$0xff]  ;;  %v292_v62 = vld [vmem:[%s4900_s1 + $0x218] sm:$0xff]  ;;  %v309_v2 = vld [vmem:[%s4900_s1 + $0x2a0] sm:$0xff]  ;;  %v2998_v3 = vpack.c.bf16 %v322_v53, %v321_v52 }
  0x23   : > { %2959 = vmatpush3.bf16.msra.mxu1 %v2958_v28  ;;  %v545_v0 = vld [vmem:[%s3474_s9 + $0x11] sm:$0xff]  ;;  %v3586_v1 = vld [vmem:[%s3474_s9 + $0x1a] sm:$0xff]  ;;  %v534_v4 = vmax.f32 %v524_v56, 0.0  ;;  %v310_v5 = vld [vmem:[%s4900_s1 + $0x2a8] sm:$0xff]  ;;  %v2970_v9 = vpack.c.bf16 %v292_v62, %v291_v61 }
  0x24   : > { %2961 = vmatprep.subr.bf16.mxu1 %v2960_v33  ;;  %v323_v7 = vld [vmem:[%s4900_s1 + $0x310] sm:$0xff]  ;;  %v324_v8 = vld [vmem:[%s4900_s1 + $0x318] sm:$0xff]  ;;  %v341_v11 = vld [vmem:[%s4900_s1 + $0x3a0] sm:$0xff]  ;;  %v555_v13 = vmax.f32 %v545_v0, 0.0  ;;  %v576_v14 = vmax.f32 %v3586_v1, 0.0  ;;  %v2972_v17 = vpack.c.bf16 %v310_v5, %v309_v2 }
  0x25   : > { %2931 = vmatpush3.bf16.msra.mxu0 %v2930_v37  ;;  %v525_v10 = vld [vmem:[%s3474_s9 + $0x10] sm:$0xff]  ;;  %v342_v12 = vld [vmem:[%s4900_s1 + $0x3a8] sm:$0xff]  ;;  %v546_v15 = vld [vmem:[%s3474_s9 + $0x19] sm:$0xff]  ;;  %v3002_v21 = vpack.c.bf16 %v324_v8, %v323_v7 }
  0x26   : > { %2965 = vmatprep.subr.bf16.mxu0 %v2964_v42  ;;  %v293_v16 = vld [vmem:[%s4900_s1 + $0x220] sm:$0xff]  ;;  %v294_v18 = vld [vmem:[%s4900_s1 + $0x228] sm:$0xff]  ;;  %v311_v20 = vld [vmem:[%s4900_s1 + $0x2b0] sm:$0xff]  ;;  %v535_v22 = vmax.f32 %v525_v10, 0.0  ;;  %v3004_v25 = vpack.c.bf16 %v342_v12, %v341_v11  ;;  %v556_v29 = vmax.f32 %v546_v15, 0.0 }
  0x27   : > { %2963 = vmatpush3.bf16.msra.mxu1 %v2962_v41  ;;  %v3618_v19 = vld [vmem:[%s3474_s9 + $0x22] sm:$0xff]  ;;  %v312_v24 = vld [vmem:[%s4900_s1 + $0x2b8] sm:$0xff]  ;;  %v343_v31 = vld [vmem:[%s4900_s1 + $0x3b0] sm:$0xff]  ;;  %v2974_v33 = vpack.c.bf16 %v294_v18, %v293_v16 }
  0x28   : > { %2997 = vmatprep.subr.bf16.mxu1 %v2996_v49  ;;  %738 = vmatmul.mubr.f32.vlgmr.msra.gmra.mrb[0].mxu0 %v533_v50  ;;  %v325_v27 = vld [vmem:[%s4900_s1 + $0x320] sm:$0xff]  ;;  %v326_v28 = vld [vmem:[%s4900_s1 + $0x328] sm:$0xff]  ;;  %v526_v30 = vld [vmem:[%s3474_s9 + $0x18] sm:$0xff]  ;;  %v577_v23 = vmax.f32 %v3618_v19, 0.0  ;;  %v2976_v35 = vpack.c.bf16 %v312_v24, %v311_v20 }
  0x29   : > { %2967 = vmatpush3.bf16.msra.mxu0 %v2966_v54  ;;  %742 = vmatprep.mubr.f32.mxu0 %v554_v59  ;;  %v344_v32 = vld [vmem:[%s4900_s1 + $0x3b8] sm:$0xff]  ;;  %v295_v34 = vld [vmem:[%s4900_s1 + $0x230] sm:$0xff]  ;;  %v3006_v38 = vpack.c.bf16 %v326_v28, %v325_v27  ;;  %v313_v39 = vld [vmem:[%s4900_s1 + $0x2c0] sm:$0xff]  ;;  %v536_v40 = vmax.f32 %v526_v30, 0.0 }
  0x2a   : > { %853 = vmatmul.mubr.f32.vlgmr.msra.gmra.mrb[0].mxu1 %v573_v55  ;;  %2969 = vmatprep.subr.bf16.mxu0 %v2968_v63  ;;  %v296_v36 = vld [vmem:[%s4900_s1 + $0x238] sm:$0xff]  ;;  %v3652_v37 = vld [vmem:[%s3474_s9 + $0x2a] sm:$0xff]  ;;  %v3008_v42 = vpack.c.bf16 %v344_v32, %v343_v31  ;;  %v527_v46 = vld [vmem:[%s3474_s9 + $0x20] sm:$0xff] }
  0x2b   : > { %857 = vmatprep.mubr.f32.mxu1 %v575_v60  ;;  %2999 = vmatpush3.bf16.msra.mxu1 %v2998_v3  ;;  %v314_v41 = vld [vmem:[%s4900_s1 + $0x2c8] sm:$0xff]  ;;  %v327_v43 = vld [vmem:[%s4900_s1 + $0x330] sm:$0xff]  ;;  %v328_v44 = vld [vmem:[%s4900_s1 + $0x338] sm:$0xff]  ;;  %v2978_v50 = vpack.c.bf16 %v296_v36, %v295_v34  ;;  %v578_v51 = vmax.f32 %v3652_v37, 0.0  ;;  %v537_v58 = vmax.f32 %v527_v46, 0.0 }
  0x2c   : > { %743 = vmatmul.mubr.f32.gmra.mrb[2].mxu0 %v534_v4  ;;  %3001 = vmatprep.subr.bf16.mxu1 %v3000_v6  ;;  %v345_v48 = vld [vmem:[%s4900_s1 + $0x3c0] sm:$0xff]  ;;  %v346_v49 = vld [vmem:[%s4900_s1 + $0x3c8] sm:$0xff]  ;;  %v3680_v52 = vld [vmem:[%s3474_s9 + $0x32] sm:$0xff]  ;;  %v2980_v53 = vpack.c.bf16 %v314_v41, %v313_v39  ;;  %v3010_v56 = vpack.c.bf16 %v328_v44, %v327_v43 }
  0x2d   : > { %2971 = vmatpush3.bf16.msra.mxu0 %v2970_v9  ;;  %747 = vmatprep.mubr.f32.mxu0 %v555_v13  ;;  %v548_v47 = vld [vmem:[%s3474_s9 + $0x29] sm:$0xff]  ;;  %v297_v54 = vld [vmem:[%s4900_s1 + $0x240] sm:$0xff]  ;;  %v316_v59 = vld [vmem:[%s4900_s1 + $0x2d8] sm:$0xff]  ;;  %v579_v4 = vmax.f32 %v3680_v52, 0.0 }
  0x2e   : > { %858 = vmatmul.mubr.f32.gmra.mrb[2].mxu1 %v574_v26  ;;  %v547_v26 = vld [vmem:[%s3474_s9 + $0x21] sm:$0xff]  ;;  %2973 = vmatprep.subr.bf16.mxu0 %v2972_v17  ;;  %v315_v57 = vld [vmem:[%s4900_s1 + $0x2d0] sm:$0xff]  ;;  %v558_v63 = vmax.f32 %v548_v47, 0.0  ;;  %v348_v3 = vld [vmem:[%s4900_s1 + $0x3d8] sm:$0xff] }
  0x2f   : > { %862 = vmatprep.mubr.f32.mxu1 %v576_v14  ;;  %3003 = vmatpush3.bf16.msra.mxu1 %v3002_v21  ;;  %v557_v45 = vmax.f32 %v547_v26, 0.0  ;;  %v298_v55 = vld [vmem:[%s4900_s1 + $0x248] sm:$0xff]  ;;  %v329_v61 = vld [vmem:[%s4900_s1 + $0x340] sm:$0xff]  ;;  %v347_v2 = vld [vmem:[%s4900_s1 + $0x3d0] sm:$0xff]  ;;  %v2984_v7 = vpack.c.bf16 %v316_v59, %v315_v57 }
  0x30   : > { %748 = vmatmul.mubr.f32.gmra.mrb[4].mxu0 %v535_v22  ;;  %3005 = vmatprep.subr.bf16.mxu1 %v3004_v25  ;;  %v330_v62 = vld [vmem:[%s4900_s1 + $0x348] sm:$0xff]  ;;  %v2982_v5 = vpack.c.bf16 %v298_v55, %v297_v54  ;;  %v549_v1 = vld [vmem:[%s3474_s9 + $0x31] sm:$0xff]  ;;  %v3714_v6 = vld [vmem:[%s3474_s9 + $0x3a] sm:$0xff] }
  0x31   : > { %752 = vmatprep.mubr.f32.mxu0 %v556_v29  ;;  %2975 = vmatpush3.bf16.msra.mxu0 %v2974_v33  ;;  %v528_v0 = vld [vmem:[%s3474_s9 + $0x28] sm:$0xff]  ;;  %v299_v8 = vld [vmem:[%s4900_s1 + $0x250] sm:$0xff]  ;;  %v300_v9 = vld [vmem:[%s4900_s1 + $0x258] sm:$0xff]  ;;  %v3014_v10 = vpack.c.bf16 %v330_v62, %v329_v61  ;;  %v559_v17 = vmax.f32 %v549_v1, 0.0  ;;  %v580_v22 = vmax.f32 %v3714_v6, 0.0 }
  0x32   : > { %863 = vmatmul.mubr.f32.gmra.mrb[4].mxu1 %v575_v60  ;;  %2977 = vmatprep.subr.bf16.mxu0 %v2976_v35  ;;  %v3012_v60 = vpack.c.bf16 %v346_v49, %v345_v48  ;;  %v317_v11 = vld [vmem:[%s4900_s1 + $0x2e0] sm:$0xff]  ;;  %v538_v12 = vmax.f32 %v528_v0, 0.0  ;;  %v318_v13 = vld [vmem:[%s4900_s1 + $0x2e8] sm:$0xff]  ;;  %v331_v15 = vld [vmem:[%s4900_s1 + $0x350] sm:$0xff]  ;;  %v2986_v24 = vpack.c.bf16 %v300_v9, %v299_v8 }
  0x33   : > { %867 = vmatprep.mubr.f32.mxu1 %v577_v23  ;;  %3007 = vmatpush3.bf16.msra.mxu1 %v3006_v38  ;;  %v332_v16 = vld [vmem:[%s4900_s1 + $0x358] sm:$0xff]  ;;  %v529_v18 = vld [vmem:[%s3474_s9 + $0x30] sm:$0xff]  ;;  %v349_v20 = vld [vmem:[%s4900_s1 + $0x3e0] sm:$0xff]  ;;  %v2988_v27 = vpack.c.bf16 %v318_v13, %v317_v11 }
  0x34   : > { %753 = vmatmul.mubr.f32.gmra.mrb[6].mxu0 %v536_v40  ;;  %3009 = vmatprep.subr.bf16.mxu1 %v3008_v42  ;;  %v350_v21 = vld [vmem:[%s4900_s1 + $0x3e8] sm:$0xff]  ;;  %v550_v19 = vld [vmem:[%s3474_s9 + $0x39] sm:$0xff]  ;;  %v3018_v30 = vpack.c.bf16 %v332_v16, %v331_v15  ;;  %v319_v31 = vld [vmem:[%s4900_s1 + $0x2f0] sm:$0xff]  ;;  %v539_v32 = vmax.f32 %v529_v18, 0.0 }
  0x35   : > { %757 = vmatprep.mubr.f32.mxu0 %v557_v45  ;;  %2979 = vmatpush3.bf16.msra.mxu0 %v2978_v50  ;;  %v3748_v25 = vld [vmem:[%s3474_s9 + $0x42] sm:$0xff]  ;;  %v3020_v33 = vpack.c.bf16 %v350_v21, %v349_v20  ;;  %v560_v35 = vmax.f32 %v550_v19, 0.0  ;;  %v530_v36 = vld [vmem:[%s3474_s9 + $0x38] sm:$0xff]  ;;  %v351_v38 = vld [vmem:[%s4900_s1 + $0x3f0] sm:$0xff] }
  0x36   : > { %868 = vmatmul.mubr.f32.gmra.mrb[6].mxu1 %v576_v14  ;;  %2981 = vmatprep.subr.bf16.mxu0 %v2980_v53  ;;  %v3016_v14 = vpack.c.bf16 %v348_v3, %v347_v2  ;;  %v301_v28 = vld [vmem:[%s4900_s1 + $0x260] sm:$0xff]  ;;  %v302_v29 = vld [vmem:[%s4900_s1 + $0x268] sm:$0xff]  ;;  %v352_v39 = vld [vmem:[%s4900_s1 + $0x3f8] sm:$0xff]  ;;  %v581_v40 = vmax.f32 %v3748_v25, 0.0  ;;  %v540_v49 = vmax.f32 %v530_v36, 0.0 }
  0x37   : > { %872 = vmatprep.mubr.f32.mxu1 %v578_v51  ;;  %3011 = vmatpush3.bf16.msra.mxu1 %v3010_v56  ;;  %v333_v26 = vld [vmem:[%s4900_s1 + $0x360] sm:$0xff]  ;;  %v334_v34 = vld [vmem:[%s4900_s1 + $0x368] sm:$0xff]  ;;  %v2990_v42 = vpack.c.bf16 %v302_v29, %v301_v28  ;;  %v303_v45 = vld [vmem:[%s4900_s1 + $0x270] sm:$0xff]  ;;  %v3024_v50 = vpack.c.bf16 %v352_v39, %v351_v38 }
  0x38   : > { %758 = vmatmul.mubr.f32.gmra.mrb[8].mxu0 %v537_v58  ;;  %3013 = vmatprep.subr.bf16.mxu1 %v3012_v60  ;;  %v551_v41 = vld [vmem:[%s3474_s9 + $0x41] sm:$0xff]  ;;  %v572_v43 = vld [vmem:[%s3474_s9 + $0x4a] sm:$0xff]  ;;  %v3022_v44 = vpack.c.bf16 %v334_v34, %v333_v26  ;;  %v304_v46 = vld [vmem:[%s4900_s1 + $0x278] sm:$0xff] }
  0x39   : > { %762 = vmatprep.mubr.f32.mxu0 %v558_v63  ;;  %2983 = vmatpush3.bf16.msra.mxu0 %v2982_v5  ;;  %v335_v48 = vld [vmem:[%s4900_s1 + $0x370] sm:$0xff]  ;;  %v353_v47 = vld [vmem:[%s4900_s1 + $0x400] sm:$0xff]  ;;  %v354_v53 = vld [vmem:[%s4900_s1 + $0x408] sm:$0xff]  ;;  %v561_v54 = vmax.f32 %v551_v41, 0.0  ;;  %v582_v56 = vmax.f32 %v572_v43, 0.0  ;;  %v2994_v58 = vpack.c.bf16 %v304_v46, %v303_v45 }
  0x3a   : > { %873 = vmatmul.mubr.f32.gmra.mrb[8].mxu1 %v577_v23  ;;  %2985 = vmatprep.subr.bf16.mxu0 %v2984_v7  ;;  %v320_v23 = vld [vmem:[%s4900_s1 + $0x2f8] sm:$0xff]  ;;  %v531_v55 = vld [vmem:[%s3474_s9 + $0x40] sm:$0xff]  ;;  %v552_v57 = vld [vmem:[%s3474_s9 + $0x49] sm:$0xff]  ;;  %v3028_v61 = vpack.c.bf16 %v354_v53, %v353_v47 }
  0x3b   : > { %877 = vmatprep.mubr.f32.mxu1 %v579_v4  ;;  %3015 = vmatpush3.bf16.msra.mxu1 %v3014_v10  ;;  %v2992_v37 = vpack.c.bf16 %v320_v23, %v319_v31  ;;  %v583_v59 = vld [vmem:[%s3474_s9 + $0x52] sm:$0xff]  ;;  %v541_v62 = vmax.f32 %v531_v55, 0.0  ;;  %v562_v52 = vmax.f32 %v552_v57, 0.0  ;;  %v532_v63 = vld [vmem:[%s3474_s9 + $0x48] sm:$0xff]  ;;  %v628_v8 = vld [vmem:[%s3474_s9 + $0x1d] sm:$0xff] }
  0x3c   : > { %763 = vmatmul.mubr.f32.gmra.mrb[10].mxu0 %v538_v12  ;;  %3017 = vmatprep.subr.bf16.mxu1 %v3016_v14  ;;  %v584_v0 = vmax.f32 %v583_v59, 0.0  ;;  %v605_v2 = vld [vmem:[%s3474_s9 + $0xc] sm:$0xff]  ;;  %v627_v3 = vld [vmem:[%s3474_s9 + $0x15] sm:$0xff]  ;;  %v638_v14 = vmax.f32 %v628_v8, 0.0  ;;  %v357_v20 = vld [vmem:[%s4900_s1 + $0x420] sm:$0xff] }
  0x3d   : > { %767 = vmatprep.mubr.f32.mxu0 %v559_v17  ;;  %2987 = vmatpush3.bf16.msra.mxu0 %v2986_v24  ;;  %v615_v5 = vmax.f32 %v605_v2, 0.0  ;;  %v585_v1 = vld [vmem:[%s3474_s9 + $0xb] sm:$0xff]  ;;  %v637_v6 = vmax.f32 %v627_v3, 0.0  ;;  %v606_v7 = vld [vmem:[%s3474_s9 + $0x14] sm:$0xff]  ;;  %v607_v15 = vld [vmem:[%s3474_s9 + $0x1c] sm:$0xff] }
  0x3e   : > { %878 = vmatmul.mubr.f32.gmra.mrb[10].mxu1 %v578_v51  ;;  %2989 = vmatprep.subr.bf16.mxu0 %v2988_v27  ;;  %v336_v51 = vld [vmem:[%s4900_s1 + $0x378] sm:$0xff]  ;;  %v595_v9 = vmax.f32 %v585_v1, 0.0  ;;  %v355_v10 = vld [vmem:[%s4900_s1 + $0x410] sm:$0xff]  ;;  %v616_v12 = vmax.f32 %v606_v7, 0.0  ;;  %v629_v17 = vld [vmem:[%s3474_s9 + $0x25] sm:$0xff] }
  0x3f   : > { %882 = vmatprep.mubr.f32.mxu1 %v580_v22  ;;  %3019 = vmatpush3.bf16.msra.mxu1 %v3018_v30  ;;  %v3026_v60 = vpack.c.bf16 %v336_v51, %v335_v48  ;;  %v356_v11 = vld [vmem:[%s4900_s1 + $0x418] sm:$0xff]  ;;  %v358_v21 = vld [vmem:[%s4900_s1 + $0x428] sm:$0xff]  ;;  %v639_v19 = vmax.f32 %v629_v17, 0.0  ;;  %v359_v30 = vld [vmem:[%s4900_s1 + $0x430] sm:$0xff] }
  0x40   : > { %768 = vmatmul.mubr.f32.gmra.mrb[12].mxu0 %v539_v32  ;;  %3021 = vmatprep.subr.bf16.mxu1 %v3020_v33  ;;  %v586_v13 = vld [vmem:[%s3474_s9 + $0x13] sm:$0xff]  ;;  %v3032_v16 = vpack.c.bf16 %v356_v11, %v355_v10  ;;  %v587_v24 = vld [vmem:[%s3474_s9 + $0x1b] sm:$0xff]  ;;  %v608_v25 = vld [vmem:[%s3474_s9 + $0x24] sm:$0xff]  ;;  %v3036_v27 = vpack.c.bf16 %v358_v21, %v357_v20 }
  0x41   : > { %772 = vmatprep.mubr.f32.mxu0 %v560_v35  ;;  %2991 = vmatpush3.bf16.msra.mxu0 %v2990_v42  ;;  %v596_v18 = vmax.f32 %v586_v13, 0.0  ;;  %v630_v28 = vld [vmem:[%s3474_s9 + $0x2d] sm:$0xff]  ;;  %v597_v29 = vmax.f32 %v587_v24, 0.0  ;;  %v360_v31 = vld [vmem:[%s4900_s1 + $0x438] sm:$0xff]  ;;  %v618_v32 = vmax.f32 %v608_v25, 0.0  ;;  %v588_v33 = vld [vmem:[%s3474_s9 + $0x23] sm:$0xff] }
  0x42   : > { %883 = vmatmul.mubr.f32.gmra.mrb[12].mxu1 %v579_v4  ;;  %2993 = vmatprep.subr.bf16.mxu0 %v2992_v37  ;;  %v542_v4 = vmax.f32 %v532_v63, 0.0  ;;  %v640_v23 = vmax.f32 %v630_v28, 0.0  ;;  %v609_v26 = vld [vmem:[%s3474_s9 + $0x2c] sm:$0xff]  ;;  %v3040_v34 = vpack.c.bf16 %v360_v31, %v359_v30  ;;  %v631_v35 = vld [vmem:[%s3474_s9 + $0x35] sm:$0xff]  ;;  %v598_v36 = vmax.f32 %v588_v33, 0.0  ;;  %v361_v38 = vld [vmem:[%s4900_s1 + $0x440] sm:$0xff] }
  0x43   : > { %887 = vmatprep.mubr.f32.mxu1 %v581_v40  ;;  %3023 = vmatpush3.bf16.msra.mxu1 %v3022_v44  ;;  %v362_v39 = vld [vmem:[%s4900_s1 + $0x448] sm:$0xff]  ;;  %v641_v42 = vmax.f32 %v631_v35, 0.0  ;;  %v610_v43 = vld [vmem:[%s3474_s9 + $0x34] sm:$0xff]  ;;  %v632_v44 = vld [vmem:[%s3474_s9 + $0x3d] sm:$0xff] }
  0x44   : > { %773 = vmatmul.mubr.f32.gmra.mrb[14].mxu0 %v540_v49  ;;  %3025 = vmatprep.subr.bf16.mxu1 %v3024_v50  ;;  %v589_v41 = vld [vmem:[%s3474_s9 + $0x2b] sm:$0xff]  ;;  %v3044_v37 = vpack.c.bf16 %v362_v39, %v361_v38  ;;  %v364_v48 = vld [vmem:[%s4900_s1 + $0x458] sm:$0xff]  ;;  %v620_v49 = vmax.f32 %v610_v43, 0.0  ;;  %v642_v51 = vmax.f32 %v632_v44, 0.0  ;;  %v370_v44 = vld [vmem:[%s4902_s3] sm:$0xff] }
  0x45   : > { %777 = vmatprep.mubr.f32.mxu0 %v561_v54  ;;  %2995 = vmatpush3.bf16.msra.mxu0 %v2994_v58  ;;  %v599_v45 = vmax.f32 %v589_v41, 0.0  ;;  %v363_v46 = vld [vmem:[%s4900_s1 + $0x450] sm:$0xff]  ;;  %v611_v47 = vld [vmem:[%s3474_s9 + $0x3c] sm:$0xff]  ;;  %v633_v53 = vld [vmem:[%s3474_s9 + $0x45] sm:$0xff] }
  0x46   : > { %888 = vmatmul.mubr.f32.gmra.mrb[14].mxu1 %v580_v22  ;;  %3029 = vmatprep.subr.bf16.mxu0 %v3028_v61  ;;  %v617_v22 = vmax.f32 %v607_v15, 0.0  ;;  %v590_v50 = vld [vmem:[%s3474_s9 + $0x33] sm:$0xff]  ;;  %v3048_v54 = vpack.c.bf16 %v364_v48, %v363_v46  ;;  %v366_v57 = vld [vmem:[%s4900_s1 + $0x468] sm:$0xff]  ;;  %v621_v58 = vmax.f32 %v611_v47, 0.0  ;;  %v591_v59 = vld [vmem:[%s3474_s9 + $0x3b] sm:$0xff] }
  0x47   : > { %892 = vmatprep.mubr.f32.mxu1 %v582_v56  ;;  %3027 = vmatpush3.bf16.msra.mxu1 %v3026_v60  ;;  %v600_v55 = vmax.f32 %v590_v50, 0.0  ;;  %v643_v60 = vmax.f32 %v633_v53, 0.0  ;;  %v601_v63 = vmax.f32 %v591_v59, 0.0  ;;  %v368_v2 = vld [vmem:[%s4900_s1 + $0x478] sm:$0xff]  ;;  %v613_v1 = vld [vmem:[%s3474_s9 + $0x4c] sm:$0xff]  ;;  %v418_v53 = vld [vmem:[%s4902_s3 + $0x180] sm:$0xff] }
  0x48   : > { %778 = vmatmul.mubr.f32.gmra.mrb[16].mxu0 %v541_v62  ;;  %v634_v62 = vld [vmem:[%s3474_s9 + $0x4d] sm:$0xff]  ;;  %v636_v13 = vld [vmem:[%s3474_s9 + $0x5d] sm:$0xff] }
  0x49   : > { %782 = vmatprep.mubr.f32.mxu0 %v562_v52  ;;  %v593_v10 = vld [vmem:[%s3474_s9 + $0x4b] sm:$0xff]  ;;  %v646_v17 = vmax.f32 %v636_v13, 0.0  ;;  %v647_v20 = vld [vmem:[%s3474_s9 + $0x16] sm:$0xff]  ;;  %v652_v33 = vld [vmem:[%s3474_s9 + $0x3e] sm:$0xff] }
  0x4a   : > { %893 = vmatmul.mubr.f32.gmra.mrb[16].mxu1 %v581_v40  ;;  %v619_v40 = vmax.f32 %v609_v26, 0.0  ;;  %v657_v24 = vmax.f32 %v647_v20, 0.0  ;;  %v649_v25 = vld [vmem:[%s3474_s9 + $0x26] sm:$0xff]  ;;  %v651_v30 = vld [vmem:[%s3474_s9 + $0x36] sm:$0xff]  ;;  %v662_v26 = vmax.f32 %v652_v33, 0.0  ;;  %v654_v35 = vld [vmem:[%s3474_s9 + $0x4e] sm:$0xff] }
  0x4b   : > { %897 = vmatprep.mubr.f32.mxu1 %v584_v0  ;;  %v367_v0 = vld [vmem:[%s4900_s1 + $0x470] sm:$0xff]  ;;  %v659_v28 = vmax.f32 %v649_v25, 0.0  ;;  %v664_v38 = vmax.f32 %v654_v35, 0.0  ;;  %v387_v43 = vld [vmem:[%s4902_s3 + $0x88] sm:$0xff]  ;;  %v373_v47 = vld [vmem:[%s4902_s3 + $0x18] sm:$0xff] }
  0x4c   : > { %783 = vmatmul.mubr.f32.gmra.mrb[18].mxu0 %v542_v4  ;;  %v592_v4 = vld [vmem:[%s3474_s9 + $0x43] sm:$0xff]  ;;  %v3056_v7 = vpack.c.bf16 %v368_v2, %v367_v0  ;;  %v388_v48 = vld [vmem:[%s4902_s3 + $0x90] sm:$0xff]  ;;  %v421_v2 = vld [vmem:[%s4902_s3 + $0x198] sm:$0xff] }
  0x4d   : > { %967 = vmatprep.mubr.f32.mxu0 %v615_v5  ;;  %v644_v5 = vmax.f32 %v634_v62, 0.0  ;;  %v602_v8 = vmax.f32 %v592_v4, 0.0  ;;  %v372_v50 = vld [vmem:[%s4902_s3 + $0x10] sm:$0xff]  ;;  %v374_v62 = vld [vmem:[%s4902_s3 + $0x20] sm:$0xff]  ;;  %v423_v13 = vld [vmem:[%s4902_s3 + $0x1a8] sm:$0xff] }
  0x4e   : > { %898 = vmatmul.mubr.f32.gmra.mrb[18].mxu1 %v582_v56  ;;  %v365_v56 = vld [vmem:[%s4900_s1 + $0x460] sm:$0xff]  ;;  %v420_v0 = vld [vmem:[%s4902_s3 + $0x190] sm:$0xff]  ;;  %v381_v35 = vld [vmem:[%s4902_s3 + $0x58] sm:$0xff] }
  0x4f   : > { %1082 = vmatprep.mubr.f32.mxu1 %v637_v6  ;;  %v3052_v52 = vpack.c.bf16 %v366_v57, %v365_v56  ;;  %v635_v6 = vld [vmem:[%s3474_s9 + $0x55] sm:$0xff]  ;;  %v402_v57 = vld [vmem:[%s4902_s3 + $0x100] sm:$0xff]  ;;  %v3096_v4 = vpack.c.bf16 %v421_v2, %v420_v0  ;;  %v415_v0 = vld [vmem:[%s4902_s3 + $0x168] sm:$0xff] }
  0x50   : > { %968 = vmatmul.mubr.f32.vlgmr.msra.gmra.mrb[20].mxu0 %v595_v9  ;;  %v623_v9 = vmax.f32 %v613_v1, 0.0  ;;  %v645_v11 = vmax.f32 %v635_v6, 0.0  ;;  %v405_v1 = vld [vmem:[%s4902_s3 + $0x118] sm:$0xff]  ;;  %v394_v20 = vld [vmem:[%s4902_s3 + $0xc0] sm:$0xff]  ;;  %v424_v25 = vld [vmem:[%s4902_s3 + $0x1b0] sm:$0xff] }
  0x51   : > { %3031 = vmatpush3.bf16.msra.mxu0 %v3028_v61  ;;  %972 = vmatprep.mubr.f32.mxu0 %v616_v12  ;;  %v612_v61 = vld [vmem:[%s3474_s9 + $0x44] sm:$0xff]  ;;  %v396_v33 = vld [vmem:[%s4902_s3 + $0xd0] sm:$0xff] }
  0x52   : > { %1083 = vmatmul.mubr.f32.vlgmr.msra.gmra.mrb[20].mxu1 %v616_v12  ;;  %3033 = vmatprep.subr.bf16.mxu0 %v3032_v16  ;;  %v622_v3 = vmax.f32 %v612_v61, 0.0  ;;  %v614_v12 = vld [vmem:[%s3474_s9 + $0x54] sm:$0xff]  ;;  %v391_v61 = vld [vmem:[%s4902_s3 + $0xa8] sm:$0xff] }
  0x53   : > { %1087 = vmatprep.mubr.f32.mxu1 %v638_v14  ;;  %v603_v14 = vmax.f32 %v593_v10, 0.0  ;;  %v624_v15 = vmax.f32 %v614_v12, 0.0  ;;  %v422_v12 = vld [vmem:[%s4902_s3 + $0x1a0] sm:$0xff] }
  0x54   : > { %973 = vmatmul.mubr.f32.gmra.mrb[22].mxu0 %v596_v18  ;;  %v625_v18 = vld [vmem:[%s3474_s9 + $0x5c] sm:$0xff] }
  0x55   : > { %3035 = vmatpush3.bf16.msra.mxu0 %v3032_v16  ;;  %977 = vmatprep.mubr.f32.mxu0 %v617_v22  ;;  %v594_v16 = vld [vmem:[%s3474_s9 + $0x53] sm:$0xff] }
  0x56   : > { %1088 = vmatmul.mubr.f32.gmra.mrb[22].mxu1 %v617_v22  ;;  %3037 = vmatprep.subr.bf16.mxu0 %v3036_v27  ;;  %v604_v21 = vmax.f32 %v594_v16, 0.0  ;;  %v626_v22 = vmax.f32 %v625_v18, 0.0  ;;  %v406_v16 = vld [vmem:[%s4902_s3 + $0x120] sm:$0xff] }
  0x57   : > { %1092 = vmatprep.mubr.f32.mxu1 %v639_v19  ;;  %v648_v19 = vld [vmem:[%s3474_s9 + $0x1e] sm:$0xff] }
  0x58   : > { %978 = vmatmul.mubr.f32.gmra.mrb[24].mxu0 %v597_v29  ;;  %v650_v29 = vld [vmem:[%s3474_s9 + $0x2e] sm:$0xff] }
  0x59   : > { %982 = vmatprep.mubr.f32.mxu0 %v618_v32  ;;  %3039 = vmatpush3.bf16.msra.mxu0 %v3036_v27  ;;  %v658_v27 = vmax.f32 %v648_v19, 0.0  ;;  %v660_v31 = vmax.f32 %v650_v29, 0.0  ;;  %v379_v19 = vld [vmem:[%s4902_s3 + $0x48] sm:$0xff]  ;;  %v408_v29 = vld [vmem:[%s4902_s3 + $0x130] sm:$0xff] }
  0x5a   : > { %1093 = vmatmul.mubr.f32.gmra.mrb[24].mxu1 %v618_v32  ;;  %3041 = vmatprep.subr.bf16.mxu0 %v3040_v34  ;;  %v661_v32 = vmax.f32 %v651_v30, 0.0  ;;  %v409_v30 = vld [vmem:[%s4902_s3 + $0x138] sm:$0xff] }
  0x5b   : > { %1097 = vmatprep.mubr.f32.mxu1 %v640_v23  ;;  %v653_v23 = vld [vmem:[%s3474_s9 + $0x46] sm:$0xff] }
  0x5c   : > { %983 = vmatmul.mubr.f32.gmra.mrb[26].mxu0 %v598_v36  ;;  %v655_v36 = vld [vmem:[%s3474_s9 + $0x56] sm:$0xff] }
  0x5d   : > { %987 = vmatprep.mubr.f32.mxu0 %v619_v40  ;;  %3043 = vmatpush3.bf16.msra.mxu0 %v3040_v34  ;;  %v663_v34 = vmax.f32 %v653_v23, 0.0  ;;  %v665_v39 = vmax.f32 %v655_v36, 0.0  ;;  %v397_v23 = vld [vmem:[%s4902_s3 + $0xd8] sm:$0xff]  ;;  %v426_v36 = vld [vmem:[%s4902_s3 + $0x1c0] sm:$0xff] }
  0x5e   : > { %1098 = vmatmul.mubr.f32.gmra.mrb[26].mxu1 %v619_v40  ;;  %3045 = vmatprep.subr.bf16.mxu0 %v3044_v37  ;;  %v656_v40 = vld [vmem:[%s3474_s9 + $0x5e] sm:$0xff] }
  0x5f   : > { %1102 = vmatprep.mubr.f32.mxu1 %v641_v42  ;;  %v666_v41 = vmax.f32 %v656_v40, 0.0  ;;  %v386_v42 = vld [vmem:[%s4902_s3 + $0x80] sm:$0xff] }
  0x60   : > { %988 = vmatmul.mubr.f32.gmra.mrb[28].mxu0 %v599_v45  ;;  %v371_v45 = vld [vmem:[%s4902_s3 + $0x8] sm:$0xff]  ;;  %v410_v40 = vld [vmem:[%s4902_s3 + $0x140] sm:$0xff] }
  0x61   : > { %992 = vmatprep.mubr.f32.mxu0 %v620_v49  ;;  %3047 = vmatpush3.bf16.msra.mxu0 %v3044_v37  ;;  %v3060_v37 = vpack.c.bf16 %v387_v43, %v386_v42  ;;  %v3062_v46 = vpack.c.bf16 %v371_v45, %v370_v44  ;;  %v399_v44 = vld [vmem:[%s4902_s3 + $0xe8] sm:$0xff] }
  0x62   : > { %1103 = vmatmul.mubr.f32.gmra.mrb[28].mxu1 %v620_v49  ;;  %3049 = vmatprep.subr.bf16.mxu0 %v3048_v54  ;;  %v389_v49 = vld [vmem:[%s4902_s3 + $0x98] sm:$0xff] }
  0x63   : > { %1107 = vmatprep.mubr.f32.mxu1 %v642_v51  ;;  %3061 = vmatprep.subr.bf16.mxu1 %v3060_v37  ;;  %v3064_v51 = vpack.c.bf16 %v389_v49, %v388_v48  ;;  %v398_v37 = vld [vmem:[%s4902_s3 + $0xe0] sm:$0xff]  ;;  %v383_v48 = vld [vmem:[%s4902_s3 + $0x68] sm:$0xff]  ;;  %v428_v49 = vld [vmem:[%s4902_s3 + $0x1d0] sm:$0xff] }
  0x64   : > { %993 = vmatmul.mubr.f32.gmra.mrb[30].mxu0 %v600_v55  ;;  %3063 = vmatpush3.bf16.msra.mxu1 %v3062_v46  ;;  %v3066_v55 = vpack.c.bf16 %v373_v47, %v372_v50  ;;  %v3084_v45 = vpack.c.bf16 %v399_v44, %v398_v37  ;;  %v382_v46 = vld [vmem:[%s4902_s3 + $0x60] sm:$0xff]  ;;  %v412_v47 = vld [vmem:[%s4902_s3 + $0x150] sm:$0xff] }
  0x65   : > { %997 = vmatprep.mubr.f32.mxu0 %v621_v58  ;;  %3051 = vmatpush3.bf16.msra.mxu0 %v3048_v54  ;;  %v419_v54 = vld [vmem:[%s4902_s3 + $0x188] sm:$0xff]  ;;  %v3086_v50 = vpack.c.bf16 %v383_v48, %v382_v46  ;;  %v460_v44 = vld [vmem:[%s4902_s3 + $0x2d0] sm:$0xff] }
  0x66   : > { %1108 = vmatmul.mubr.f32.gmra.mrb[30].mxu1 %v621_v58  ;;  %3053 = vmatprep.subr.bf16.mxu0 %v3052_v52  ;;  %v3092_v56 = vpack.c.bf16 %v419_v54, %v418_v53  ;;  %v403_v58 = vld [vmem:[%s4902_s3 + $0x108] sm:$0xff]  ;;  %v413_v54 = vld [vmem:[%s4902_s3 + $0x158] sm:$0xff]  ;;  %v444_v46 = vld [vmem:[%s4902_s3 + $0x250] sm:$0xff] }
  0x67   : > { %1112 = vmatprep.mubr.f32.mxu1 %v643_v60  ;;  %3065 = vmatprep.subr.bf16.mxu1 %v3064_v51  ;;  %v3094_v59 = vpack.c.bf16 %v403_v58, %v402_v57  ;;  %v390_v60 = vld [vmem:[%s4902_s3 + $0xa0] sm:$0xff]  ;;  %v429_v51 = vld [vmem:[%s4902_s3 + $0x1d8] sm:$0xff] }
  0x68   : > { %998 = vmatmul.mubr.f32.gmra.mrb[32].mxu0 %v601_v63  ;;  %3067 = vmatpush3.bf16.msra.mxu1 %v3066_v55  ;;  %v375_v63 = vld [vmem:[%s4902_s3 + $0x28] sm:$0xff]  ;;  %v3112_v53 = vpack.c.bf16 %v429_v51, %v428_v49  ;;  %v3114_v55 = vpack.c.bf16 %v413_v54, %v412_v47  ;;  %v401_v57 = vld [vmem:[%s4902_s3 + $0xf8] sm:$0xff]  ;;  %v462_v51 = vld [vmem:[%s4902_s3 + $0x2e0] sm:$0xff] }
  0x69   : > { %1002 = vmatprep.mubr.f32.mxu0 %v622_v3  ;;  %3055 = vmatpush3.bf16.msra.mxu0 %v3052_v52  ;;  %v3068_v52 = vpack.c.bf16 %v391_v61, %v390_v60  ;;  %v385_v60 = vld [vmem:[%s4902_s3 + $0x78] sm:$0xff]  ;;  %v430_v61 = vld [vmem:[%s4902_s3 + $0x1e0] sm:$0xff]  ;;  %v463_v47 = vld [vmem:[%s4902_s3 + $0x2e8] sm:$0xff] }
  0x6a   : > { %1113 = vmatmul.mubr.f32.gmra.mrb[32].mxu1 %v622_v3  ;;  %3057 = vmatprep.subr.bf16.mxu0 %v3056_v7  ;;  %v3070_v3 = vpack.c.bf16 %v375_v63, %v374_v62  ;;  %v414_v63 = vld [vmem:[%s4902_s3 + $0x160] sm:$0xff]  ;;  %v445_v49 = vld [vmem:[%s4902_s3 + $0x258] sm:$0xff]  ;;  %v3148_v54 = vpack.c.bf16 %v463_v47, %v462_v51 }
  0x6b   : > { %1117 = vmatprep.mubr.f32.mxu1 %v644_v5  ;;  %v404_v5 = vld [vmem:[%s4902_s3 + $0x110] sm:$0xff]  ;;  %3069 = vmatprep.subr.bf16.mxu1 %v3068_v52  ;;  %v431_v52 = vld [vmem:[%s4902_s3 + $0x1e8] sm:$0xff] }
  0x6c   : > { %1003 = vmatmul.mubr.f32.gmra.mrb[34].mxu0 %v602_v8  ;;  %v3098_v6 = vpack.c.bf16 %v405_v1, %v404_v5  ;;  %3071 = vmatpush3.bf16.msra.mxu1 %v3070_v3  ;;  %v393_v8 = vld [vmem:[%s4902_s3 + $0xb8] sm:$0xff]  ;;  %v3116_v2 = vpack.c.bf16 %v431_v52, %v430_v61  ;;  %v3118_v3 = vpack.c.bf16 %v415_v0, %v414_v63  ;;  %v432_v5 = vld [vmem:[%s4902_s3 + $0x1f0] sm:$0xff]  ;;  %v4184_v63 = vld [vmem:[%s4901_s2] ss:$0 sm:$0xff] }
  0x6d   : > { %1007 = vmatprep.mubr.f32.mxu0 %v623_v9  ;;  %3059 = vmatpush3.bf16.msra.mxu0 %v3056_v7  ;;  %v392_v7 = vld [vmem:[%s4902_s3 + $0xb0] sm:$0xff]  ;;  %v433_v1 = vld [vmem:[%s4902_s3 + $0x1f8] sm:$0xff] }
  0x6e   : > { %1118 = vmatmul.mubr.f32.gmra.mrb[34].mxu1 %v623_v9  ;;  %3093 = vmatprep.subr.bf16.mxu0 %v3092_v56  ;;  %v376_v9 = vld [vmem:[%s4902_s3 + $0x30] sm:$0xff]  ;;  %v3072_v10 = vpack.c.bf16 %v393_v8, %v392_v7  ;;  %v417_v7 = vld [vmem:[%s4902_s3 + $0x178] sm:$0xff]  ;;  %v3250_v8 = vld [vmem:[#allocation2] sm:$0xff] }
  0x6f   : > { %1122 = vmatprep.mubr.f32.mxu1 %v645_v11  ;;  %v377_v11 = vld [vmem:[%s4902_s3 + $0x38] sm:$0xff]  ;;  %v400_v56 = vld [vmem:[%s4902_s3 + $0xf0] sm:$0xff] }
  0x70   : > { %1008 = vmatmul.mubr.f32.gmra.mrb[36].mxu0 %v603_v14  ;;  %v3074_v14 = vpack.c.bf16 %v377_v11, %v376_v9  ;;  %3073 = vmatprep.subr.bf16.mxu1 %v3072_v10  ;;  %v3088_v58 = vpack.c.bf16 %v401_v57, %v400_v56  ;;  %v3120_v9 = vpack.c.bf16 %v433_v1, %v432_v5  ;;  %v450_v11 = vld [vmem:[%s4902_s3 + $0x280] sm:$0xff]  ;;  %v464_v57 = vld [vmem:[%s4902_s3 + $0x2f0] sm:$0xff]  ;;  %v449_v61 = vld [vmem:[%s4902_s3 + $0x278] sm:$0xff] }
  0x71   : > { %1012 = vmatprep.mubr.f32.mxu0 %v624_v15 }
  0x72   : > { %1123 = vmatmul.mubr.f32.gmra.mrb[36].mxu1 %v624_v15  ;;  %v3100_v15 = vpack.c.bf16 %v423_v13, %v422_v12  ;;  %v451_v12 = vld [vmem:[%s4902_s3 + $0x288] sm:$0xff] }
  0x73   : > { %1127 = vmatprep.mubr.f32.mxu1 %v646_v17  ;;  %v407_v17 = vld [vmem:[%s4902_s3 + $0x128] sm:$0xff]  ;;  %3075 = vmatpush3.bf16.msra.mxu1 %v3074_v14  ;;  %v3124_v13 = vpack.c.bf16 %v451_v12, %v450_v11  ;;  %v434_v14 = vld [vmem:[%s4902_s3 + $0x200] sm:$0xff] }
  0x74   : > { %1013 = vmatmul.mubr.f32.gmra.mrb[38].mxu0 %v604_v21  ;;  %v3102_v18 = vpack.c.bf16 %v407_v17, %v406_v16  ;;  %v395_v21 = vld [vmem:[%s4902_s3 + $0xc8] sm:$0xff]  ;;  %v452_v17 = vld [vmem:[%s4902_s3 + $0x290] sm:$0xff] }
  0x75   : > { %2838 = vmatprep.mubr.f32.mxu0 %v657_v24  ;;  %v378_v24 = vld [vmem:[%s4902_s3 + $0x40] sm:$0xff] }
  0x76   : > { %1128 = vmatmul.mubr.f32.gmra.mrb[38].mxu1 %v626_v22  ;;  %v3076_v22 = vpack.c.bf16 %v395_v21, %v394_v20  ;;  %v436_v21 = vld [vmem:[%s4902_s3 + $0x210] sm:$0xff] }
  0x78   : > { %2839 = vmatmul.mubr.f32.vlgmr.msra.gmra.mrb[40].mxu0 %v658_v27  ;;  %v3078_v27 = vpack.c.bf16 %v379_v19, %v378_v24  ;;  %3077 = vmatprep.subr.bf16.mxu1 %v3076_v22  ;;  %v437_v22 = vld [vmem:[%s4902_s3 + $0x218] sm:$0xff]  ;;  %v454_v24 = vld [vmem:[%s4902_s3 + $0x2a0] sm:$0xff]  ;;  %v455_v19 = vld [vmem:[%s4902_s3 + $0x2a8] sm:$0xff] }
  0x79   : > { %2841 = vmatprep.mubr.f32.mxu0 %v659_v28  ;;  %3095 = vmatpush3.bf16.msra.mxu0 %v3094_v59  ;;  %v425_v28 = vld [vmem:[%s4902_s3 + $0x1b8] sm:$0xff]  ;;  %v384_v59 = vld [vmem:[%s4902_s3 + $0x70] sm:$0xff] }
  0x7a   : > { %3097 = vmatprep.subr.bf16.mxu0 %v3096_v4  ;;  %3079 = vmatpush3.bf16.msra.mxu1 %v3078_v27  ;;  %v3090_v62 = vpack.c.bf16 %v385_v60, %v384_v59  ;;  %v1509_v4 = vld [vmem:[#allocation2 + $0x1] sm:$0xff]  ;;  %v3130_v27 = vpack.c.bf16 %v437_v22, %v436_v21  ;;  %v448_v60 = vld [vmem:[%s4902_s3 + $0x270] sm:$0xff] }
  0x7b   : > { %1641 = vmatprep.mubr.f32.mxu1 %v1509_v4  ;;  %v3154_v52 = vpack.c.bf16 %v449_v61, %v448_v60 }
  0x7c   : > { %2842 = vmatmul.mubr.f32.gmra.mrb[42].mxu0 %v660_v31  ;;  %v3104_v31 = vpack.c.bf16 %v425_v28, %v424_v25  ;;  %v438_v25 = vld [vmem:[%s4902_s3 + $0x220] sm:$0xff]  ;;  %v3132_v28 = vpack.c.bf16 %v455_v19, %v454_v24 }
  0x7d   : > { %2844 = vmatprep.mubr.f32.mxu0 %v661_v32  ;;  %3099 = vmatpush3.bf16.msra.mxu0 %v3098_v6  ;;  %v3106_v32 = vpack.c.bf16 %v409_v30, %v408_v29  ;;  %v416_v6 = vld [vmem:[%s4902_s3 + $0x170] sm:$0xff]  ;;  %v439_v29 = vld [vmem:[%s4902_s3 + $0x228] sm:$0xff]  ;;  %v482_v30 = vld [vmem:[%s4902_s3 + $0x380] sm:$0xff] }
  0x7e   : > { %3101 = vmatprep.subr.bf16.mxu0 %v3100_v15  ;;  %v3122_v10 = vpack.c.bf16 %v417_v7, %v416_v6  ;;  %v435_v15 = vld [vmem:[%s4902_s3 + $0x208] sm:$0xff]  ;;  %v498_v7 = vld [vmem:[%s4902_s3 + $0x400] sm:$0xff] }
  0x7f   : > { %v3126_v16 = vpack.c.bf16 %v435_v15, %v434_v14 }
  0x80   : > { %2845 = vmatmul.mubr.f32.gmra.mrb[44].mxu0 %v662_v26  ;;  %v3080_v26 = vpack.c.bf16 %v397_v23, %v396_v33  ;;  %v456_v33 = vld [vmem:[%s4902_s3 + $0x2b0] sm:$0xff]  ;;  %v457_v23 = vld [vmem:[%s4902_s3 + $0x2b8] sm:$0xff] }
  0x81   : > { %2847 = vmatprep.mubr.f32.mxu0 %v663_v34  ;;  %3103 = vmatpush3.bf16.msra.mxu0 %v3102_v18  ;;  %v380_v34 = vld [vmem:[%s4902_s3 + $0x50] sm:$0xff]  ;;  %v453_v18 = vld [vmem:[%s4902_s3 + $0x298] sm:$0xff] }
  0x82   : > { %3105 = vmatprep.subr.bf16.mxu0 %v3104_v31  ;;  %3081 = vmatprep.subr.bf16.mxu1 %v3080_v26  ;;  %v3128_v20 = vpack.c.bf16 %v453_v18, %v452_v17  ;;  %v483_v31 = vld [vmem:[%s4902_s3 + $0x388] sm:$0xff] }
  0x83   : > { %v3156_v26 = vpack.c.bf16 %v483_v31, %v482_v30 }
  0x84   : > { %2848 = vmatmul.mubr.f32.gmra.mrb[46].mxu0 %v664_v38  ;;  %v3082_v38 = vpack.c.bf16 %v381_v35, %v380_v34  ;;  %v440_v34 = vld [vmem:[%s4902_s3 + $0x230] sm:$0xff]  ;;  %v441_v35 = vld [vmem:[%s4902_s3 + $0x238] sm:$0xff] }
  0x85   : > { %2850 = vmatprep.mubr.f32.mxu0 %v665_v39  ;;  %3107 = vmatpush3.bf16.msra.mxu0 %v3106_v32  ;;  %v427_v39 = vld [vmem:[%s4902_s3 + $0x1c8] sm:$0xff]  ;;  %v3134_v32 = vpack.c.bf16 %v439_v29, %v438_v25 }
  0x86   : > { %v3108_v42 = vpack.c.bf16 %v427_v39, %v426_v36  ;;  %3083 = vmatpush3.bf16.msra.mxu1 %v3082_v38  ;;  %v3136_v36 = vpack.c.bf16 %v457_v23, %v456_v33  ;;  %v3138_v38 = vpack.c.bf16 %v441_v35, %v440_v34  ;;  %v458_v39 = vld [vmem:[%s4902_s3 + $0x2c0] sm:$0xff] }
  0x87   : > { %3085 = vmatprep.subr.bf16.mxu1 %v3084_v45  ;;  %v461_v45 = vld [vmem:[%s4902_s3 + $0x2d8] sm:$0xff] }
  0x88   : > { %2851 = vmatmul.mubr.f32.gmra.mrb[48].mxu0 %v666_v41  ;;  %v411_v41 = vld [vmem:[%s4902_s3 + $0x148] sm:$0xff]  ;;  %3109 = vmatprep.subr.bf16.mxu0 %v3108_v42  ;;  %v442_v42 = vld [vmem:[%s4902_s3 + $0x240] sm:$0xff]  ;;  %v3144_v48 = vpack.c.bf16 %v461_v45, %v460_v44 }
  0x89   : > { %v3110_v43 = vpack.c.bf16 %v411_v41, %v410_v40  ;;  %v459_v40 = vld [vmem:[%s4902_s3 + $0x2c8] sm:$0xff] }
  0x8a   : > { %3087 = vmatpush3.bf16.msra.mxu1 %v3086_v50  ;;  %v3140_v41 = vpack.c.bf16 %v459_v40, %v458_v39  ;;  %v3146_v50 = vpack.c.bf16 %v445_v49, %v444_v46 }
  0x8b   : > { %3111 = vmatpush3.bf16.msra.mxu0 %v3110_v43  ;;  %3089 = vmatprep.subr.bf16.mxu1 %v3088_v58  ;;  %v443_v43 = vld [vmem:[%s4902_s3 + $0x248] sm:$0xff]  ;;  %v465_v58 = vld [vmem:[%s4902_s3 + $0x2f8] sm:$0xff] }
  0x8c   : > { %3113 = vmatprep.subr.bf16.mxu0 %v3112_v53  ;;  %v3142_v37 = vpack.c.bf16 %v443_v43, %v442_v42  ;;  %v446_v53 = vld [vmem:[%s4902_s3 + $0x260] sm:$0xff]  ;;  %v3152_v59 = vpack.c.bf16 %v465_v58, %v464_v57 }
  0x8e   : > { %3091 = vmatpush3.bf16.msra.mxu1 %v3090_v62 }
  0x8f   : > { %3115 = vmatpush3.bf16.msra.mxu0 %v3114_v55  ;;  %3125 = vmatprep.subr.bf16.mxu1 %v3124_v13  ;;  %v447_v55 = vld [vmem:[%s4902_s3 + $0x268] sm:$0xff] }
  0x90   : > { %3117 = vmatprep.subr.bf16.mxu0 %v3116_v2  ;;  %v3150_v56 = vpack.c.bf16 %v447_v55, %v446_v53 }
  0x91   : > { %1642 = vmatmul.mubr.f32.vlgmr.msra.gmra.mrb[40].mxu1 %v3250_v8  ;;  %v499_v8 = vld [vmem:[%s4902_s3 + $0x408] sm:$0xff] }
  0x92   : > { %3127 = vmatpush3.bf16.msra.mxu1 %v3126_v16  ;;  %v4193_v11 = vpack.c.bf16 %v499_v8, %v498_v7 }
  0x93   : > { %3119 = vmatpush3.bf16.msra.mxu0 %v3118_v3  ;;  %3129 = vmatprep.subr.bf16.mxu1 %v3128_v20 }
  0x94   : > { %3121 = vmatprep.subr.bf16.mxu0 %v3120_v9 }
  0x96   : > { %3131 = vmatpush3.bf16.msra.mxu1 %v3130_v27 }
  0x97   : > { %3123 = vmatpush3.bf16.msra.mxu0 %v3122_v10  ;;  %3133 = vmatprep.subr.bf16.mxu1 %v3132_v28 }
  0x98   : > { %3157 = vmatprep.subr.bf16.mxu0 %v3156_v26 }
  0x9a   : > { %3135 = vmatpush3.bf16.msra.mxu1 %v3134_v32 }
  0x9b   : > { %3137 = vmatprep.subr.bf16.mxu1 %v3136_v36 }
  0x9e   : > { %3139 = vmatpush3.bf16.msra.mxu1 %v3138_v38 }
  0x9f   : > { %3141 = vmatprep.subr.bf16.mxu1 %v3140_v41 }
  0xa2   : > { %3143 = vmatpush3.bf16.msra.mxu1 %v3142_v37 }
  0xa3   : > { %3145 = vmatprep.subr.bf16.mxu1 %v3144_v48 }
  0xa6   : > { %3147 = vmatpush3.bf16.msra.mxu1 %v3146_v50 }
  0xa7   : > { %3149 = vmatprep.subr.bf16.mxu1 %v3148_v54 }
  0xaa   : > { %3151 = vmatpush3.bf16.msra.mxu1 %v3150_v56 }
  0xab   : > { %3153 = vmatprep.subr.bf16.mxu1 %v3152_v59 }
  0xae   : > { %3155 = vmatpush3.bf16.msra.mxu1 %v3154_v52 }
  0xaf   : > { %3189 = vmatprep.subr.bf16.mxu1 %v4193_v11 }
  0xfb   : > { %v2290_v62 = vpop.f32.mrb[0].mxu0 }
  0xfc   : > { %v2291_v0 = vpop.f32.mrb[1].mxu0 }
  0xfd   : > { %v2352_v2 = vpop.f32.mrb[0].mxu1  ;;  %v2292_v3 = vadd.f32 %v2291_v0, %v2290_v62 }
  0xfe   : > { %v2353_v4 = vpop.f32.mrb[1].mxu1 }
  0xff   : > { %v2354_v5 = vadd.f32 %v2353_v4, %v2352_v2  ;;  %v740_v1 = vadd.f32 %v2292_v3, %v4184_v63  ;;  %v2293_v6 = vpop.f32.mrb[2].mxu0 }
 0x100   : > { %v2294_v9 = vpop.f32.mrb[3].mxu0 }
 0x101   : > { %v2355_v10 = vpop.f32.mrb[2].mxu1  ;;  %v4195_v12 = vadd.f32 %v2354_v5, %v740_v1  ;;  %v2295_v13 = vadd.f32 %v2294_v9, %v2293_v6  ;;  %v1258_v1 = vlaneseq }
 0x102   : > { %v2356_v14 = vpop.f32.mrb[3].mxu1 }
 0x103   : > { %v2357_v15 = vadd.f32 %v2356_v14, %v2355_v10  ;;  %v745_v16 = vadd.f32 %v2295_v13, %v4184_v63  ;;  %v2296_v17 = vpop.f32.mrb[4].mxu0 }
 0x104   : > { %v2297_v18 = vpop.f32.mrb[5].mxu0 }
 0x105   : > { %v2358_v20 = vpop.f32.mrb[4].mxu1  ;;  %v4199_v21 = vadd.f32 %v2357_v15, %v745_v16  ;;  %v2298_v22 = vadd.f32 %v2297_v18, %v2296_v17  ;;  %v4220_v16 = vshrl.u32 %v1258_v1, 7 }
 0x106   : > { %v2359_v24 = vpop.f32.mrb[5].mxu1 }
 0x107   : > { %v2360_v19 = vadd.f32 %v2359_v24, %v2358_v20  ;;  %v750_v25 = vadd.f32 %v2298_v22, %v4184_v63  ;;  %v2299_v27 = vpop.f32.mrb[6].mxu0 }
 0x108   : > { %v2300_v28 = vpop.f32.mrb[7].mxu0 }
 0x109   : > { %v2361_v29 = vpop.f32.mrb[6].mxu1  ;;  %v4202_v30 = vadd.f32 %v2360_v19, %v750_v25  ;;  %v2301_v31 = vadd.f32 %v2300_v28, %v2299_v27  ;;  %v1260_v28 = vadd.s32 8, %v4220_v16 }
 0x10a   : > { %v2362_v32 = vpop.f32.mrb[7].mxu1 }
 0x10b   : > { %v2363_v33 = vadd.f32 %v2362_v32, %v2361_v29  ;;  %v755_v23 = vadd.f32 %v2301_v31, %v4184_v63  ;;  %v2302_v26 = vpop.f32.mrb[8].mxu0 }
 0x10c   : > { %v2303_v34 = vpop.f32.mrb[9].mxu0 }
 0x10d   : > { %v2364_v35 = vpop.f32.mrb[8].mxu1  ;;  %v4205_v36 = vadd.f32 %v2363_v33, %v755_v23  ;;  %v2304_v38 = vadd.f32 %v2303_v34, %v2302_v26 }
 0x10e   : > { %v2365_v39 = vpop.f32.mrb[9].mxu1 }
 0x10f   : > { %v2366_v40 = vadd.f32 %v2365_v39, %v2364_v35  ;;  %v760_v41 = vadd.f32 %v2304_v38, %v4184_v63  ;;  %v2305_v42 = vpop.f32.mrb[10].mxu0  ;;  %v4229_v38 = vmul.u32.u64.low 3435973837, %v1260_v28  ;;  %v4230_v39 = vmul.u32.u64.high 3435973837, %v1260_v28, %v4229_v38 }
 0x110   : > { %v2306_v43 = vpop.f32.mrb[11].mxu0 }
 0x111   : > { %v2367_v37 = vpop.f32.mrb[10].mxu1  ;;  %v4208_v44 = vadd.f32 %v2366_v40, %v760_v41  ;;  %v2307_v45 = vadd.f32 %v2306_v43, %v2305_v42  ;;  %v4235_v42 = vadd.s32 24, %v4220_v16 }
 0x112   : > { %v2368_v46 = vpop.f32.mrb[11].mxu1 }
 0x113   : > { %v2369_v48 = vadd.f32 %v2368_v46, %v2367_v37  ;;  %v765_v49 = vadd.f32 %v2307_v45, %v4184_v63  ;;  %v2308_v50 = vpop.f32.mrb[12].mxu0 }
 0x114   : > { %v2309_v51 = vpop.f32.mrb[13].mxu0 }
 0x115   : > { %v2370_v47 = vpop.f32.mrb[12].mxu1  ;;  %v4211_v53 = vadd.f32 %v2369_v48, %v765_v49  ;;  %v2310_v54 = vadd.f32 %v2309_v51, %v2308_v50 }
 0x116   : > { %v2371_v55 = vpop.f32.mrb[13].mxu1 }
 0x117   : > { %v2372_v56 = vadd.f32 %v2371_v55, %v2370_v47  ;;  %v770_v57 = vadd.f32 %v2310_v54, %v4184_v63  ;;  %v2311_v58 = vpop.f32.mrb[14].mxu0  ;;  %v4245_v54 = vmul.u32.u64.low 3435973837, %v4235_v42  ;;  %v4246_v55 = vmul.u32.u64.high 3435973837, %v4235_v42, %v4245_v54 }
 0x118   : > { %v2312_v59 = vpop.f32.mrb[15].mxu0 }
 0x119   : > { %v2373_v60 = vpop.f32.mrb[14].mxu1  ;;  %v4214_v61 = vadd.f32 %v2372_v56, %v770_v57  ;;  %v2313_v62 = vadd.f32 %v2312_v59, %v2311_v58  ;;  %v4249_v57 = vadd.s32 16, %v4220_v16 }
 0x11a   : > { %v2374_v52 = vpop.f32.mrb[15].mxu1 }
 0x11b   : > { %v2375_v0 = vadd.f32 %v2374_v52, %v2373_v60  ;;  %v775_v2 = vadd.f32 %v2313_v62, %v4184_v63  ;;  %v2314_v3 = vpop.f32.mrb[16].mxu0  ;;  %v1296_v62 = vshrl.u32 %v4230_v39, 3  ;;  %v4254_v52 = vadd.s32 40, %v4220_v16 }
 0x11c   : > { %v2315_v4 = vpop.f32.mrb[17].mxu0 }
 0x11d   : > { %v2376_v5 = vpop.f32.mrb[16].mxu1  ;;  %v4217_v6 = vadd.f32 %v2375_v0, %v775_v2  ;;  %v2316_v7 = vadd.f32 %v2315_v4, %v2314_v3 }
 0x11e   : > { %v2377_v8 = vpop.f32.mrb[17].mxu1 }
 0x11f   : > { %v2378_v9 = vadd.f32 %v2377_v8, %v2376_v5  ;;  %v780_v10 = vadd.f32 %v2316_v7, %v4184_v63  ;;  %v2317_v13 = vpop.f32.mrb[18].mxu0  ;;  %v4259_v5 = vmul.u32.u64.low 3435973837, %v4249_v57  ;;  %v4260_v1 = vmul.u32.u64.high 3435973837, %v4249_v57, %v4259_v5 }
 0x120   : > { %v2318_v14 = vpop.f32.mrb[19].mxu0 }
 0x121   : > { %v2379_v15 = vpop.f32.mrb[18].mxu1  ;;  %v4222_v17 = vadd.f32 %v2378_v9, %v780_v10  ;;  %v2319_v18 = vadd.f32 %v2318_v14, %v2317_v13  ;;  %v1297_v13 = vmul.u32 10, %v1296_v62 }
 0x122   : > { %v2380_v20 = vpop.f32.mrb[19].mxu1 }
 0x123   : > { %v2381_v22 = vadd.f32 %v2380_v20, %v2379_v15  ;;  %v785_v24 = vadd.f32 %v2319_v18, %v4184_v63  ;;  %v2414_v19 = vpop.f32.mrb[20].mxu0  ;;  %v4265_v14 = vmul.u32.u64.low 3435973837, %v4254_v52  ;;  %v4266_v15 = vmul.u32.u64.high 3435973837, %v4254_v52, %v4265_v14 }
 0x124   : > { %v2415_v25 = vpop.f32.mrb[21].mxu0  ;;  %v4269_v18 = vadd.s32 32, %v4220_v16 }
 0x125   : > { %v2476_v27 = vpop.f32.mrb[20].mxu1  ;;  %v4226_v29 = vadd.f32 %v2381_v22, %v785_v24  ;;  %v2416_v31 = vadd.f32 %v2415_v25, %v2414_v19  ;;  %v1318_v19 = vshrl.u32 %v4246_v55, 3  ;;  %v4275_v25 = vadd.s32 56, %v4220_v16 }
 0x126   : > { %v2477_v32 = vpop.f32.mrb[21].mxu1 }
 0x127   : > { %v2478_v33 = vadd.f32 %v2477_v32, %v2476_v27  ;;  %v970_v23 = vadd.f32 %v2416_v31, %v4195_v12  ;;  %v2417_v26 = vpop.f32.mrb[22].mxu0  ;;  %v4239_v46 = vmul.u32.u64.low 3435973837, %v4220_v16  ;;  %v4240_v12 = vmul.u32.u64.high 3435973837, %v4220_v16, %v4239_v46 }
 0x128   : > { %v2418_v34 = vpop.f32.mrb[23].mxu0 }
 0x129   : > { %v2479_v35 = vpop.f32.mrb[22].mxu1  ;;  %v2419_v40 = vadd.f32 %v2418_v34, %v2417_v26  ;;  %v4232_v41 = vadd.f32 %v2478_v33, %v970_v23  ;;  %v1285_v8 = vshrl.u32 %v4240_v12, 3  ;;  %v4279_v33 = vadd.s32 48, %v4220_v16 }
 0x12a   : > { %v2480_v63 = vpop.f32.mrb[23].mxu1  ;;  %v4281_v34 = vsub.s32 %v1260_v28, %v1297_v13  ;;  %v4294_v46 = vmul.u32.u64.low 3435973837, %v4275_v25  ;;  %v4295_v12 = vmul.u32.u64.high 3435973837, %v4275_v25, %v4294_v46 }
 0x12b   : > { %v2481_v43 = vadd.f32 %v2480_v63, %v2479_v35  ;;  %v975_v37 = vadd.f32 %v2419_v40, %v4199_v21  ;;  %v2420_v45 = vpop.f32.mrb[24].mxu0  ;;  %v1286_v32 = vmul.u32 10, %v1285_v8  ;;  %v1319_v63 = vmul.u32 10, %v1318_v19 }
 0x12c   : > { %v2421_v48 = vpop.f32.mrb[25].mxu0  ;;  %v4284_v35 = vmul.u32.u64.low 3435973837, %v4269_v18  ;;  %v4285_v38 = vmul.u32.u64.high 3435973837, %v4269_v18, %v4284_v35  ;;  %vm1390_vm0 = vcmp.ne.s32.totalorder %v4281_v34, 0  ;;  %vm1400_vm1 = vcmp.lt.s32.totalorder %v4281_v34, 0 }
 0x12d   : > { %v2482_v49 = vpop.f32.mrb[24].mxu1  ;;  %v2422_v50 = vadd.f32 %v2421_v48, %v2420_v45  ;;  %v4242_v47 = vadd.f32 %v2481_v43, %v975_v37  ;;  %v1307_v45 = vshrl.u32 %v4260_v1, 3  ;;  %vm4335_vm4 = vmand %vm1400_vm1, %vm1390_vm0 }
 0x12e   : > { %v2483_v51 = vpop.f32.mrb[25].mxu1  ;;  %v1329_v8 = vshrl.u32 %v4285_v38, 3 }
 0x12f   : > { %v2484_v56 = vadd.f32 %v2483_v51, %v2482_v49  ;;  %v980_v21 = vadd.f32 %v2422_v50, %v4202_v30  ;;  %v2423_v58 = vpop.f32.mrb[26].mxu0  ;;  %v4299_v49 = vsub.s32 %v4220_v16, %v1286_v32  ;;  %v1362_v32 = vshrl.u32 %v4295_v12, 3 }
 0x130   : > { %v2424_v59 = vpop.f32.mrb[27].mxu0  ;;  %v4302_v50 = vmul.u32.u64.low 3435973837, %v4279_v33  ;;  %v4303_v51 = vmul.u32.u64.high 3435973837, %v4279_v33, %v4302_v50 }
 0x131   : > { %v2485_v60 = vpop.f32.mrb[26].mxu1  ;;  %v2425_v0 = vadd.f32 %v2424_v59, %v2423_v58  ;;  %v4256_v3 = vadd.f32 %v2484_v56, %v980_v21  ;;  %v1340_v56 = vshrl.u32 %v4266_v15, 3  ;;  %v4307_v21 = vadd.s32 64, %v4220_v16 }
 0x132   : > { %v2486_v2 = vpop.f32.mrb[27].mxu1  ;;  %vm1389_vm2 = vcmp.ne.s32.totalorder %v4299_v49, 0  ;;  %vm1399_vm3 = vcmp.lt.s32.totalorder %v4299_v49, 0 }
 0x133   : > { %v2487_v4 = vadd.f32 %v2486_v2, %v2485_v60  ;;  %v985_v7 = vadd.f32 %v2425_v0, %v4205_v36  ;;  %v2426_v30 = vpop.f32.mrb[28].mxu0  ;;  %v4317_v2 = vsub.s32 %v4235_v42, %v1319_v63  ;;  %vm4349_vm6 = vmand %vm1399_vm3, %vm1389_vm2 }
 0x134   : > { %v2427_v9 = vpop.f32.mrb[29].mxu0 }
 0x135   : > { %v2488_v10 = vpop.f32.mrb[28].mxu1  ;;  %v2428_v20 = vadd.f32 %v2427_v9, %v2426_v30  ;;  %v4271_v24 = vadd.f32 %v2487_v4, %v985_v7  ;;  %v1308_v4 = vmul.u32 10, %v1307_v45  ;;  %v1341_v30 = vmul.u32 10, %v1340_v56 }
 0x136   : > { %v2489_v22 = vpop.f32.mrb[29].mxu1  ;;  %vm1392_vm5 = vcmp.ne.s32.totalorder %v4317_v2, 0  ;;  %vm1402_vm7 = vcmp.lt.s32.totalorder %v4317_v2, 0 }
 0x137   : > { %v2490_v36 = vadd.f32 %v2489_v22, %v2488_v10  ;;  %v990_v27 = vadd.f32 %v2428_v20, %v4208_v44  ;;  %v2429_v31 = vpop.f32.mrb[30].mxu0  ;;  %v4290_v44 = vadd.s32 72, %v4220_v16  ;;  %v1419_v22 = vadd.s32 10, %v4299_v49  ;;  %vm4373_vm8 = vmand %vm1402_vm7, %vm1392_vm5 }
 0x138   : > { %v2430_v23 = vpop.f32.mrb[31].mxu0  ;;  %v4325_v9 = vmul.u32.u64.low 3435973837, %v4307_v21  ;;  %v4326_v10 = vmul.u32.u64.high 3435973837, %v4307_v21, %v4325_v9  ;;  %v4342_v19 = vsub.s32 %v4249_v57, %v1308_v4  ;;  %v4357_v35 = vsub.s32 %v4254_v52, %v1341_v30 }
 0x139   : > { %v2491_v26 = vpop.f32.mrb[30].mxu1  ;;  %v2431_v39 = vadd.f32 %v2430_v23, %v2429_v31  ;;  %v4287_v43 = vadd.f32 %v2490_v36, %v990_v27  ;;  %v1351_v23 = vshrl.u32 %v4303_v51, 3  ;;  %v1429_v12 = vsel %vm4349_vm6, %v1419_v22, %v4299_v49 }
 0x13a   : > { %v2492_v40 = vpop.f32.mrb[31].mxu1  ;;  %vm1391_vm9 = vcmp.ne.s32.totalorder %v4342_v19, 0  ;;  %vm1401_vm10 = vcmp.lt.s32.totalorder %v4342_v19, 0  ;;  %vm1394_vm11 = vcmp.ne.s32.totalorder %v4357_v35, 0  ;;  %vm1404_vm12 = vcmp.lt.s32.totalorder %v4357_v35, 0 }
 0x13b   : > { %v2493_v37 = vadd.f32 %v2492_v40, %v2491_v26  ;;  %v995_v28 = vadd.f32 %v2431_v39, %v4211_v53  ;;  %v2432_v48 = vpop.f32.mrb[32].mxu0  ;;  %v4312_v53 = vmul.u32.u64.low 3435973837, %v4290_v44  ;;  %v4313_v62 = vmul.u32.u64.high 3435973837, %v4290_v44, %v4312_v53  ;;  %vm4399_vm14 = vmand %vm1401_vm10, %vm1391_vm9 }
 0x13c   : > { %v2433_v54 = vpop.f32.mrb[33].mxu0  ;;  %v1422_v40 = vadd.s32 10, %v4317_v2  ;;  %v1352_v50 = vmul.u32 10, %v1351_v23  ;;  %v1421_v4 = vadd.s32 10, %v4342_v19  ;;  %vm4406_vm15 = vcmp.lt.s32.totalorder %v1429_v12, 8  ;;  %vm4414_vm0 = vmand %vm1404_vm12, %vm1394_vm11 }
 0x13d   : > { %v2494_v55 = vpop.f32.mrb[32].mxu1  ;;  %v2434_v58 = vadd.f32 %v2433_v54, %v2432_v48  ;;  %v4309_v60 = vadd.f32 %v2493_v37, %v995_v28  ;;  %v1384_v37 = vshrl.u32 %v4313_v62, 3 }
 0x13e   : > { %v2495_v59 = vpop.f32.mrb[33].mxu1 }
 0x13f   : > { %v2496_v0 = vadd.f32 %v2495_v59, %v2494_v55  ;;  %v1000_v5 = vadd.f32 %v2434_v58, %v4214_v61  ;;  %v2435_v1 = vpop.f32.mrb[34].mxu0  ;;  %v1420_v61 = vadd.s32 10, %v4281_v34  ;;  %v1373_v55 = vshrl.u32 %v4326_v10, 3 }
 0x140   : > { %v2436_v16 = vpop.f32.mrb[35].mxu0  ;;  %v1385_v59 = vmul.u32 10, %v1384_v37 }
 0x141   : > { %v2497_v7 = vpop.f32.mrb[34].mxu1  ;;  %v2437_v42 = vadd.f32 %v2436_v16, %v2435_v1  ;;  %v4329_v14 = vadd.f32 %v2496_v0, %v1000_v5  ;;  %v1430_v46 = vsel %vm4335_vm4, %v1420_v61, %v4281_v34  ;;  %v1363_v34 = vmul.u32 10, %v1362_v32 }
 0x142   : > { %v2498_v13 = vpop.f32.mrb[35].mxu1  ;;  %vm4391_vm13 = vcmp.lt.s32.totalorder %v1430_v46, 8  ;;  %v1431_v61 = vsel %vm4399_vm14, %v1421_v4, %v4342_v19 }
 0x143   : > { %v2499_v15 = vadd.f32 %v2498_v13, %v2497_v7  ;;  %v1005_v36 = vadd.f32 %v2437_v42, %v4217_v6  ;;  %v2438_v27 = vpop.f32.mrb[36].mxu0  ;;  %v1330_v6 = vmul.u32 10, %v1329_v8  ;;  %v4419_v30 = vsub.s32 %v4275_v25, %v1363_v34 }
 0x144   : > { %v2439_v26 = vpop.f32.mrb[37].mxu0  ;;  %v4422_v8 = vsub.s32 %v4279_v33, %v1352_v50  ;;  %v1374_v42 = vmul.u32 10, %v1373_v55  ;;  %v4439_v33 = vsub.s32 %v4290_v44, %v1385_v59  ;;  %vm4482_vm11 = vcmp.lt.s32.totalorder %v1431_v61, 8  ;;  %v484_v59 = vld [vmem:[%s4902_s3 + $0x390] sm:$0xff] }
 0x145   : > { %v2500_v57 = vpop.f32.mrb[36].mxu1  ;;  %v2440_v38 = vadd.f32 %v2439_v26, %v2438_v27  ;;  %v4360_v63 = vadd.f32 %v2499_v15, %v1005_v36  ;;  %v4383_v49 = vsub.s32 %v4269_v18, %v1330_v6  ;;  %vm1396_vm4 = vcmp.ne.s32.totalorder %v4419_v30, 0 }
 0x146   : > { %v2501_v39 = vpop.f32.mrb[37].mxu1  ;;  %vm1406_vm5 = vcmp.lt.s32.totalorder %v4419_v30, 0  ;;  %vm1395_vm6 = vcmp.ne.s32.totalorder %v4422_v8, 0  ;;  %v4470_v32 = vsub.s32 %v4307_v21, %v1374_v42  ;;  %vm1398_vm9 = vcmp.ne.s32.totalorder %v4439_v33, 0 }
 0x147   : > { %v2502_v45 = vadd.f32 %v2501_v39, %v2500_v57  ;;  %v1010_v28 = vadd.f32 %v2440_v38, %v4222_v17  ;;  %v2441_v48 = vpop.f32.mrb[38].mxu0  ;;  %v1432_v17 = vsel %vm4373_vm8, %v1422_v40, %v4317_v2  ;;  %v1424_v2 = vadd.s32 10, %v4357_v35  ;;  %vm4490_vm12 = vmand %vm1406_vm5, %vm1396_vm4 }
 0x148   : > { %v2442_v51 = vpop.f32.mrb[39].mxu0  ;;  %vm4427_vm1 = vcmp.lt.s32.totalorder %v1432_v17, 8  ;;  %vm1393_vm2 = vcmp.ne.s32.totalorder %v4383_v49, 0  ;;  %vm1403_vm3 = vcmp.lt.s32.totalorder %v4383_v49, 0  ;;  %vm1405_vm8 = vcmp.lt.s32.totalorder %v4422_v8, 0 }
 0x149   : > { %v2503_v54 = vpop.f32.mrb[38].mxu1  ;;  %v2443_v56 = vadd.f32 %v2442_v51, %v2441_v48  ;;  %v4389_v53 = vadd.f32 %v2502_v45, %v1010_v28  ;;  %v1434_v15 = vsel %vm4414_vm0, %v1424_v2, %v4357_v35  ;;  %vm4464_vm7 = vmand %vm1403_vm3, %vm1393_vm2  ;;  %vm1408_vm10 = vcmp.lt.s32.totalorder %v4439_v33, 0  ;;  %v470_v28 = vld [vmem:[%s4902_s3 + $0x320] sm:$0xff] }
 0x14a   : > { %v2504_v58 = vpop.f32.mrb[39].mxu1  ;;  %vm4503_vm14 = vmand %vm1405_vm8, %vm1395_vm6  ;;  %v1425_v40 = vadd.s32 10, %v4422_v8  ;;  %v1428_v37 = vadd.s32 10, %v4439_v33  ;;  %vm4516_vm0 = vcmp.lt.s32.totalorder %v1434_v15, 8  ;;  %vm1397_vm3 = vcmp.ne.s32.totalorder %v4470_v32, 0 }
 0x14b   : > { %v2505_v62 = vadd.f32 %v2504_v58, %v2503_v54  ;;  %v1015_v5 = vadd.f32 %v2443_v56, %v4226_v29  ;;  %v2840_v1 = vpop.f32.mrb[40].mxu0  ;;  %vm4524_vm2 = vmand %vm1408_vm10, %vm1398_vm9  ;;  %vm1407_vm4 = vcmp.lt.s32.totalorder %v4470_v32, 0  ;;  %v467_v54 = vld [vmem:[%s4902_s3 + $0x308] sm:$0xff]  ;;  %v1427_v17 = vadd.s32 10, %v4470_v32 }
 0x14c   : > { %v4425_v29 = vadd.f32 %v2840_v1, %v4242_v47  ;;  %v1199_v9 = vpop.f32.mrb[41].mxu0  ;;  %v1435_v56 = vsel %vm4503_vm14, %v1425_v40, %v4422_v8  ;;  %v1438_v58 = vsel %vm4524_vm2, %v1428_v37, %v4439_v33  ;;  %vm1278_vm6 = vcmp.lt.s32.totalorder %v4290_v44, 78 }
 0x14d   : > { %v4433_v13 = vadd.f32 %v1199_v9, %v4232_v41  ;;  %v4436_v25 = vadd.f32 %v2505_v62, %v1015_v5  ;;  %v1423_v41 = vadd.s32 10, %v4383_v49  ;;  %v485_v62 = vld [vmem:[%s4902_s3 + $0x398] sm:$0xff]  ;;  %v1519_v5 = vld [vmem:[#allocation2 + $0x2] sm:$0xff]  ;;  %vm4593_vm9 = vcmp.lt.s32.totalorder %v1435_v56, 8 }
 0x14e   : > { %v1249_v47 = vmax.f32 %v4425_v29, 0.0  ;;  %vm4597_vm10 = vcmp.lt.s32.totalorder %v1438_v58, 8 }
 0x14f   : > { %v1248_v20 = vmax.f32 %v4433_v13, 0.0  ;;  %v2843_v22 = vpop.f32.mrb[42].mxu0  ;;  %v1433_v38 = vsel %vm4464_vm7, %v1423_v41, %v4383_v49  ;;  %vm4577_vm7 = vmand %vm1407_vm4, %vm1397_vm3 }
 0x150   : > { %v1480_v19 = vsel %vm4391_vm13, %v1249_v47, 0.0  ;;  %v4458_v36 = vadd.f32 %v2843_v22, %v4271_v24  ;;  %v1209_v27 = vpop.f32.mrb[43].mxu0  ;;  %vm4538_vm5 = vcmp.lt.s32.totalorder %v1433_v38, 8  ;;  %v3160_v22 = vpack.c.bf16 %v485_v62, %v484_v59  ;;  %v487_v38 = vld [vmem:[%s4902_s3 + $0x3a8] sm:$0xff] }
 0x151   : > { %1490 = vst [vmem:[#allocation2 + $0x13] sm:$0xff] %v1480_v19  ;;  %v1479_v24 = vsel %vm4406_vm15, %v1248_v20, 0.0  ;;  %v4477_v23 = vadd.f32 %v1209_v27, %v4256_v3  ;;  %v1426_v3 = vadd.s32 10, %v4419_v30  ;;  %v469_v19 = vld [vmem:[%s4902_s3 + $0x318] sm:$0xff]  ;;  %v486_v27 = vld [vmem:[%s4902_s3 + $0x3a0] sm:$0xff]  ;;  %v1437_v21 = vsel %vm4577_vm7, %v1427_v17, %v4470_v32 }
 0x152   : > { %1489 = vst [vmem:[#allocation2 + $0xb] sm:$0xff] %v1479_v24  ;;  %v1251_v26 = vmax.f32 %v4458_v36, 0.0  ;;  %vm4643_vm14 = vcmp.lt.s32.totalorder %v1437_v21, 8  ;;  %v489_v17 = vld [vmem:[%s4902_s3 + $0x3b8] sm:$0xff] }
 0x153   : > { %v1250_v35 = vmax.f32 %v4477_v23, 0.0  ;;  %v2846_v6 = vpop.f32.mrb[44].mxu0  ;;  %v1436_v51 = vsel %vm4490_vm12, %v1426_v3, %v4419_v30  ;;  %vm4632_vm12 = vmand %vm1278_vm6, %vm4597_vm10 }
 0x154   : > { %v1482_v45 = vsel %vm4427_vm1, %v1251_v26, 0.0  ;;  %v4514_v46 = vadd.f32 %v2846_v6, %v4309_v60  ;;  %v1219_v52 = vpop.f32.mrb[45].mxu0  ;;  %vm4585_vm8 = vcmp.lt.s32.totalorder %v1436_v51, 8 }
 0x155   : > { %1492 = vst [vmem:[#allocation2 + $0x23] sm:$0xff] %v1482_v45  ;;  %v1481_v60 = vsel %vm4482_vm11, %v1250_v35, 0.0  ;;  %v4533_v48 = vadd.f32 %v1219_v52, %v4287_v43  ;;  %v466_v43 = vld [vmem:[%s4902_s3 + $0x300] sm:$0xff] }
 0x156   : > { %1491 = vst [vmem:[#allocation2 + $0x1b] sm:$0xff] %v1481_v60  ;;  %v1253_v34 = vmax.f32 %v4514_v46, 0.0  ;;  %v3158_v33 = vpack.c.bf16 %v467_v54, %v466_v43  ;;  %v3164_v43 = vpack.c.bf16 %v487_v38, %v486_v27  ;;  %v488_v54 = vld [vmem:[%s4902_s3 + $0x3b0] sm:$0xff]  ;;  %v475_v27 = vld [vmem:[%s4902_s3 + $0x348] sm:$0xff] }
 0x157   : > { %v1252_v49 = vmax.f32 %v4533_v48, 0.0  ;;  %v2849_v55 = vpop.f32.mrb[46].mxu0  ;;  %v3168_v1 = vpack.c.bf16 %v489_v17, %v488_v54 }
 0x158   : > { %v1484_v18 = vsel %vm4516_vm0, %v1253_v34, 0.0  ;;  %v4570_v4 = vadd.f32 %v2849_v55, %v4360_v63  ;;  %v1229_v2 = vpop.f32.mrb[47].mxu0 }
 0x159   : > { %1494 = vst [vmem:[#allocation2 + $0x33] sm:$0xff] %v1484_v18  ;;  %v1483_v7 = vsel %vm4538_vm5, %v1252_v49, 0.0  ;;  %v4590_v30 = vadd.f32 %v1229_v2, %v4329_v14  ;;  %v1510_v8 = vld [vmem:[#allocation2 + $0x9] sm:$0xff]  ;;  %v1511_v3 = vld [vmem:[#allocation2 + $0x11] sm:$0xff] }
 0x15a   : > { %v1520_v9 = vld [vmem:[#allocation2 + $0xa] sm:$0xff]  ;;  %1493 = vst [vmem:[#allocation2 + $0x2b] sm:$0xff] %v1483_v7  ;;  %v1255_v61 = vmax.f32 %v4570_v4, 0.0  ;;  %1646 = vmatprep.mubr.f32.mxu1 %v1510_v8  ;;  %v1521_v6 = vld [vmem:[#allocation2 + $0x12] sm:$0xff]  ;;  %v490_v8 = vld [vmem:[%s4902_s3 + $0x3c0] sm:$0xff] }
 0x15b   : > { %v1500_v42 = vld [vmem:[#allocation2 + $0x8] sm:$0xff]  ;;  %1756 = vmatprep.mubr.f32.mxu0 %v1520_v9  ;;  %v468_v14 = vld [vmem:[%s4902_s3 + $0x310] sm:$0xff]  ;;  %v1254_v31 = vmax.f32 %v4590_v30, 0.0  ;;  %v2852_v24 = vpop.f32.mrb[48].mxu0  ;;  %v473_v7 = vld [vmem:[%s4902_s3 + $0x338] sm:$0xff] }
 0x15c   : > { %1647 = vmatmul.mubr.f32.gmra.mrb[42].mxu1 %v1500_v42  ;;  %1757 = vmatmul.mubr.f32.vlgmr.msra.gmra.mrb[50].mxu0 %v1519_v5  ;;  %v1486_v39 = vsel %vm4585_vm8, %v1255_v61, 0.0  ;;  %v4622_v40 = vadd.f32 %v2852_v24, %v4436_v25  ;;  %v1239_v37 = vpop.f32.mrb[49].mxu0  ;;  %v3162_v52 = vpack.c.bf16 %v469_v19, %v468_v14  ;;  %v1501_v44 = vld [vmem:[#allocation2 + $0x10] sm:$0xff]  ;;  %v1560_v4 = vld [vmem:[#allocation2 + $0x5d] sm:$0xff] }
 0x15d   : > { %1651 = vmatprep.mubr.f32.mxu1 %v1511_v3  ;;  %1761 = vmatprep.mubr.f32.mxu0 %v1521_v6  ;;  %1496 = vst [vmem:[#allocation2 + $0x43] sm:$0xff] %v1486_v39  ;;  %v1485_v32 = vsel %vm4593_vm9, %v1254_v31, 0.0  ;;  %v4637_v25 = vadd.f32 %v1239_v37, %v4389_v53  ;;  %v471_v53 = vld [vmem:[%s4902_s3 + $0x328] sm:$0xff]  ;;  %v1512_v56 = vld [vmem:[#allocation2 + $0x19] sm:$0xff]  ;;  %v472_v2 = vld [vmem:[%s4902_s3 + $0x330] sm:$0xff] }
 0x15e   : > { %3159 = vmatpush3.bf16.msra.mxu0 %v3158_v33  ;;  %1495 = vst [vmem:[#allocation2 + $0x3b] sm:$0xff] %v1485_v32  ;;  %v1257_v60 = vmax.f32 %v4622_v40, 0.0  ;;  %v1522_v58 = vld [vmem:[#allocation2 + $0x1a] sm:$0xff]  ;;  %v3166_v18 = vpack.c.bf16 %v471_v53, %v470_v28  ;;  %v1523_v42 = vld [vmem:[#allocation2 + $0x22] sm:$0xff]  ;;  %v3170_v41 = vpack.c.bf16 %v473_v7, %v472_v2  ;;  %v492_v24 = vld [vmem:[%s4902_s3 + $0x3d0] sm:$0xff] }
 0x15f   : > { %3161 = vmatprep.subr.bf16.mxu0 %v3160_v22  ;;  %v1256_v55 = vmax.f32 %v4637_v25, 0.0  ;;  %v1502_v5 = vld [vmem:[#allocation2 + $0x18] sm:$0xff]  ;;  %v491_v33 = vld [vmem:[%s4902_s3 + $0x3c8] sm:$0xff]  ;;  %v474_v22 = vld [vmem:[%s4902_s3 + $0x340] sm:$0xff] }
 0x160   : > { %1652 = vmatmul.mubr.f32.gmra.mrb[44].mxu1 %v1501_v44  ;;  %1762 = vmatmul.mubr.f32.gmra.mrb[52].mxu0 %v1520_v9  ;;  %v1488_v59 = vsel %vm4632_vm12, %v1257_v60, 0.0  ;;  %v1513_v9 = vld [vmem:[#allocation2 + $0x21] sm:$0xff]  ;;  %v3172_v19 = vpack.c.bf16 %v491_v33, %v490_v8  ;;  %v3174_v38 = vpack.c.bf16 %v475_v27, %v474_v22  ;;  %v476_v39 = vld [vmem:[%s4902_s3 + $0x350] sm:$0xff] }
 0x161   : > { %1656 = vmatprep.mubr.f32.mxu1 %v1512_v56  ;;  %1766 = vmatprep.mubr.f32.mxu0 %v1522_v58  ;;  %1498 = vst [vmem:[#allocation2 + $0x53] sm:$0xff] %v1488_v59  ;;  %v1487_v62 = vsel %vm4643_vm14, %v1256_v55, 0.0  ;;  %v1503_v14 = vld [vmem:[#allocation2 + $0x20] sm:$0xff]  ;;  %v1514_v21 = vld [vmem:[#allocation2 + $0x29] sm:$0xff]  ;;  %v1515_v44 = vld [vmem:[#allocation2 + $0x31] sm:$0xff] }
 0x162   : > { %3163 = vmatpush3.bf16.msra.mxu0 %v3162_v52  ;;  %1497 = vst [vmem:[#allocation2 + $0x4b] sm:$0xff] %v1487_v62  ;;  %v1524_v3 = vld [vmem:[#allocation2 + $0x2a] sm:$0xff]  ;;  %v477_v52 = vld [vmem:[%s4902_s3 + $0x358] sm:$0xff]  ;;  %v494_v28 = vld [vmem:[%s4902_s3 + $0x3e0] sm:$0xff] }
 0x163   : > { %3165 = vmatprep.subr.bf16.mxu0 %v3164_v43  ;;  %v1504_v37 = vld [vmem:[#allocation2 + $0x28] sm:$0xff]  ;;  %v1525_v43 = vld [vmem:[#allocation2 + $0x32] sm:$0xff]  ;;  %v3178_v54 = vpack.c.bf16 %v477_v52, %v476_v39  ;;  %v478_v56 = vld [vmem:[%s4902_s3 + $0x360] sm:$0xff] }
 0x164   : > { %1657 = vmatmul.mubr.f32.gmra.mrb[46].mxu1 %v1502_v5  ;;  %1767 = vmatmul.mubr.f32.gmra.mrb[54].mxu0 %v1521_v6  ;;  %v493_v6 = vld [vmem:[%s4902_s3 + $0x3d8] sm:$0xff]  ;;  %v495_v53 = vld [vmem:[%s4902_s3 + $0x3e8] sm:$0xff]  ;;  %v496_v62 = vld [vmem:[%s4902_s3 + $0x3f0] sm:$0xff] }
 0x165   : > { %1661 = vmatprep.mubr.f32.mxu1 %v1513_v9  ;;  %1771 = vmatprep.mubr.f32.mxu0 %v1523_v42  ;;  %v3176_v32 = vpack.c.bf16 %v493_v6, %v492_v24  ;;  %v3180_v17 = vpack.c.bf16 %v495_v53, %v494_v28  ;;  %v479_v59 = vld [vmem:[%s4902_s3 + $0x368] sm:$0xff]  ;;  %v1526_v2 = vld [vmem:[#allocation2 + $0x3a] sm:$0xff]  ;;  %v480_v9 = vld [vmem:[%s4902_s3 + $0x370] sm:$0xff] }
 0x166   : > { %3167 = vmatpush3.bf16.msra.mxu0 %v3166_v18  ;;  %v1516_v18 = vld [vmem:[#allocation2 + $0x39] sm:$0xff]  ;;  %v1517_v33 = vld [vmem:[#allocation2 + $0x41] sm:$0xff]  ;;  %v1540_v6 = vld [vmem:[#allocation2 + $0xc] sm:$0xff] }
 0x167   : > { %3169 = vmatprep.subr.bf16.mxu0 %v3168_v1  ;;  %v497_v5 = vld [vmem:[%s4902_s3 + $0x3f8] sm:$0xff]  ;;  %v3182_v1 = vpack.c.bf16 %v479_v59, %v478_v56  ;;  %v503_v28 = vld [vmem:[%s4902_s3 + $0x428] sm:$0xff] }
 0x168   : > { %1662 = vmatmul.mubr.f32.gmra.mrb[48].mxu1 %v1503_v14  ;;  %1772 = vmatmul.mubr.f32.gmra.mrb[56].mxu0 %v1522_v58  ;;  %v1505_v58 = vld [vmem:[#allocation2 + $0x30] sm:$0xff]  ;;  %v1506_v7 = vld [vmem:[#allocation2 + $0x38] sm:$0xff]  ;;  %v3184_v8 = vpack.c.bf16 %v497_v5, %v496_v62  ;;  %v1507_v14 = vld [vmem:[#allocation2 + $0x40] sm:$0xff] }
 0x169   : > { %1666 = vmatprep.mubr.f32.mxu1 %v1514_v21  ;;  %1776 = vmatprep.mubr.f32.mxu0 %v1524_v3  ;;  %v1528_v27 = vld [vmem:[#allocation2 + $0x4a] sm:$0xff]  ;;  %v1551_v52 = vld [vmem:[#allocation2 + $0x15] sm:$0xff]  ;;  %v1562_v25 = vld [vmem:[#allocation2 + $0x1e] sm:$0xff] }
 0x16a   : > { %3171 = vmatpush3.bf16.msra.mxu0 %v3170_v41  ;;  %v1527_v41 = vld [vmem:[#allocation2 + $0x42] sm:$0xff]  ;;  %v500_v21 = vld [vmem:[%s4902_s3 + $0x410] sm:$0xff]  ;;  %v505_v53 = vld [vmem:[%s4902_s3 + $0x438] sm:$0xff] }
 0x16b   : > { %3173 = vmatprep.subr.bf16.mxu0 %v3172_v19  ;;  %v1518_v19 = vld [vmem:[#allocation2 + $0x49] sm:$0xff]  ;;  %v1542_v13 = vld [vmem:[#allocation2 + $0x1c] sm:$0xff]  ;;  %v1545_v36 = vld [vmem:[#allocation2 + $0x34] sm:$0xff] }
 0x16c   : > { %1667 = vmatmul.mubr.f32.gmra.mrb[50].mxu1 %v1504_v37  ;;  %1777 = vmatmul.mubr.f32.gmra.mrb[58].mxu0 %v1523_v42  ;;  %v481_v42 = vld [vmem:[%s4902_s3 + $0x378] sm:$0xff]  ;;  %v1508_v24 = vld [vmem:[#allocation2 + $0x48] sm:$0xff]  ;;  %v502_v37 = vld [vmem:[%s4902_s3 + $0x420] sm:$0xff] }
 0x16d   : > { %1671 = vmatprep.mubr.f32.mxu1 %v1515_v44  ;;  %1781 = vmatprep.mubr.f32.mxu0 %v1525_v43  ;;  %v3186_v22 = vpack.c.bf16 %v481_v42, %v480_v9  ;;  %v3196_v44 = vpack.c.bf16 %v503_v28, %v502_v37  ;;  %v1543_v29 = vld [vmem:[#allocation2 + $0x24] sm:$0xff]  ;;  %v1544_v23 = vld [vmem:[#allocation2 + $0x2c] sm:$0xff]  ;;  %v509_v59 = vld [vmem:[%s4902_s3 + $0x458] sm:$0xff] }
 0x16e   : > { %3175 = vmatpush3.bf16.msra.mxu0 %v3174_v38  ;;  %v501_v38 = vld [vmem:[%s4902_s3 + $0x418] sm:$0xff]  ;;  %v507_v56 = vld [vmem:[%s4902_s3 + $0x448] sm:$0xff] }
 0x16f   : > { %3177 = vmatprep.subr.bf16.mxu0 %v3176_v32  ;;  %v3192_v39 = vpack.c.bf16 %v501_v38, %v500_v21  ;;  %v1541_v32 = vld [vmem:[#allocation2 + $0x14] sm:$0xff]  ;;  %v1546_v48 = vld [vmem:[#allocation2 + $0x3c] sm:$0xff]  ;;  %v1547_v46 = vld [vmem:[#allocation2 + $0x44] sm:$0xff] }
 0x170   : > { %1672 = vmatmul.mubr.f32.gmra.mrb[52].mxu1 %v1505_v58  ;;  %1782 = vmatmul.mubr.f32.gmra.mrb[60].mxu0 %v1524_v3  ;;  %v1529_v3 = vld [vmem:[#allocation2 + $0x52] sm:$0xff]  ;;  %v1566_v40 = vld [vmem:[#allocation2 + $0x3e] sm:$0xff] }
 0x171   : > { %1676 = vmatprep.mubr.f32.mxu1 %v1516_v18  ;;  %1786 = vmatprep.mubr.f32.mxu0 %v1526_v2  ;;  %v510_v18 = vld [vmem:[%s4902_s3 + $0x460] sm:$0xff]  ;;  %v1548_v9 = vld [vmem:[#allocation2 + $0x4c] sm:$0xff]  ;;  %v1549_v30 = vld [vmem:[#allocation2 + $0x54] sm:$0xff] }
 0x172   : > { %3179 = vmatpush3.bf16.msra.mxu0 %v3178_v54  ;;  %v506_v54 = vld [vmem:[%s4902_s3 + $0x440] sm:$0xff]  ;;  %v1558_v42 = vld [vmem:[#allocation2 + $0x4d] sm:$0xff]  ;;  %v1569_v21 = vld [vmem:[#allocation2 + $0x56] sm:$0xff] }
 0x173   : > { %3181 = vmatprep.subr.bf16.mxu0 %v3180_v17  ;;  %v3204_v58 = vpack.c.bf16 %v507_v56, %v506_v54  ;;  %v508_v17 = vld [vmem:[%s4902_s3 + $0x450] sm:$0xff] }
 0x174   : > { %1677 = vmatmul.mubr.f32.gmra.mrb[54].mxu1 %v1506_v7  ;;  %1787 = vmatmul.mubr.f32.gmra.mrb[62].mxu0 %v1525_v43  ;;  %v504_v43 = vld [vmem:[%s4902_s3 + $0x430] sm:$0xff]  ;;  %v3208_v62 = vpack.c.bf16 %v509_v59, %v508_v17  ;;  %v513_v7 = vld [vmem:[%s4902_s3 + $0x478] sm:$0xff] }
 0x175   : > { %1681 = vmatprep.mubr.f32.mxu1 %v1517_v33  ;;  %1791 = vmatprep.mubr.f32.mxu0 %v1527_v41  ;;  %v1550_v33 = vld [vmem:[#allocation2 + $0x5c] sm:$0xff] }
 0x176   : > { %3183 = vmatpush3.bf16.msra.mxu0 %v3182_v1  ;;  %v512_v1 = vld [vmem:[%s4902_s3 + $0x470] sm:$0xff] }
 0x177   : > { %3185 = vmatprep.subr.bf16.mxu0 %v3184_v8  ;;  %v3216_v8 = vpack.c.bf16 %v513_v7, %v512_v1 }
 0x178   : > { %1682 = vmatmul.mubr.f32.gmra.mrb[56].mxu1 %v1507_v14  ;;  %1792 = vmatmul.mubr.f32.gmra.mrb[64].mxu0 %v1526_v2  ;;  %v511_v2 = vld [vmem:[%s4902_s3 + $0x468] sm:$0xff] }
 0x179   : > { %1686 = vmatprep.mubr.f32.mxu1 %v1518_v19  ;;  %1796 = vmatprep.mubr.f32.mxu0 %v1528_v27  ;;  %v3212_v5 = vpack.c.bf16 %v511_v2, %v510_v18  ;;  %v1565_v19 = vld [vmem:[#allocation2 + $0x36] sm:$0xff] }
 0x17a   : > { %3187 = vmatpush3.bf16.msra.mxu0 %v3186_v22  ;;  %v1564_v22 = vld [vmem:[#allocation2 + $0x2e] sm:$0xff] }
 0x17c   : > { %1687 = vmatmul.mubr.f32.gmra.mrb[58].mxu1 %v1508_v24  ;;  %1797 = vmatmul.mubr.f32.gmra.mrb[66].mxu0 %v1527_v41  ;;  %v2564_v41 = vpop.f32.mrb[40].mxu1  ;;  %v1568_v24 = vld [vmem:[#allocation2 + $0x4e] sm:$0xff] }
 0x17d   : > { %1801 = vmatprep.mubr.f32.mxu0 %v1529_v3  ;;  %1871 = vmatprep.mubr.f32.mxu1 %v1540_v6  ;;  %v2565_v14 = vpop.f32.mrb[41].mxu1  ;;  %v1570_v3 = vld [vmem:[#allocation2 + $0x5e] sm:$0xff] }
 0x17e   : > { %v4805_v6 = vld [vmem:[%s4903_s4] ss:$0 sm:$0xff] }
 0x180   : > { %1802 = vmatmul.mubr.f32.gmra.mrb[68].mxu0 %v1528_v27  ;;  %3251 = vmatmul.mubr.msk.f32.vlgmr.msra.gmra.mrb[60].mxu1 %vm4406_vm15, %v1248_v20  ;;  %v1552_v20 = vld [vmem:[#allocation2 + $0x1d] sm:$0xff]  ;;  %v2566_v27 = vadd.f32 %v2565_v14, %v2564_v41 }
 0x181   : > { %1876 = vmatprep.mubr.f32.mxu1 %v1541_v32  ;;  %1986 = vmatprep.mubr.f32.mxu0 %v1551_v52 }
 0x182   : > { %3191 = vmatpush3.bf16.msra.mxu1 %v4193_v11  ;;  %v3200_v11 = vpack.c.bf16 %v505_v53, %v504_v43  ;;  %v1644_v52 = vadd.f32 %v2566_v27, %v4805_v6 }
 0x183   : > { %3193 = vmatprep.subr.bf16.mxu1 %v3192_v39 }
 0x184   : > { %3252 = vmatmul.mubr.msk.f32.gmra.mrb[62].mxu1 %vm4391_vm13, %v1249_v47  ;;  %1987 = vmatmul.mubr.f32.vlgmr.msra.gmra.mrb[70].mxu0 %v1541_v32  ;;  %v1553_v47 = vld [vmem:[#allocation2 + $0x25] sm:$0xff] }
 0x185   : > { %1881 = vmatprep.mubr.f32.mxu1 %v1542_v13  ;;  %1991 = vmatprep.mubr.f32.mxu0 %v1552_v20 }
 0x186   : > { %3195 = vmatpush3.bf16.msra.mxu1 %v3192_v39 }
 0x187   : > { %3197 = vmatprep.subr.bf16.mxu1 %v3196_v44 }
 0x188   : > { %3253 = vmatmul.mubr.msk.f32.gmra.mrb[64].mxu1 %vm4482_vm11, %v1250_v35  ;;  %1992 = vmatmul.mubr.f32.gmra.mrb[72].mxu0 %v1542_v13  ;;  %v1554_v35 = vld [vmem:[#allocation2 + $0x2d] sm:$0xff] }
 0x189   : > { %1886 = vmatprep.mubr.f32.mxu1 %v1543_v29  ;;  %1996 = vmatprep.mubr.f32.mxu0 %v1553_v47 }
 0x18a   : > { %3199 = vmatpush3.bf16.msra.mxu1 %v3196_v44 }
 0x18b   : > { %3201 = vmatprep.subr.bf16.mxu1 %v3200_v11 }
 0x18c   : > { %3254 = vmatmul.mubr.msk.f32.gmra.mrb[66].mxu1 %vm4427_vm1, %v1251_v26  ;;  %1997 = vmatmul.mubr.f32.gmra.mrb[74].mxu0 %v1543_v29  ;;  %v1555_v26 = vld [vmem:[#allocation2 + $0x35] sm:$0xff] }
 0x18d   : > { %1891 = vmatprep.mubr.f32.mxu1 %v1544_v23  ;;  %2001 = vmatprep.mubr.f32.mxu0 %v1554_v35 }
 0x18e   : > { %3203 = vmatpush3.bf16.msra.mxu1 %v3200_v11 }
 0x18f   : > { %3205 = vmatprep.subr.bf16.mxu1 %v3204_v58 }
 0x190   : > { %3255 = vmatmul.mubr.msk.f32.gmra.mrb[68].mxu1 %vm4538_vm5, %v1252_v49  ;;  %2002 = vmatmul.mubr.f32.gmra.mrb[76].mxu0 %v1544_v23  ;;  %v1556_v49 = vld [vmem:[#allocation2 + $0x3d] sm:$0xff] }
 0x191   : > { %1896 = vmatprep.mubr.f32.mxu1 %v1545_v36  ;;  %2006 = vmatprep.mubr.f32.mxu0 %v1555_v26 }
 0x192   : > { %3207 = vmatpush3.bf16.msra.mxu1 %v3204_v58 }
 0x193   : > { %3209 = vmatprep.subr.bf16.mxu1 %v3208_v62 }
 0x194   : > { %3256 = vmatmul.mubr.msk.f32.gmra.mrb[70].mxu1 %vm4516_vm0, %v1253_v34  ;;  %2007 = vmatmul.mubr.f32.gmra.mrb[78].mxu0 %v1545_v36  ;;  %v1557_v34 = vld [vmem:[#allocation2 + $0x45] sm:$0xff] }
 0x195   : > { %1901 = vmatprep.mubr.f32.mxu1 %v1546_v48  ;;  %2011 = vmatprep.mubr.f32.mxu0 %v1556_v49 }
 0x196   : > { %3211 = vmatpush3.bf16.msra.mxu1 %v3208_v62 }
 0x197   : > { %3213 = vmatprep.subr.bf16.mxu1 %v3212_v5 }
 0x198   : > { %3257 = vmatmul.mubr.msk.f32.gmra.mrb[72].mxu1 %vm4593_vm9, %v1254_v31  ;;  %2012 = vmatmul.mubr.f32.gmra.mrb[80].mxu0 %v1546_v48  ;;  %v1559_v31 = vld [vmem:[#allocation2 + $0x55] sm:$0xff] }
 0x199   : > { %1906 = vmatprep.mubr.f32.mxu1 %v1547_v46  ;;  %2016 = vmatprep.mubr.f32.mxu0 %v1557_v34 }
 0x19a   : > { %3215 = vmatpush3.bf16.msra.mxu1 %v3212_v5 }
 0x19b   : > { %3217 = vmatprep.subr.bf16.mxu1 %v3216_v8 }
 0x19c   : > { %3258 = vmatmul.mubr.msk.f32.gmra.mrb[74].mxu1 %vm4585_vm8, %v1255_v61  ;;  %2017 = vmatmul.mubr.f32.gmra.mrb[82].mxu0 %v1547_v46  ;;  %v1561_v61 = vld [vmem:[#allocation2 + $0x16] sm:$0xff] }
 0x19d   : > { %1911 = vmatprep.mubr.f32.mxu1 %v1548_v9  ;;  %2021 = vmatprep.mubr.f32.mxu0 %v1558_v42 }
 0x19e   : > { %3219 = vmatpush3.bf16.msra.mxu1 %v3216_v8 }
 0x1a0   : > { %3259 = vmatmul.mubr.msk.f32.gmra.mrb[76].mxu1 %vm4643_vm14, %v1256_v55  ;;  %2022 = vmatmul.mubr.f32.gmra.mrb[84].mxu0 %v1548_v9  ;;  %v1563_v55 = vld [vmem:[#allocation2 + $0x26] sm:$0xff] }
 0x1a1   : > { %1916 = vmatprep.mubr.f32.mxu1 %v1549_v30  ;;  %2026 = vmatprep.mubr.f32.mxu0 %v1559_v31 }
 0x1a4   : > { %3260 = vmatmul.mubr.msk.f32.gmra.mrb[78].mxu1 %vm4632_vm12, %v1257_v60  ;;  %2027 = vmatmul.mubr.f32.gmra.mrb[86].mxu0 %v1549_v30  ;;  %v1567_v60 = vld [vmem:[#allocation2 + $0x46] sm:$0xff] }
 0x1a5   : > { %2885 = vmatprep.mubr.f32.mxu1 %v1561_v61  ;;  %2031 = vmatprep.mubr.f32.mxu0 %v1560_v4 }
 0x1a8   : > { %2032 = vmatmul.mubr.f32.gmra.mrb[88].mxu0 %v1550_v33  ;;  %2886 = vmatmul.mubr.f32.vlgmr.msra.gmra.mrb[80].mxu1 %v1562_v25 }
 0x1a9   : > { %2888 = vmatprep.mubr.f32.mxu1 %v1563_v55 }
 0x1ac   : > { %2889 = vmatmul.mubr.f32.gmra.mrb[82].mxu1 %v1564_v22 }
 0x1ad   : > { %2891 = vmatprep.mubr.f32.mxu1 %v1565_v19 }
 0x1b0   : > { %2892 = vmatmul.mubr.f32.gmra.mrb[84].mxu1 %v1566_v40 }
 0x1b1   : > { %2894 = vmatprep.mubr.f32.mxu1 %v1567_v60 }
 0x1b4   : > { %2895 = vmatmul.mubr.f32.gmra.mrb[86].mxu1 %v1568_v24 }
 0x1b5   : > { %2897 = vmatprep.mubr.f32.mxu1 %v1569_v21 }
 0x1b8   : > { %2898 = vmatmul.mubr.f32.gmra.mrb[88].mxu1 %v1570_v3 }
 0x22f   : > { %v2567_v38 = vpop.f32.mrb[42].mxu1  ;;  %v2626_v39 = vpop.f32.mrb[50].mxu0 }
 0x230   : > { %v2568_v37 = vpop.f32.mrb[43].mxu1  ;;  %v2627_v32 = vpop.f32.mrb[51].mxu0 }
 0x231   : > { %v2569_v28 = vadd.f32 %v2568_v37, %v2567_v38  ;;  %v2628_v44 = vadd.f32 %v2627_v32, %v2626_v39 }
 0x233   : > { %v4808_v43 = vadd.f32 %v2628_v44, %v1644_v52  ;;  %v2570_v13 = vpop.f32.mrb[44].mxu1  ;;  %v2629_v20 = vpop.f32.mrb[52].mxu0  ;;  %v1649_v54 = vadd.f32 %v2569_v28, %v4805_v6 }
 0x234   : > { %v2571_v53 = vpop.f32.mrb[45].mxu1  ;;  %v2630_v11 = vpop.f32.mrb[53].mxu0 }
 0x235   : > { %v2572_v29 = vadd.f32 %v2571_v53, %v2570_v13  ;;  %v2631_v47 = vadd.f32 %v2630_v11, %v2629_v20 }
 0x237   : > { %v4811_v56 = vadd.f32 %v2631_v47, %v1649_v54  ;;  %v2573_v58 = vpop.f32.mrb[46].mxu1  ;;  %v2632_v17 = vpop.f32.mrb[54].mxu0  ;;  %v1654_v59 = vadd.f32 %v2572_v29, %v4805_v6 }
 0x238   : > { %v2574_v23 = vpop.f32.mrb[47].mxu1  ;;  %v2633_v35 = vpop.f32.mrb[55].mxu0 }
 0x239   : > { %v2575_v62 = vadd.f32 %v2574_v23, %v2573_v58  ;;  %v2634_v18 = vadd.f32 %v2633_v35, %v2632_v17 }
 0x23b   : > { %v4814_v36 = vadd.f32 %v2634_v18, %v1654_v59  ;;  %v2576_v26 = vpop.f32.mrb[48].mxu1  ;;  %v2635_v2 = vpop.f32.mrb[56].mxu0  ;;  %v1659_v48 = vadd.f32 %v2575_v62, %v4805_v6 }
 0x23c   : > { %v2577_v5 = vpop.f32.mrb[49].mxu1  ;;  %v2636_v1 = vpop.f32.mrb[57].mxu0 }
 0x23d   : > { %v2578_v49 = vadd.f32 %v2577_v5, %v2576_v26  ;;  %v2637_v7 = vadd.f32 %v2636_v1, %v2635_v2 }
 0x23f   : > { %v4817_v8 = vadd.f32 %v2637_v7, %v1659_v48  ;;  %v2579_v46 = vpop.f32.mrb[50].mxu1  ;;  %v2638_v34 = vpop.f32.mrb[58].mxu0  ;;  %v1664_v30 = vadd.f32 %v2578_v49, %v4805_v6 }
 0x240   : > { %v2580_v9 = vpop.f32.mrb[51].mxu1  ;;  %v2639_v42 = vpop.f32.mrb[59].mxu0 }
 0x241   : > { %v2581_v31 = vadd.f32 %v2580_v9, %v2579_v46  ;;  %v2640_v4 = vadd.f32 %v2639_v42, %v2638_v34 }
 0x243   : > { %v4820_v61 = vadd.f32 %v2640_v4, %v1664_v30  ;;  %v2582_v33 = vpop.f32.mrb[52].mxu1  ;;  %v2641_v25 = vpop.f32.mrb[60].mxu0  ;;  %v1669_v22 = vadd.f32 %v2581_v31, %v4805_v6 }
 0x244   : > { %v2583_v55 = vpop.f32.mrb[53].mxu1  ;;  %v2642_v41 = vpop.f32.mrb[61].mxu0 }
 0x245   : > { %v2584_v14 = vadd.f32 %v2583_v55, %v2582_v33  ;;  %v2643_v19 = vadd.f32 %v2642_v41, %v2641_v25 }
 0x247   : > { %v4823_v27 = vadd.f32 %v2643_v19, %v1669_v22  ;;  %v2585_v40 = vpop.f32.mrb[54].mxu1  ;;  %v2644_v60 = vpop.f32.mrb[62].mxu0  ;;  %v1674_v3 = vadd.f32 %v2584_v14, %v4805_v6 }
 0x248   : > { %v2586_v24 = vpop.f32.mrb[55].mxu1  ;;  %v2645_v21 = vpop.f32.mrb[63].mxu0 }
 0x249   : > { %v2587_v38 = vadd.f32 %v2586_v24, %v2585_v40  ;;  %v2646_v39 = vadd.f32 %v2645_v21, %v2644_v60 }
 0x24b   : > { %v4826_v37 = vadd.f32 %v2646_v39, %v1674_v3  ;;  %v2588_v32 = vpop.f32.mrb[56].mxu1  ;;  %v2647_v52 = vpop.f32.mrb[64].mxu0  ;;  %v1679_v13 = vadd.f32 %v2587_v38, %v4805_v6 }
 0x24c   : > { %v2589_v28 = vpop.f32.mrb[57].mxu1  ;;  %v2648_v44 = vpop.f32.mrb[65].mxu0 }
 0x24d   : > { %v2590_v20 = vadd.f32 %v2589_v28, %v2588_v32  ;;  %v2649_v53 = vadd.f32 %v2648_v44, %v2647_v52 }
 0x24f   : > { %v4829_v11 = vadd.f32 %v2649_v53, %v1679_v13  ;;  %v2591_v54 = vpop.f32.mrb[58].mxu1  ;;  %v2650_v29 = vpop.f32.mrb[66].mxu0  ;;  %v1684_v17 = vadd.f32 %v2590_v20, %v4805_v6 }
 0x250   : > { %v2592_v47 = vpop.f32.mrb[59].mxu1  ;;  %v2651_v58 = vpop.f32.mrb[67].mxu0 }
 0x251   : > { %v2593_v23 = vadd.f32 %v2592_v47, %v2591_v54  ;;  %v2652_v35 = vadd.f32 %v2651_v58, %v2650_v29 }
 0x253   : > { %v4832_v59 = vadd.f32 %v2652_v35, %v1684_v17  ;;  %v2653_v62 = vpop.f32.mrb[68].mxu0  ;;  %v2688_v18 = vpop.f32.mrb[60].mxu1  ;;  %v1689_v5 = vadd.f32 %v2593_v23, %v4805_v6 }
 0x254   : > { %v2654_v26 = vpop.f32.mrb[69].mxu0  ;;  %v2689_v2 = vpop.f32.mrb[61].mxu1 }
 0x255   : > { %v2655_v1 = vadd.f32 %v2654_v26, %v2653_v62  ;;  %v2690_v48 = vadd.f32 %v2689_v2, %v2688_v18 }
 0x257   : > { %v4835_v49 = vadd.f32 %v2655_v1, %v1689_v5  ;;  %v1874_v7 = vadd.f32 %v2690_v48, %v4808_v43  ;;  %v2691_v46 = vpop.f32.mrb[62].mxu1  ;;  %v2750_v34 = vpop.f32.mrb[70].mxu0 }
 0x258   : > { %v2692_v9 = vpop.f32.mrb[63].mxu1  ;;  %v2751_v42 = vpop.f32.mrb[71].mxu0 }
 0x259   : > { %v2693_v30 = vadd.f32 %v2692_v9, %v2691_v46  ;;  %v2752_v31 = vadd.f32 %v2751_v42, %v2750_v34 }
 0x25b   : > { %v1879_v4 = vadd.f32 %v2693_v30, %v4811_v56  ;;  %v2694_v33 = vpop.f32.mrb[64].mxu1  ;;  %v2753_v25 = vpop.f32.mrb[72].mxu0  ;;  %v4839_v55 = vadd.f32 %v2752_v31, %v1874_v7 }
 0x25c   : > { %v2695_v41 = vpop.f32.mrb[65].mxu1  ;;  %v2754_v6 = vpop.f32.mrb[73].mxu0 }
 0x25d   : > { %v2696_v22 = vadd.f32 %v2695_v41, %v2694_v33  ;;  %v2755_v14 = vadd.f32 %v2754_v6, %v2753_v25 }
 0x25f   : > { %v1884_v19 = vadd.f32 %v2696_v22, %v4814_v36  ;;  %v2697_v40 = vpop.f32.mrb[66].mxu1  ;;  %v2756_v43 = vpop.f32.mrb[74].mxu0  ;;  %v1994_v60 = vadd.f32 %v2755_v14, %v1879_v4 }
 0x260   : > { %v2698_v24 = vpop.f32.mrb[67].mxu1  ;;  %v2757_v21 = vpop.f32.mrb[75].mxu0 }
 0x261   : > { %v2699_v3 = vadd.f32 %v2698_v24, %v2697_v40  ;;  %v2758_v38 = vadd.f32 %v2757_v21, %v2756_v43 }
 0x263   : > { %v1889_v39 = vadd.f32 %v2699_v3, %v4817_v8  ;;  %v2700_v56 = vpop.f32.mrb[68].mxu1  ;;  %v2759_v32 = vpop.f32.mrb[76].mxu0  ;;  %v4843_v52 = vadd.f32 %v2758_v38, %v1884_v19 }
 0x264   : > { %v2701_v28 = vpop.f32.mrb[69].mxu1  ;;  %v2760_v44 = vpop.f32.mrb[77].mxu0 }
 0x265   : > { %v2702_v13 = vadd.f32 %v2701_v28, %v2700_v56  ;;  %v2761_v20 = vadd.f32 %v2760_v44, %v2759_v32 }
 0x267   : > { %v1894_v53 = vadd.f32 %v2702_v13, %v4820_v61  ;;  %v2703_v36 = vpop.f32.mrb[70].mxu1  ;;  %v2762_v54 = vpop.f32.mrb[78].mxu0  ;;  %v2004_v29 = vadd.f32 %v2761_v20, %v1889_v39  ;;  %v2152_v13 = vld [vmem:[%s3474_s9 + $0xb] sm:$0xff]  ;;  %v2155_v20 = vld [vmem:[%s3474_s9 + $0x23] sm:$0xff] }
 0x268   : > { %v2704_v47 = vpop.f32.mrb[71].mxu1  ;;  %v2763_v58 = vpop.f32.mrb[79].mxu0 }
 0x269   : > { %v2705_v17 = vadd.f32 %v2704_v47, %v2703_v36  ;;  %v2764_v23 = vadd.f32 %v2763_v58, %v2762_v54  ;;  %v2157_v47 = vld [vmem:[%s3474_s9 + $0x33] sm:$0xff]  ;;  %v2156_v58 = vld [vmem:[%s3474_s9 + $0x2b] sm:$0xff] }
 0x26b   : > { %v1899_v35 = vadd.f32 %v2705_v17, %v4823_v27  ;;  %v2706_v8 = vpop.f32.mrb[72].mxu1  ;;  %v2765_v62 = vpop.f32.mrb[80].mxu0  ;;  %v4847_v18 = vadd.f32 %v2764_v23, %v1894_v53  ;;  %v2154_v53 = vld [vmem:[%s3474_s9 + $0x1b] sm:$0xff] }
 0x26c   : > { %v2707_v26 = vpop.f32.mrb[73].mxu1  ;;  %v2766_v2 = vpop.f32.mrb[81].mxu0  ;;  %v2158_v23 = vld [vmem:[%s3474_s9 + $0x3b] sm:$0xff] }
 0x26d   : > { %v2708_v5 = vadd.f32 %v2707_v26, %v2706_v8  ;;  %v2767_v1 = vadd.f32 %v2766_v2, %v2765_v62  ;;  %v2160_v8 = vld [vmem:[%s3474_s9 + $0x4b] sm:$0xff] }
 0x26f   : > { %v1904_v48 = vadd.f32 %v2708_v5, %v4826_v37  ;;  %v2709_v61 = vpop.f32.mrb[74].mxu1  ;;  %v2768_v7 = vpop.f32.mrb[82].mxu0  ;;  %v2014_v46 = vadd.f32 %v2767_v1, %v1899_v35  ;;  %v2161_v35 = vld [vmem:[%s3474_s9 + $0x53] sm:$0xff] }
 0x270   : > { %v2710_v34 = vpop.f32.mrb[75].mxu1  ;;  %v2769_v9 = vpop.f32.mrb[83].mxu0 }
 0x271   : > { %v2711_v42 = vadd.f32 %v2710_v34, %v2709_v61  ;;  %v2770_v30 = vadd.f32 %v2769_v9, %v2768_v7 }
 0x273   : > { %v1909_v31 = vadd.f32 %v2711_v42, %v4829_v11  ;;  %v2712_v27 = vpop.f32.mrb[76].mxu1  ;;  %v2771_v4 = vpop.f32.mrb[84].mxu0  ;;  %v2019_v33 = vadd.f32 %v2770_v30, %v1904_v48 }
 0x274   : > { %v2713_v25 = vpop.f32.mrb[77].mxu1  ;;  %v2772_v41 = vpop.f32.mrb[85].mxu0 }
 0x275   : > { %v2714_v6 = vadd.f32 %v2713_v25, %v2712_v27  ;;  %v2773_v22 = vadd.f32 %v2772_v41, %v2771_v4 }
 0x277   : > { %v1914_v14 = vadd.f32 %v2714_v6, %v4832_v59  ;;  %v2715_v37 = vpop.f32.mrb[78].mxu1  ;;  %v2774_v19 = vpop.f32.mrb[86].mxu0  ;;  %v2024_v40 = vadd.f32 %v2773_v22, %v1909_v31  ;;  %v2153_v59 = vld [vmem:[%s3474_s9 + $0x13] sm:$0xff] }
 0x278   : > { %v2716_v43 = vpop.f32.mrb[79].mxu1  ;;  %v2775_v24 = vpop.f32.mrb[87].mxu0 }
 0x279   : > { %v2717_v11 = vadd.f32 %v2716_v43, %v2715_v37  ;;  %v2776_v21 = vadd.f32 %v2775_v24, %v2774_v19 }
 0x27b   : > { %v1919_v3 = vadd.f32 %v2717_v11, %v4835_v49  ;;  %v2777_v38 = vpop.f32.mrb[88].mxu0  ;;  %v2887_v39 = vpop.f32.mrb[80].mxu1  ;;  %v2029_v56 = vadd.f32 %v2776_v21, %v1914_v14  ;;  %v2159_v49 = vld [vmem:[%s3474_s9 + $0x43] sm:$0xff] }
 0x27c   : > { %v2109_v32 = vadd.f32 %v2887_v39, %v1994_v60  ;;  %v2778_v28 = vpop.f32.mrb[89].mxu0  ;;  %v2103_v44 = vpop.f32.mrb[81].mxu1 }
 0x27d   : > { %v2779_v36 = vadd.f32 %v2778_v28, %v2777_v38  ;;  %v2104_v54 = vadd.f32 %v2103_v44, %v4839_v55 }
 0x27e   : > { %v2163_v17 = vadd.f32 %v2153_v59, %v2109_v32 }
 0x27f   : > { %v2162_v62 = vadd.f32 %v2152_v13, %v2104_v54  ;;  %v2890_v26 = vpop.f32.mrb[82].mxu1  ;;  %v2034_v60 = vadd.f32 %v2779_v36, %v1919_v3 }
 0x280   : > { %v2173_v2 = vsel %vm4391_vm13, %v2163_v17, 0.0  ;;  %v2119_v5 = vadd.f32 %v2890_v26, %v2004_v29  ;;  %v2113_v1 = vpop.f32.mrb[83].mxu1 }
 0x281   : > { %v2172_v55 = vsel %vm4406_vm15, %v2162_v62, 0.0  ;;  %v2114_v48 = vadd.f32 %v2113_v1, %v4843_v52  ;;  %2183 = vst [vmem:[%s3385_s20 + $0x13] sm:$0xff] %v2173_v2 }
 0x282   : > { %v2165_v61 = vadd.f32 %v2155_v20, %v2119_v5  ;;  %2182 = vst [vmem:[%s3385_s20 + $0xb] sm:$0xff] %v2172_v55 }
 0x283   : > { %v2164_v7 = vadd.f32 %v2154_v53, %v2114_v48  ;;  %v2893_v34 = vpop.f32.mrb[84].mxu1 }
 0x284   : > { %v2175_v9 = vsel %vm4427_vm1, %v2165_v61, 0.0  ;;  %v2129_v0 = vadd.f32 %v2893_v34, %v2014_v46  ;;  %v2123_v42 = vpop.f32.mrb[85].mxu1 }
 0x285   : > { %v2174_v29 = vsel %vm4482_vm11, %v2164_v7, 0.0  ;;  %v2124_v16 = vadd.f32 %v2123_v42, %v4847_v18  ;;  %2185 = vst [vmem:[%s3385_s20 + $0x23] sm:$0xff] %v2175_v9 }
 0x286   : > { %v2167_v30 = vadd.f32 %v2157_v47, %v2129_v0  ;;  %2184 = vst [vmem:[%s3385_s20 + $0x1b] sm:$0xff] %v2174_v29 }
 0x287   : > { %v2166_v52 = vadd.f32 %v2156_v58, %v2124_v16  ;;  %v2896_v31 = vpop.f32.mrb[86].mxu1 }
 0x288   : > { %v2177_v27 = vsel %vm4516_vm0, %v2167_v30, 0.0  ;;  %v2139_v10 = vadd.f32 %v2896_v31, %v2024_v40  ;;  %v2133_v4 = vpop.f32.mrb[87].mxu1 }
 0x289   : > { %v2176_v46 = vsel %vm4538_vm5, %v2166_v52, 0.0  ;;  %v2134_v25 = vadd.f32 %v2133_v4, %v2019_v33  ;;  %2187 = vst [vmem:[%s3385_s20 + $0x33] sm:$0xff] %v2177_v27 }
 0x28a   : > { %v2169_v57 = vadd.f32 %v2159_v49, %v2139_v10  ;;  %2186 = vst [vmem:[%s3385_s20 + $0x2b] sm:$0xff] %v2176_v46 }
 0x28b   : > { %v2168_v18 = vadd.f32 %v2158_v23, %v2134_v25  ;;  %v2899_v41 = vpop.f32.mrb[88].mxu1 }
 0x28c   : > { %v2179_v6 = vsel %vm4585_vm8, %v2169_v57, 0.0  ;;  %v2149_v12 = vadd.f32 %v2899_v41, %v2034_v60  ;;  %v2143_v22 = vpop.f32.mrb[89].mxu1 }
 0x28d   : > { %v2178_v14 = vsel %vm4593_vm9, %v2168_v18, 0.0  ;;  %v2144_v37 = vadd.f32 %v2143_v22, %v2029_v56  ;;  %2189 = vst [vmem:[%s3385_s20 + $0x43] sm:$0xff] %v2179_v6 }
 0x28e   : > { %v2171_v50 = vadd.f32 %v2161_v35, %v2149_v12  ;;  %2188 = vst [vmem:[%s3385_s20 + $0x3b] sm:$0xff] %v2178_v14 }
 0x28f   : > { %v2170_v33 = vadd.f32 %v2160_v8, %v2144_v37 }
 0x290   : > { %v2181_v19 = vsel %vm4632_vm12, %v2171_v50, 0.0 }
 0x291   : > { %v2180_v40 = vsel %vm4643_vm14, %v2170_v33, 0.0  ;;  %2191 = vst [vmem:[%s3385_s20 + $0x53] sm:$0xff] %v2181_v19 }
 0x292   : > { %2190 = vst [vmem:[%s3385_s20 + $0x4b] sm:$0xff] %v2180_v40 }
 0x293 PF: > { %s15_s18 = sadd.s32 1, %s3267_s18  }
 0x294   : > { %p12_p4 = scmp.ge.s32.totalorder %s15_s18, 4  }
 0x296   :  { %14 = sbr.rel (!%p12_p4) target bundleno = 1 (0x1), region = 70 }

</bundles_post_ra>
